<compile_context>
chip_gen: v7x
topology: tpu7x:2x2x1
jax: 0.10.0
libtpu: 0.0.40
codegen_flags: <defaults>
</compile_context>

<pallas_src>
import numpy as np
import jax
import jax.numpy as jnp
from jax import lax
from jax.experimental import pallas as pl
from jax.experimental.pallas import tpu as pltpu

BINS = 256
_NT_DIMS = (((1,), (1,)), ((), ()))  # contract the pixel (lane) axis of both operands


def _hist_loss_kernel(x_ref, y_ref, ms_ref, mt_ref, out_ref, hd_ref, hr_ref, tbl_ref):
    """Two-phase per-channel histogram matching.

    Block shapes:
      x_ref, y_ref  : (1, 1, TP)  generator / target pixel tile of one channel
      ms_ref, mt_ref: (1, TP)     source / target mask tiles (shared across channels)
      out_ref       : (1, 1, 128) per-channel masked sum |input_masked - input_match|
    Scratch:
      hd_ref, hr_ref: (1, 256)    masked histograms (source / target), f32 exact counts
      tbl_ref       : (1, 256)    histogram-matching transfer table
    """
    f32 = jnp.float32
    bf16 = jnp.bfloat16
    ph = pl.program_id(1)          # 0: histogram accumulation, 1: LUT apply + loss
    t = pl.program_id(2)           # pixel tile
    nt = pl.num_programs(2)

    bins_col = lax.broadcasted_iota(jnp.int32, (BINS, 1), 0).astype(f32)   # (256, 1)

    def denorm255(v):              # de_norm: (v+1)/2 clamped to [0,1], scaled to [0,255]
        return jnp.clip((v + 1.0) * 0.5, 0.0, 1.0) * 255.0

    # Source-tile quantities shared by both phases.
    x = x_ref[0]                               # (1, TP)
    ms = ms_ref[...]                           # (1, TP)
    ms_nz = ms != 0.0
    im = denorm255(x) * ms                     # input_masked
    # Single floor-equality onehot for this tile: used for the histogram (phase 0) and the
    # LUT application (phase 1); the mask is folded in via the MXU contraction, not a VPU AND.
    eq_im = (bins_col == jnp.floor(im)).astype(bf16)          # (256, TP), exact 0/1

    @pl.when(jnp.logical_and(ph == 0, t == 0))
    def _init():
        hd_ref[...] = jnp.zeros_like(hd_ref)
        hr_ref[...] = jnp.zeros_like(hr_ref)
        out_ref[...] = jnp.zeros_like(out_ref)

    @pl.when(ph == 0)
    def _accumulate_hists():
        y = y_ref[0]
        mt = mt_ref[...]
        tm = denorm255(y) * mt                                 # target_masked
        eq_tm = (bins_col == jnp.floor(tm)).astype(bf16)       # (256, TP)
        ms_nz_b = ms_nz.astype(bf16)                           # (1, TP) 0/1
        mt_nz_b = (mt != 0.0).astype(bf16)
        # Masked 256-bin histograms on the MXU: hist[b] = sum_p onehot[b,p] * nz[p].
        hd_ref[...] += lax.dot_general(ms_nz_b, eq_im, _NT_DIMS,
                                       preferred_element_type=f32)     # (1, 256)
        hr_ref[...] += lax.dot_general(mt_nz_b, eq_tm, _NT_DIMS,
                                       preferred_element_type=f32)     # (1, 256)

    @pl.when(jnp.logical_and(ph == 0, t == nt - 1))
    def _build_table():
        hd = hd_ref[...]                                   # (1, 256) source counts
        hr = hr_ref[...]                                   # (1, 256) target counts
        # Guard all-zero masks (PyTorch would NaN; here the loss is 0 anyway since nothing is masked).
        k_dst = jnp.maximum(jnp.sum(hd), 1.0)
        k_ref = jnp.maximum(jnp.sum(hr), 1.0)

        ii = lax.broadcasted_iota(jnp.int32, (BINS, BINS), 0)   # sublane index r
        jj = lax.broadcasted_iota(jnp.int32, (BINS, BINS), 1)   # lane index    l
        eye = (ii == jj).astype(f32)
        gt = (ii > jj).astype(f32)                          # [r,l] = 1 if r >  l
        ge = gt + eye                                       # [r,l] = 1 if r >= l
        le = 1.0 - gt                                       # [r,l] = 1 if r <= l

        # Exact cumulative counts (0/1 mask reductions of integer counts), laid out for the
        # table build: dst cdf indexed by i along lanes, ref cdf indexed by j along sublanes.
        hd_col = jnp.sum(hd * eye, axis=1, keepdims=True)             # (256,1)  hd transposed
        dst_cum_row = jnp.sum(hd_col * le, axis=0, keepdims=True)     # (1,256)  sum_{b<=i} hd[b]
        ref_cum_col = jnp.sum(hr * ge, axis=1, keepdims=True)         # (256,1)  sum_{b<=j} hr[b]
        ref_prev_col = jnp.sum(hr * gt, axis=1, keepdims=True)        # (256,1)  sum_{b<j}  hr[b]

        dst_cdf = dst_cum_row / k_dst                                 # (1,256)  cdf_dst[i]
        ref_cdf = ref_cum_col / k_ref                                 # (256,1)  cdf_ref[j]
        ref_prev = ref_prev_col / k_ref                               # (256,1)  cdf_ref[j-1]

        # cal_trans: table[i] = smallest j in [1,255] with cdf_ref[j-1] <= cdf_dst[i] <= cdf_ref[j];
        # identity when no j matches; table[0] untouched; table[255] pinned to 255.
        cond = (dst_cdf >= ref_prev) & (dst_cdf <= ref_cdf) & (ii >= 1)   # (256,256), rows = j
        first_j = jnp.min(jnp.where(cond, ii.astype(f32), float(BINS)),
                          axis=0, keepdims=True)                          # (1,256)
        i_row = lax.broadcasted_iota(jnp.int32, (1, BINS), 1).astype(f32)
        table = jnp.where(first_j < float(BINS), first_j, i_row)
        table = jnp.where(i_row == 0.0, 0.0, table)
        table = jnp.where(i_row == float(BINS - 1), float(BINS - 1), table)
        tbl_ref[...] = table

    @pl.when(ph == 1)
    def _apply_and_reduce():
        table_b = tbl_ref[...].astype(bf16)                # integers <= 255: exact in bf16
        # LUT application on the MXU: lut[p] = table[floor(im[p])]  (one 1 per onehot column).
        lut = jnp.dot(table_b, eq_im, preferred_element_type=f32)    # (1, TP)
        diff = jnp.where(ms_nz, jnp.abs(im - lut), 0.0)
        out_ref[...] += jnp.sum(diff)


def histogram_loss(input_data, target_data, mask_src, mask_tar, *, tile=2048):
    """JAX/Pallas equivalent of HistogramLoss.forward (returns a scalar f32 loss)."""
    _, C, H, W = input_data.shape
    P = H * W

    # Pixel tile: multiple of 128, bounded so the (256, tile) bf16 onehots stay small in VMEM.
    tile = max(128, (min(tile, P) // 128) * 128)
    nt = -(-P // tile)
    p_pad = nt * tile

    x = input_data.reshape(C, 1, P).astype(jnp.float32)
    y = target_data.reshape(C, 1, P).astype(jnp.float32)
    ms = mask_src.reshape(1, P).astype(jnp.float32)
    mt = mask_tar.reshape(1, P).astype(jnp.float32)
    pad = p_pad - P
    if pad:
        # Padded pixels get mask 0 -> excluded from histograms and from the loss.
        x = jnp.pad(x, ((0, 0), (0, 0), (0, pad)))
        y = jnp.pad(y, ((0, 0), (0, 0), (0, pad)))
        ms = jnp.pad(ms, ((0, 0), (0, pad)))
        mt = jnp.pad(mt, ((0, 0), (0, pad)))

    per_channel = pl.pallas_call(
        _hist_loss_kernel,
        out_shape=jax.ShapeDtypeStruct((C, 1, 128), jnp.float32),
        grid_spec=pltpu.PrefetchScalarGridSpec(
            num_scalar_prefetch=0,
            grid=(C, 2, nt),                      # channel x phase x pixel-tile
            in_specs=[
                pl.BlockSpec((1, 1, tile), lambda c, ph, t: (c, 0, t)),   # input channel tile
                pl.BlockSpec((1, 1, tile), lambda c, ph, t: (c, 0, t)),   # target channel tile
                pl.BlockSpec((1, tile), lambda c, ph, t: (0, t)),         # mask_src tile (shared)
                pl.BlockSpec((1, tile), lambda c, ph, t: (0, t)),         # mask_tar tile (shared)
            ],
            out_specs=pl.BlockSpec((1, 1, 128), lambda c, ph, t: (c, 0, 0)),
            scratch_shapes=[
                pltpu.VMEM((1, BINS), jnp.float32),   # source histogram accumulator
                pltpu.VMEM((1, BINS), jnp.float32),   # target histogram accumulator
                pltpu.VMEM((1, BINS), jnp.float32),   # transfer table
            ],
        ),
        compiler_params=pltpu.CompilerParams(
            dimension_semantics=("parallel", "arbitrary", "arbitrary")),
    )(x, y, ms, mt)

    # F.l1_loss(..., reduction='mean') over the (3, H, W) tensor.
    return jnp.sum(per_channel[:, 0, 0]) / (C * P)


def _reference_loss(input_data, target_data, mask_src, mask_tar):
    """Pure numpy re-implementation mirroring the PyTorch module's semantics."""
    x = np.asarray(input_data, dtype=np.float32)[0]   # (3, H, W)
    y = np.asarray(target_data, dtype=np.float32)[0]
    ms = np.asarray(mask_src, dtype=np.float32)[0]    # (H, W)
    mt = np.asarray(mask_tar, dtype=np.float32)[0]

    def denorm255(v):
        return np.clip((v + 1.0) * 0.5, 0.0, 1.0) * np.float32(255.0)

    im = denorm255(x) * ms[None]
    tm = denorm255(y) * mt[None]
    xs, ys = np.nonzero(ms)
    xt, yt = np.nonzero(mt)

    matched = im.copy()
    for c in range(3):
        dvals = im[c, xs, ys]
        rvals = tm[c, xt, yt]
        hd = np.bincount(np.floor(dvals).astype(np.int64), minlength=BINS)[:BINS].astype(np.float32)
        hr = np.bincount(np.floor(rvals).astype(np.int64), minlength=BINS)[:BINS].astype(np.float32)
        cdf_d = (np.cumsum(hd, dtype=np.float32) / np.float32(hd.sum())).astype(np.float32)
        cdf_r = (np.cumsum(hr, dtype=np.float32) / np.float32(hr.sum())).astype(np.float32)
        table = list(range(BINS))
        for i in range(1, BINS):
            for j in range(1, BINS):
                if cdf_d[i] >= cdf_r[j - 1] and cdf_d[i] <= cdf_r[j]:
                    table[i] = j
                    break
        table[BINS - 1] = BINS - 1
        table = np.asarray(table, dtype=np.float32)
        matched[c, xs, ys] = table[np.floor(dvals).astype(np.int64)]
    return float(np.mean(np.abs(im - matched)))


if __name__ == "__main__":
    key = jax.random.PRNGKey(0)
    k1, k2, k3, k4 = jax.random.split(key, 4)
    H = 16
    input_data = jax.random.normal(k1, (1, 3, H, H), dtype=jnp.float32)
    target_data = jax.random.normal(k2, (1, 3, H, H), dtype=jnp.float32)
    mask_src = (jax.random.uniform(k3, (1, H, H)) > 0.3).astype(jnp.float32)
    mask_tar = (jax.random.uniform(k4, (1, H, H)) > 0.3).astype(jnp.float32)

    # Exercise both the multi-tile accumulation path (2 pixel tiles) and the single-tile path.
    loss_tiled = jax.block_until_ready(
        histogram_loss(input_data, target_data, mask_src, mask_tar, tile=128))
    loss_full = jax.block_until_ready(
        histogram_loss(input_data, target_data, mask_src, mask_tar))

    ref = _reference_loss(input_data, target_data, mask_src, mask_tar)
    for name, got in (("tiled", loss_tiled), ("full", loss_full)):
        if not np.isclose(float(got), ref, rtol=1e-3, atol=1e-3):
            raise AssertionError(f"mismatch ({name}): pallas={float(got)} ref={ref}")
    print("KERNEL_OK")
</pallas_src>

<mosaic_0001>
module attributes {stable_mosaic.version = 11 : i64} {
  func.func @_hist_loss_kernel(%arg0: i32, %arg1: i32, %arg2: i32, %arg3: memref<1x1x128xf32, #tpu.memory_space<vmem>>, %arg4: memref<1x1x128xf32, #tpu.memory_space<vmem>>, %arg5: memref<1x128xf32, #tpu.memory_space<vmem>>, %arg6: memref<1x128xf32, #tpu.memory_space<vmem>>, %arg7: memref<1x1x128xf32, #tpu.memory_space<vmem>>, %arg8: memref<1x256xf32, #tpu.memory_space<vmem>>, %arg9: memref<1x256xf32, #tpu.memory_space<vmem>>, %arg10: memref<1x256xf32, #tpu.memory_space<vmem>>) attributes {dimension_semantics = [#tpu.dimension_semantics<parallel>, #tpu.dimension_semantics<arbitrary>, #tpu.dimension_semantics<arbitrary>], iteration_bounds = array<i64: 3, 2, 2>, scalar_prefetch = 0 : i64, scratch_operands = 3 : i64, tpu.core_type = #tpu.core_type<tc>, window_params = [{transform_indices = @transform_0, window_bounds = array<i64: 1, 1, 128>}, {transform_indices = @transform_1, window_bounds = array<i64: 1, 1, 128>}, {transform_indices = @transform_2, window_bounds = array<i64: 1, 128>}, {transform_indices = @transform_3, window_bounds = array<i64: 1, 128>}, {transform_indices = @transform_4, window_bounds = array<i64: 1, 1, 128>}]} {
    %0 = tpu.iota {dimensions = array<i32: 0>} : vector<256x1xi32>
    %1 = arith.sitofp %0 : vector<256x1xi32> to vector<256x1xf32>
    %c0 = arith.constant 0 : index
    %c0_0 = arith.constant 0 : index
    %c0_1 = arith.constant 0 : index
    %2 = vector.load %arg3[%c0, %c0_0, %c0_1] : memref<1x1x128xf32, #tpu.memory_space<vmem>>, vector<1x1x128xf32>
    %3 = vector.shape_cast %2 : vector<1x1x128xf32> to vector<1x128xf32>
    %c0_2 = arith.constant 0 : index
    %c0_3 = arith.constant 0 : index
    %4 = vector.load %arg5[%c0_2, %c0_3] : memref<1x128xf32, #tpu.memory_space<vmem>>, vector<1x128xf32>
    %cst = arith.constant 0.000000e+00 : f32
    %5 = vector.broadcast %cst : f32 to vector<1x128xf32>
    %6 = arith.cmpf one, %4, %5 : vector<1x128xf32>
    %cst_4 = arith.constant 1.000000e+00 : f32
    %7 = vector.broadcast %cst_4 : f32 to vector<1x128xf32>
    %8 = arith.addf %3, %7 : vector<1x128xf32>
    %cst_5 = arith.constant 5.000000e-01 : f32
    %9 = vector.broadcast %cst_5 : f32 to vector<1x128xf32>
    %10 = arith.mulf %8, %9 : vector<1x128xf32>
    %cst_6 = arith.constant 0.000000e+00 : f32
    %cst_7 = arith.constant 1.000000e+00 : f32
    %11 = vector.broadcast %cst_6 : f32 to vector<1x128xf32>
    %12 = arith.maximumf %11, %10 : vector<1x128xf32>
    %13 = vector.broadcast %cst_7 : f32 to vector<1x128xf32>
    %14 = arith.minimumf %13, %12 : vector<1x128xf32>
    %cst_8 = arith.constant 2.550000e+02 : f32
    %15 = vector.broadcast %cst_8 : f32 to vector<1x128xf32>
    %16 = arith.mulf %14, %15 : vector<1x128xf32>
    %17 = arith.mulf %16, %4 : vector<1x128xf32>
    %18 = math.floor %17 : vector<1x128xf32>
    %19 = vector.broadcast %1 : vector<256x1xf32> to vector<256x128xf32>
    %20 = vector.broadcast %18 : vector<1x128xf32> to vector<256x128xf32>
    %21 = arith.cmpf oeq, %19, %20 : vector<256x128xf32>
    %22 = arith.extui %21 : vector<256x128xi1> to vector<256x128xi32>
    %23 = arith.sitofp %22 : vector<256x128xi32> to vector<256x128xf32>
    %24 = arith.truncf %23 : vector<256x128xf32> to vector<256x128xbf16>
    %c0_i32 = arith.constant 0 : i32
    %25 = arith.cmpi eq, %arg1, %c0_i32 : i32
    %c0_i32_9 = arith.constant 0 : i32
    %26 = arith.cmpi eq, %arg2, %c0_i32_9 : i32
    %27 = arith.andi %25, %26 : i1
    %28 = arith.extui %27 : i1 to i32
    %c0_i32_10 = arith.constant 0 : i32
    %29 = arith.cmpi ne, %28, %c0_i32_10 : i32
    scf.if %29 {
      %cst_17 = arith.constant 0.000000e+00 : f32
      %41 = vector.broadcast %cst_17 : f32 to vector<1x256xf32>
      %c0_18 = arith.constant 0 : index
      %c0_19 = arith.constant 0 : index
      %42 = vector.load %arg8[%c0_18, %c0_19] : memref<1x256xf32, #tpu.memory_space<vmem>>, vector<1x256xf32>
      tpu.vector_store %arg8[%c0_18, %c0_19], %41 {strides = array<i32>} : memref<1x256xf32, #tpu.memory_space<vmem>>, vector<1x256xf32>,
      %cst_20 = arith.constant 0.000000e+00 : f32
      %43 = vector.broadcast %cst_20 : f32 to vector<1x256xf32>
      %c0_21 = arith.constant 0 : index
      %c0_22 = arith.constant 0 : index
      %44 = vector.load %arg9[%c0_21, %c0_22] : memref<1x256xf32, #tpu.memory_space<vmem>>, vector<1x256xf32>
      tpu.vector_store %arg9[%c0_21, %c0_22], %43 {strides = array<i32>} : memref<1x256xf32, #tpu.memory_space<vmem>>, vector<1x256xf32>,
      %cst_23 = arith.constant 0.000000e+00 : f32
      %45 = vector.broadcast %cst_23 : f32 to vector<1x1x128xf32>
      %c0_24 = arith.constant 0 : index
      %c0_25 = arith.constant 0 : index
      %c0_26 = arith.constant 0 : index
      %46 = vector.load %arg7[%c0_24, %c0_25, %c0_26] : memref<1x1x128xf32, #tpu.memory_space<vmem>>, vector<1x1x128xf32>
      tpu.vector_store %arg7[%c0_24, %c0_25, %c0_26], %45 {strides = array<i32>} : memref<1x1x128xf32, #tpu.memory_space<vmem>>, vector<1x1x128xf32>,
    } else {
    }
    %c0_i32_11 = arith.constant 0 : i32
    %30 = arith.cmpi eq, %arg1, %c0_i32_11 : i32
    %31 = arith.extui %30 : i1 to i32
    %c0_i32_12 = arith.constant 0 : i32
    %32 = arith.cmpi ne, %31, %c0_i32_12 : i32
    scf.if %32 {
      %c0_17 = arith.constant 0 : index
      %c0_18 = arith.constant 0 : index
      %c0_19 = arith.constant 0 : index
      %41 = vector.load %arg4[%c0_17, %c0_18, %c0_19] : memref<1x1x128xf32, #tpu.memory_space<vmem>>, vector<1x1x128xf32>
      %42 = vector.shape_cast %41 : vector<1x1x128xf32> to vector<1x128xf32>
      %c0_20 = arith.constant 0 : index
      %c0_21 = arith.constant 0 : index
      %43 = vector.load %arg6[%c0_20, %c0_21] : memref<1x128xf32, #tpu.memory_space<vmem>>, vector<1x128xf32>
      %cst_22 = arith.constant 1.000000e+00 : f32
      %44 = vector.broadcast %cst_22 : f32 to vector<1x128xf32>
      %45 = arith.addf %42, %44 : vector<1x128xf32>
      %cst_23 = arith.constant 5.000000e-01 : f32
      %46 = vector.broadcast %cst_23 : f32 to vector<1x128xf32>
      %47 = arith.mulf %45, %46 : vector<1x128xf32>
      %cst_24 = arith.constant 0.000000e+00 : f32
      %cst_25 = arith.constant 1.000000e+00 : f32
      %48 = vector.broadcast %cst_24 : f32 to vector<1x128xf32>
      %49 = arith.maximumf %48, %47 : vector<1x128xf32>
      %50 = vector.broadcast %cst_25 : f32 to vector<1x128xf32>
      %51 = arith.minimumf %50, %49 : vector<1x128xf32>
      %cst_26 = arith.constant 2.550000e+02 : f32
      %52 = vector.broadcast %cst_26 : f32 to vector<1x128xf32>
      %53 = arith.mulf %51, %52 : vector<1x128xf32>
      %54 = arith.mulf %53, %43 : vector<1x128xf32>
      %55 = math.floor %54 : vector<1x128xf32>
      %56 = vector.broadcast %1 : vector<256x1xf32> to vector<256x128xf32>
      %57 = vector.broadcast %55 : vector<1x128xf32> to vector<256x128xf32>
      %58 = arith.cmpf oeq, %56, %57 : vector<256x128xf32>
      %59 = arith.extui %58 : vector<256x128xi1> to vector<256x128xi32>
      %60 = arith.sitofp %59 : vector<256x128xi32> to vector<256x128xf32>
      %61 = arith.truncf %60 : vector<256x128xf32> to vector<256x128xbf16>
      %62 = arith.extui %6 : vector<1x128xi1> to vector<1x128xi32>
      %63 = arith.sitofp %62 : vector<1x128xi32> to vector<1x128xf32>
      %64 = arith.truncf %63 : vector<1x128xf32> to vector<1x128xbf16>
      %cst_27 = arith.constant 0.000000e+00 : f32
      %65 = vector.broadcast %cst_27 : f32 to vector<1x128xf32>
      %66 = arith.cmpf one, %43, %65 : vector<1x128xf32>
      %67 = arith.extui %66 : vector<1x128xi1> to vector<1x128xi32>
      %68 = arith.sitofp %67 : vector<1x128xi32> to vector<1x128xf32>
      %69 = arith.truncf %68 : vector<1x128xf32> to vector<1x128xbf16>
      %c0_28 = arith.constant 0 : index
      %c0_29 = arith.constant 0 : index
      %70 = vector.load %arg8[%c0_28, %c0_29] : memref<1x256xf32, #tpu.memory_space<vmem>>, vector<1x256xf32>
      %cst_30 = arith.constant dense<0.000000e+00> : vector<1x256xf32>
      %71 = tpu.matmul %64, %24, %cst_30 {dimension_numbers = #tpu.dot_dimension_numbers<[1], [1], [0], [0], [0, 0, 1, 0], [], []>} : vector<1x128xbf16>, vector<256x128xbf16>, vector<1x256xf32> -> vector<1x256xf32>
      %72 = arith.addf %70, %71 : vector<1x256xf32>
      %c0_31 = arith.constant 0 : index
      %c0_32 = arith.constant 0 : index
      %73 = vector.load %arg8[%c0_31, %c0_32] : memref<1x256xf32, #tpu.memory_space<vmem>>, vector<1x256xf32>
      tpu.vector_store %arg8[%c0_31, %c0_32], %72 {strides = array<i32>} : memref<1x256xf32, #tpu.memory_space<vmem>>, vector<1x256xf32>,
      %c0_33 = arith.constant 0 : index
      %c0_34 = arith.constant 0 : index
      %74 = vector.load %arg9[%c0_33, %c0_34] : memref<1x256xf32, #tpu.memory_space<vmem>>, vector<1x256xf32>
      %cst_35 = arith.constant dense<0.000000e+00> : vector<1x256xf32>
      %75 = tpu.matmul %69, %61, %cst_35 {dimension_numbers = #tpu.dot_dimension_numbers<[1], [1], [0], [0], [0, 0, 1, 0], [], []>} : vector<1x128xbf16>, vector<256x128xbf16>, vector<1x256xf32> -> vector<1x256xf32>
      %76 = arith.addf %74, %75 : vector<1x256xf32>
      %c0_36 = arith.constant 0 : index
      %c0_37 = arith.constant 0 : index
      %77 = vector.load %arg9[%c0_36, %c0_37] : memref<1x256xf32, #tpu.memory_space<vmem>>, vector<1x256xf32>
      tpu.vector_store %arg9[%c0_36, %c0_37], %76 {strides = array<i32>} : memref<1x256xf32, #tpu.memory_space<vmem>>, vector<1x256xf32>,
    } else {
    }
    %c0_i32_13 = arith.constant 0 : i32
    %33 = arith.cmpi eq, %arg1, %c0_i32_13 : i32
    %c1_i32 = arith.constant 1 : i32
    %34 = arith.cmpi eq, %arg2, %c1_i32 : i32
    %35 = arith.andi %33, %34 : i1
    %36 = arith.extui %35 : i1 to i32
    %c0_i32_14 = arith.constant 0 : i32
    %37 = arith.cmpi ne, %36, %c0_i32_14 : i32
    scf.if %37 {
      %c0_17 = arith.constant 0 : index
      %c0_18 = arith.constant 0 : index
      %41 = vector.load %arg8[%c0_17, %c0_18] : memref<1x256xf32, #tpu.memory_space<vmem>>, vector<1x256xf32>
      %c0_19 = arith.constant 0 : index
      %c0_20 = arith.constant 0 : index
      %42 = vector.load %arg9[%c0_19, %c0_20] : memref<1x256xf32, #tpu.memory_space<vmem>>, vector<1x256xf32>
      %43 = vector.shape_cast %41 : vector<1x256xf32> to vector<1x1x256xf32>
      %cst_21 = arith.constant dense<0.000000e+00> : vector<1xf32>
      %44 = vector.multi_reduction <add>, %43, %cst_21 [1, 2] : vector<1x1x256xf32> to vector<1xf32>
      %45 = vector.shape_cast %44 : vector<1xf32> to vector<1x1x1xf32>
      %46 = vector.extract %45[0, 0, 0] : f32 from vector<1x1x1xf32>
      %cst_22 = arith.constant 1.000000e+00 : f32
      %47 = arith.maximumf %46, %cst_22 : f32
      %48 = vector.shape_cast %42 : vector<1x256xf32> to vector<1x1x256xf32>
      %cst_23 = arith.constant dense<0.000000e+00> : vector<1xf32>
      %49 = vector.multi_reduction <add>, %48, %cst_23 [1, 2] : vector<1x1x256xf32> to vector<1xf32>
      %50 = vector.shape_cast %49 : vector<1xf32> to vector<1x1x1xf32>
      %51 = vector.extract %50[0, 0, 0] : f32 from vector<1x1x1xf32>
      %cst_24 = arith.constant 1.000000e+00 : f32
      %52 = arith.maximumf %51, %cst_24 : f32
      %53 = tpu.iota {dimensions = array<i32: 0>} : vector<256x256xi32>
      %54 = tpu.iota {dimensions = array<i32: 1>} : vector<256x256xi32>
      %55 = arith.cmpi eq, %53, %54 : vector<256x256xi32>
      %56 = arith.extui %55 : vector<256x256xi1> to vector<256x256xi32>
      %57 = arith.sitofp %56 : vector<256x256xi32> to vector<256x256xf32>
      %58 = arith.cmpi sgt, %53, %54 : vector<256x256xi32>
      %59 = arith.extui %58 : vector<256x256xi1> to vector<256x256xi32>
      %60 = arith.sitofp %59 : vector<256x256xi32> to vector<256x256xf32>
      %61 = arith.addf %60, %57 : vector<256x256xf32>
      %cst_25 = arith.constant 1.000000e+00 : f32
      %62 = vector.broadcast %cst_25 : f32 to vector<256x256xf32>
      %63 = arith.subf %62, %60 : vector<256x256xf32>
      %64 = vector.broadcast %41 : vector<1x256xf32> to vector<256x256xf32>
      %65 = arith.mulf %64, %57 : vector<256x256xf32>
      %cst_26 = arith.constant dense<0.000000e+00> : vector<256xf32>
      %66 = vector.multi_reduction <add>, %65, %cst_26 [1] : vector<256x256xf32> to vector<256xf32>
      %67 = vector.shape_cast %66 : vector<256xf32> to vector<256x1xf32>
      %68 = vector.broadcast %67 : vector<256x1xf32> to vector<256x256xf32>
      %69 = arith.mulf %68, %63 : vector<256x256xf32>
      %cst_27 = arith.constant dense<0.000000e+00> : vector<256xf32>
      %70 = vector.multi_reduction <add>, %69, %cst_27 [0] : vector<256x256xf32> to vector<256xf32>
      %71 = vector.shape_cast %70 : vector<256xf32> to vector<1x256xf32>
      %72 = vector.broadcast %42 : vector<1x256xf32> to vector<256x256xf32>
      %73 = arith.mulf %72, %61 : vector<256x256xf32>
      %cst_28 = arith.constant dense<0.000000e+00> : vector<256xf32>
      %74 = vector.multi_reduction <add>, %73, %cst_28 [1] : vector<256x256xf32> to vector<256xf32>
      %75 = vector.shape_cast %74 : vector<256xf32> to vector<256x1xf32>
      %76 = vector.broadcast %42 : vector<1x256xf32> to vector<256x256xf32>
      %77 = arith.mulf %76, %60 : vector<256x256xf32>
      %cst_29 = arith.constant dense<0.000000e+00> : vector<256xf32>
      %78 = vector.multi_reduction <add>, %77, %cst_29 [1] : vector<256x256xf32> to vector<256xf32>
      %79 = vector.shape_cast %78 : vector<256xf32> to vector<256x1xf32>
      %80 = vector.broadcast %47 : f32 to vector<1x256xf32>
      %81 = arith.divf %71, %80 : vector<1x256xf32>
      %82 = vector.broadcast %52 : f32 to vector<256x1xf32>
      %83 = arith.divf %75, %82 : vector<256x1xf32>
      %84 = vector.broadcast %52 : f32 to vector<256x1xf32>
      %85 = arith.divf %79, %84 : vector<256x1xf32>
      %86 = vector.broadcast %81 : vector<1x256xf32> to vector<256x256xf32>
      %87 = vector.broadcast %85 : vector<256x1xf32> to vector<256x256xf32>
      %88 = arith.cmpf oge, %86, %87 : vector<256x256xf32>
      %89 = vector.broadcast %81 : vector<1x256xf32> to vector<256x256xf32>
      %90 = vector.broadcast %83 : vector<256x1xf32> to vector<256x256xf32>
      %91 = arith.cmpf ole, %89, %90 : vector<256x256xf32>
      %92 = arith.andi %88, %91 : vector<256x256xi1>
      %c1_i32_30 = arith.constant 1 : i32
      %93 = vector.broadcast %c1_i32_30 : i32 to vector<256x256xi32>
      %94 = arith.cmpi sge, %53, %93 : vector<256x256xi32>
      %95 = arith.andi %92, %94 : vector<256x256xi1>
      %96 = arith.sitofp %53 : vector<256x256xi32> to vector<256x256xf32>
      %cst_31 = arith.constant 2.560000e+02 : f32
      %97 = vector.broadcast %cst_31 : f32 to vector<256x256xf32>
      %98 = arith.select %95, %96, %97 : vector<256x256xi1>, vector<256x256xf32>
      %cst_32 = arith.constant dense<0x7F800000> : vector<256xf32>
      %99 = vector.multi_reduction <minimumf>, %98, %cst_32 [0] : vector<256x256xf32> to vector<256xf32>
      %100 = vector.shape_cast %99 : vector<256xf32> to vector<1x256xf32>
      %101 = tpu.iota {dimensions = array<i32: 1>} : vector<1x256xi32>
      %102 = arith.sitofp %101 : vector<1x256xi32> to vector<1x256xf32>
      %cst_33 = arith.constant 2.560000e+02 : f32
      %103 = vector.broadcast %cst_33 : f32 to vector<1x256xf32>
      %104 = arith.cmpf olt, %100, %103 : vector<1x256xf32>
      %105 = arith.select %104, %100, %102 : vector<1x256xi1>, vector<1x256xf32>
      %cst_34 = arith.constant 0.000000e+00 : f32
      %106 = vector.broadcast %cst_34 : f32 to vector<1x256xf32>
      %107 = arith.cmpf oeq, %102, %106 : vector<1x256xf32>
      %cst_35 = arith.constant 0.000000e+00 : f32
      %108 = vector.broadcast %cst_35 : f32 to vector<1x256xf32>
      %109 = arith.select %107, %108, %105 : vector<1x256xi1>, vector<1x256xf32>
      %cst_36 = arith.constant 2.550000e+02 : f32
      %110 = vector.broadcast %cst_36 : f32 to vector<1x256xf32>
      %111 = arith.cmpf oeq, %102, %110 : vector<1x256xf32>
      %cst_37 = arith.constant 2.550000e+02 : f32
      %112 = vector.broadcast %cst_37 : f32 to vector<1x256xf32>
      %113 = arith.select %111, %112, %109 : vector<1x256xi1>, vector<1x256xf32>
      %c0_38 = arith.constant 0 : index
      %c0_39 = arith.constant 0 : index
      %114 = vector.load %arg10[%c0_38, %c0_39] : memref<1x256xf32, #tpu.memory_space<vmem>>, vector<1x256xf32>
      tpu.vector_store %arg10[%c0_38, %c0_39], %113 {strides = array<i32>} : memref<1x256xf32, #tpu.memory_space<vmem>>, vector<1x256xf32>,
    } else {
    }
    %c1_i32_15 = arith.constant 1 : i32
    %38 = arith.cmpi eq, %arg1, %c1_i32_15 : i32
    %39 = arith.extui %38 : i1 to i32
    %c0_i32_16 = arith.constant 0 : i32
    %40 = arith.cmpi ne, %39, %c0_i32_16 : i32
    scf.if %40 {
      %c0_17 = arith.constant 0 : index
      %c0_18 = arith.constant 0 : index
      %41 = vector.load %arg10[%c0_17, %c0_18] : memref<1x256xf32, #tpu.memory_space<vmem>>, vector<1x256xf32>
      %42 = arith.truncf %41 : vector<1x256xf32> to vector<1x256xbf16>
      %cst_19 = arith.constant dense<0.000000e+00> : vector<1x128xf32>
      %43 = tpu.matmul %42, %24, %cst_19 {dimension_numbers = #tpu.dot_dimension_numbers<[1], [0], [0], [1], [0, 0, 1, 1], [], []>} : vector<1x256xbf16>, vector<256x128xbf16>, vector<1x128xf32> -> vector<1x128xf32>
      %44 = arith.subf %17, %43 : vector<1x128xf32>
      %45 = math.absf %44 : vector<1x128xf32>
      %cst_20 = arith.constant 0.000000e+00 : f32
      %46 = vector.broadcast %cst_20 : f32 to vector<1x128xf32>
      %47 = arith.select %6, %45, %46 : vector<1x128xi1>, vector<1x128xf32>
      %c0_21 = arith.constant 0 : index
      %c0_22 = arith.constant 0 : index
      %c0_23 = arith.constant 0 : index
      %48 = vector.load %arg7[%c0_21, %c0_22, %c0_23] : memref<1x1x128xf32, #tpu.memory_space<vmem>>, vector<1x1x128xf32>
      %49 = vector.shape_cast %47 : vector<1x128xf32> to vector<1x1x128xf32>
      %cst_24 = arith.constant dense<0.000000e+00> : vector<1xf32>
      %50 = vector.multi_reduction <add>, %49, %cst_24 [1, 2] : vector<1x1x128xf32> to vector<1xf32>
      %51 = vector.shape_cast %50 : vector<1xf32> to vector<1x1x1xf32>
      %52 = vector.extract %51[0, 0, 0] : f32 from vector<1x1x1xf32>
      %53 = vector.broadcast %52 : f32 to vector<1x1x128xf32>
      %54 = arith.addf %48, %53 : vector<1x1x128xf32>
      %c0_25 = arith.constant 0 : index
      %c0_26 = arith.constant 0 : index
      %c0_27 = arith.constant 0 : index
      %55 = vector.load %arg7[%c0_25, %c0_26, %c0_27] : memref<1x1x128xf32, #tpu.memory_space<vmem>>, vector<1x1x128xf32>
      tpu.vector_store %arg7[%c0_25, %c0_26, %c0_27], %54 {strides = array<i32>} : memref<1x1x128xf32, #tpu.memory_space<vmem>>, vector<1x1x128xf32>,
    } else {
    }
    return
  }
  func.func @transform_0(%arg0: i32, %arg1: i32, %arg2: i32) -> (i32, i32, i32) {
    %c0_i32 = arith.constant 0 : i32
    %c0_i32_0 = arith.constant 0 : i32
    return %arg0, %c0_i32, %arg2 : i32, i32, i32
  }
  func.func @transform_1(%arg0: i32, %arg1: i32, %arg2: i32) -> (i32, i32, i32) {
    %c0_i32 = arith.constant 0 : i32
    %c0_i32_0 = arith.constant 0 : i32
    return %arg0, %c0_i32, %arg2 : i32, i32, i32
  }
  func.func @transform_2(%arg0: i32, %arg1: i32, %arg2: i32) -> (i32, i32) {
    %c0_i32 = arith.constant 0 : i32
    %c0_i32_0 = arith.constant 0 : i32
    return %c0_i32, %arg2 : i32, i32
  }
  func.func @transform_3(%arg0: i32, %arg1: i32, %arg2: i32) -> (i32, i32) {
    %c0_i32 = arith.constant 0 : i32
    %c0_i32_0 = arith.constant 0 : i32
    return %c0_i32, %arg2 : i32, i32
  }
  func.func @transform_4(%arg0: i32, %arg1: i32, %arg2: i32) -> (i32, i32, i32) {
    %c0_i32 = arith.constant 0 : i32
    %c0_i32_0 = arith.constant 0 : i32
    %c0_i32_1 = arith.constant 0 : i32
    return %arg0, %c0_i32, %c0_i32_0 : i32, i32, i32
  }
}

</mosaic_0001>

<bundles_post_ra>
// kernel: tpu_custom_call.1
= control target key start
LH: loop header
LB: loop body
LE: loop exit
PB: predicated region body
PF: predicated region fallthrough
CT: control target
= control target key end

     0   :  { %9 = vsyncpa [#allocation6], 0  ;;  %s5390_s0 = inlined_call_operand.hbm [shape: f32[3,1,256], index: 0, kind: input, shape index: {}]   ;;  %s5391_s1 = inlined_call_operand.hbm [shape: f32[3,1,256], index: 1, kind: input, shape index: {}]   ;;  %s5392_s2 = inlined_call_operand.vmem [shape: f32[1,256], index: 2, kind: input, shape index: {}]   ;;  %s5393_s3 = inlined_call_operand.vmem [shape: f32[1,256], index: 3, kind: input, shape index: {}]   ;;  %s5394_s4 = inlined_call_operand.hbm [shape: f32[3,1,128], index: 4, kind: output, shape index: {}]  }
   0x1   :  { %11 = vsyncpa [#allocation6 + $0x1], 0 }
   0x2   :  { %12 = vsyncpa [#allocation9], 0 }
   0x3   :  { %14 = vsyncpa [#allocation9 + $0x1], 0 }
   0x4   :  { %15 = vsyncpa [#allocation7], 0 }
   0x5   :  { %17 = vsyncpa [#allocation7 + $0x1], 0  ;;  %s3384_s15 = smov 0   ;;  %s3386_s16 = smov 0  }
   0x6   :  { %s3388_s17 = smov 0   ;;  %s3390_s18 = smov 0  }
   0x7   :  { %s3392_s19 = smov 0   ;;  %s3394_s20 = smov 0  }
   0x8   :  { %s3396_s21 = smov 0   ;;  %s3398_s22 = smov 0  }
   0x9   :  { %s3400_s23 = smov 0   ;;  %s3402_s24 = smov 0  }
   0xa   :  { %s3404_s25 = smov 0   ;;  %s3406_s26 = smov 0  }
   0xb   :  { %s3408_s27 = smov 0  }
   0xc LB: > { %5516 = sst [smem:[#allocation14_spill]] %s3335_s24  ;;  %s2703_s28 = sadd.s32 4294967295, %s3347_s27   ;;  %s3347_s27 = sphi %s3408_s27, %s23_s27   ;;  %s3343_s26 = sphi %s3406_s26, %s5775_s26   ;;  %s3339_s25 = sphi %s3404_s25, %s5774_s25   ;;  %s3335_s24 = sphi %s3402_s24, %s5773_s24   ;;  %s3331_s23 = sphi %s3400_s23, %s5772_s23   ;;  %s3327_s22 = sphi %s3398_s22, %s5771_s22   ;;  %s3323_s21 = sphi %s3396_s21, %s5770_s21   ;;  %s3319_s20 = sphi %s3394_s20, %s5781_s20   ;;  %s3315_s19 = sphi %s3392_s19, %s5780_s19   ;;  %s3311_s18 = sphi %s3390_s18, %s5779_s18   ;;  %s3307_s17 = sphi %s3388_s17, %s5778_s17   ;;  %s3303_s16 = sphi %s3386_s16, %s5777_s16   ;;  %s3299_s15 = sphi %s3384_s15, %s5776_s15  }
   0xd   : > { %5517 = sst [smem:[#allocation15_spill]] %s3339_s25  ;;  %s2704_s29 = sadd.s32 4294967294, %s3347_s27  }
   0xe   : > { %5518 = sst [smem:[#allocation16_spill]] %s3343_s26  ;;  %s35_s30 = sadd.s32 1, %s3335_s24 }
   0xf   : > { %s38_s5 = sadd.s32 1, %s3339_s25  ;;  %p36_p0 = scmp.ge.s32.totalorder %s35_s30, 2 }
  0x10   : > { %s42_s6 = sadd.s32 1, %s3343_s26  ;;  %s51_s7 = sadd.s32 1, %s3319_s20 }
  0x11   : > { %p58_p1 = scmp.ne.s32.totalorder %s3319_s20, %s3315_s19  ;;  %s5783_s30 = smov (%p36_p0, %s35_s30), 0 }
  0x12   : > { %5519 = sst [smem:[#allocation17_spill]] %s5783_s30  ;;  %s5785_s5 = smov (!%p36_p0, %s38_s5), %s3339_s25 }
  0x13   : > { %s47_s8 = ssub.s32 %s3335_s24, %s5783_s30  ;;  %p59_p2 = scmp.eq.s32.totalorder %s3347_s27, 0 }
  0x14   : > { %p40_p3 = scmp.ge.s32.totalorder %s5785_s5, 2  ;;  %p64_p4 = scmp.ne.s32.totalorder %s3315_s19, %s3311_s18 }
  0x15   : > { %p3462_p5 = por %p59_p2, %p58_p1  ;;  %p65_p6 = scmp.eq.s32.totalorder %s2703_s28, 0 }
  0x16   : > { %s5787_s5 = smov (%p40_p3, %s5785_s5), 0  ;;  %s5789_s6 = smov (!%p40_p3, %s42_s6), %s3343_s26 }
  0x17   : > { %5521 = sst [smem:[#allocation18_spill]] %s5787_s5  ;;  %p3469_p7 = por %p65_p6, %p64_p4 }
  0x18   : > { %s157_s11 = sadd.s32 1, %s3307_s17  ;;  %p44_p8 = scmp.ge.s32.totalorder %s5789_s6, 3 }
  0x19   : > { %s5522_s10 = scalar_select %p3469_p7, 1, 0 }
  0x1a   : > { %p167_p9 = scmp.ne.s32.totalorder %s3307_s17, %s3303_s16  ;;  %p168_p10 = scmp.eq.s32.totalorder %s2703_s28, 11 }
  0x1b   : > { %p173_p11 = scmp.ne.s32.totalorder %s3303_s16, %s3299_s15  ;;  %s5791_s6 = smov (%p44_p8, %s5789_s6), 0 }
  0x1c   : > { %5523 = sst [smem:[#allocation19_spill]] %s5791_s6  ;;  %p3480_p12 = por %p168_p10, %p167_p9 }
  0x1d   : > { %p174_p13 = scmp.eq.s32.totalorder %s2704_s29, 11  ;;  %s46_s13 = ssub.s32 %s3343_s26, %s5791_s6 }
  0x1e   : > { %s5524_s12 = scalar_select %p3480_p12, 1, 0 }
  0x1f   : > { %s48_s14 = sor.u32 %s47_s8, %s46_s13  ;;  %p155_p0 = scmp.eq.s32.totalorder %s46_s13, 0 }
  0x20   : > { %p49_p1 = scmp.eq.s32.totalorder %s48_s14, 0  ;;  %p3486_p2 = por %p174_p13, %p173_p11 }
  0x21   : > { %s3491_s28 = scalar_select %p155_p0, %s3307_s17, %s157_s11  }
  0x22   : > { %s5525_s18 = scalar_select %p3486_p2, 1, 0 }
  0x23   : > { %s3494_s5 = scalar_select %p49_p1, %s3319_s20, %s51_s7  }
  0x24   : > { %p3028_p3 = scmp.lt.s32.totalorder %s3347_s27, 12  ;;  %s3498_s30 = sand.u32 1, %s3319_s20  }
  0x25   : > { %5526 = sst [smem:[#allocation20_spill]] %s3494_s5  ;;  %s2707_s29 = sshll.u32 %s3343_s26, 1 }
  0x26   : > { %s197_s6 = scalar_lea.vmem [#allocation5], %s3498_s30  ;;  %s3503_s25 = sadd.s32 %s3335_s24, %s2707_s29 }
  0x27   : > { %s206_s8 = sshll.u32 %s197_s6, 4  ;;  %s5399_s13 = sshll.u32 %s3503_s25, 4  ;;  %s3505_s8 = int_to_ptr.vmem [resolvable:$true] %s206_s8 }
  0x28   : > { %p3510_p4 = pnand %p3028_p3, %p3462_p5  ;;  %s3519_s26 = scalar_lea.hbm %s5390_s0, %s5399_s13 }
  0x29   : > { %s195_s6 = scalar_lea.sflag [#allocation6], %s3498_s30  ;;  %s3145_s9 = scalar_lea.hbm %s3519_s26, 16 }
  0x2a   : > { %p3146_p5 = scmp.ne.s32.totalorder %s3519_s26, %s3145_s9  ;;  %p3147_p9 = pneg %p3510_p4 }
  0x2b   : > { %s3150_s14 = scalar_lea.hbm %s5390_s0, 96  ;;  %p3151_p13 = scmp.lt.u32.totalorder %s3519_s26, %s5390_s0 }
  0x2c   : > { %p3148_p10 = pnand %p3147_p9, %p3146_p5  ;;  %p3152_p0 = scmp.lt.u32.totalorder %s3150_s14, %s3145_s9 }
  0x2d   : > { %p3154_p3 = scmp.lt.u32.totalorder %s3145_s9, %s3519_s26 }
  0x2e   : > { %p3149_p11 = pneg %p3148_p10  ;;  %p3153_p1 = por %p3152_p0, %p3151_p13 }
  0x30   : > { %p3155_p6 = por %p3154_p3, %p3153_p1 }
  0x32   : > { %p3156_p8 = pnand %p3155_p6, %p3149_p11 }
  0x34   : > { %3159 = shalt.err (!%p3156_p8)
}
  0x35   : > { %s3160_s5 = scalar_lea.vmem %s3505_s8, 16  ;;  %s3349_s29 = smov [#allocation5]  }
  0x36   : > { %p3161_p5 = scmp.ne.s32.totalorder %s3505_s8, %s3160_s5  ;;  %s3165_s7 = sshll.u32 %s3349_s29, 4  ;;  %s3166_s7 = int_to_ptr.vmem [resolvable:$false] %s3165_s7 }
  0x37   : > { %s3167_s24 = scalar_lea.vmem %s3166_s7, 32  ;;  %p3168_p12 = scmp.lt.s32.totalorder %s3505_s8, %s3166_s7 }
  0x38   : > { %p3163_p10 = pnand %p3161_p5, %p3147_p9  ;;  %p3169_p13 = scmp.lt.s32.totalorder %s3167_s24, %s3160_s5 }
  0x3a   : > { %p3164_p2 = pneg %p3163_p10  ;;  %p3170_p0 = por %p3169_p13, %p3168_p12 }
  0x3c   : > { %p3171_p1 = pnand %p3170_p0, %p3164_p2 }
  0x3e   : > { %3174 = shalt.err (!%p3171_p1)
}
  0x3f   : > { %3020 = dma.hbm_to_vmem [thread:$0]  (!%p3510_p4), %s3519_s26, 16, %s3505_s8, %s195_s6  }
  0x40   : > { %p5528_p6 = scmp.lt.s32.totalorder %s3347_s27, 13  ;;  %p5529_p8 = scmp.ge.s32.totalorder %s3347_s27, 1 }
  0x41   : > { %s5531_s5 = sshll.u32 %s3503_s25, 4  ;;  %s216_s7 = scalar_lea.vmem [#allocation8], %s3498_s30 }
  0x42   : > { %p3553_p11 = pnand %p5529_p8, %p5528_p6  ;;  %s3562_s29 = scalar_lea.hbm %s5391_s1, %s5531_s5 }
  0x43   : > { %s225_s24 = sshll.u32 %s216_s7, 4  ;;  %s214_s26 = scalar_lea.sflag [#allocation9], %s3498_s30  ;;  %s226_s24 = int_to_ptr.vmem [resolvable:$true] %s225_s24 }
  0x44   : > { %s5530_s13 = scalar_select %p3553_p11, 1, 0 }
  0x45   : > { %s3175_s8 = scalar_lea.hbm %s3562_s29, 16  ;;  %s3180_s9 = scalar_lea.hbm %s5391_s1, 96 }
  0x46   : > { %p3176_p12 = scmp.ne.s32.totalorder %s3562_s29, %s3175_s8  ;;  %p3181_p5 = scmp.lt.u32.totalorder %s3562_s29, %s5391_s1 }
  0x47   : > { %p3182_p10 = scmp.lt.u32.totalorder %s3180_s9, %s3175_s8  ;;  %p3184_p0 = scmp.lt.u32.totalorder %s3175_s8, %s3562_s29 }
  0x48   : > { %p3178_p2 = pnand %p3176_p12, %p3147_p9 }
  0x49   : > { %p3183_p13 = por %p3182_p10, %p3181_p5 }
  0x4a   : > { %p3179_p3 = pneg %p3178_p2 }
  0x4b   : > { %p3185_p1 = por %p3184_p0, %p3183_p13 }
  0x4d   : > { %p3186_p6 = pnand %p3185_p1, %p3179_p3 }
  0x4f   : > { %3189 = shalt.err (!%p3186_p6)
}
  0x50   : > { %s3190_s30 = scalar_lea.vmem %s226_s24, 16  ;;  %s3350_s7 = smov [#allocation8]  }
  0x51   : > { %p3191_p8 = scmp.ne.s32.totalorder %s226_s24, %s3190_s30  ;;  %s3195_s25 = sshll.u32 %s3350_s7, 4  ;;  %s3196_s25 = int_to_ptr.vmem [resolvable:$false] %s3195_s25 }
  0x52   : > { %s3197_s6 = scalar_lea.vmem %s3196_s25, 32  ;;  %p3198_p7 = scmp.lt.s32.totalorder %s226_s24, %s3196_s25 }
  0x53   : > { %p3193_p12 = pnand %p3191_p8, %p3147_p9  ;;  %p3199_p11 = scmp.lt.s32.totalorder %s3197_s6, %s3190_s30 }
  0x55   : > { %p3194_p2 = pneg %p3193_p12  ;;  %p3200_p5 = por %p3199_p11, %p3198_p7 }
  0x57   : > { %p3201_p10 = pnand %p3200_p5, %p3194_p2 }
  0x59   : > { %3204 = shalt.err (!%p3201_p10)
}
  0x5a   : > { %3023 = dma.hbm_to_vmem [thread:$0]  (!%p3510_p4), %s3562_s29, 16, %s226_s24, %s214_s26  }
  0x5b   : > { %p5532_p3 = scmp.ne.s32.totalorder %s5530_s13, 0 }
  0x5d   : > { %246 = sbr.rel (%p5532_p3) target bundleno = 1325 (0x52d), region = 36 }
  0x64   : > { %s3588_s8 = sand.u32 1, %s3315_s19   ;;  %p5533_p9 = scmp.ne.s32.totalorder %s5522_s10, 0 }
  0x65   : > { %s249_s9 = scalar_lea.sflag [#allocation6], %s3588_s8  ;;  %s251_s5 = scalar_lea.vmem [#allocation5], %s3588_s8 }
  0x66   : > { %3286 = dma.done.wait (%p5533_p9), %s249_s9, 16  }
  0x67   : > { %3288 = vsyncadd (%p5533_p9), %s249_s9, 4294967280  ;;  %s257_s11 = scalar_lea.sflag [#allocation9], %s3588_s8  ;;  %s259_s29 = scalar_lea.vmem [#allocation8], %s3588_s8 }
  0x68   : > { %3290 = dma.done.wait (%p5533_p9), %s257_s11, 16  }
  0x69   : > { %3292 = vsyncadd (%p5533_p9), %s257_s11, 4294967280  ;;  %s290_s13 = sand.u32 1, %s3303_s16   ;;  %p292_p7 = scmp.lt.s32.totalorder %s3323_s21, 1  ;;  %v5403_v0 = vlaneseq  ;;  %v364_v3 = vld [vmem:[%s251_s5] sm:$0x1] }
  0x6a   : > { %p492_p4 = scmp.eq.s32.totalorder %s3327_s22, 0  ;;  %p493_p11 = scmp.eq.s32.totalorder %s3323_s21, 0  ;;  %v367_v15 = vadd.f32 1.0, %v364_v3 }
  0x6b   : > { %s3606_s24 = scalar_select %p292_p7, %s3323_s21, 1  ;;  %v3620_v1 = vshrl.u32 %v5403_v0, 7 }
  0x6c   : > { %p3615_p13 = pnand %p493_p11, %p492_p4  ;;  %v368_v23 = vmul.f32 0.5, %v367_v15  ;;  %s3894_s9 = scalar_lea.vmem [#allocation10], %s290_s13 }
  0x6d   : > { %s297_s30 = scalar_lea.vmem %s5393_s3, %s3606_s24  ;;  %5535 = vst [vmem:[#allocation21_spill] sm:$0xff] %v3620_v1  ;;  %s294_s6 = scalar_lea.vmem %s5392_s2, %s3606_s24  ;;  %v3627_v2 = vadd.s32 8, %v3620_v1  ;;  %v3630_v4 = vadd.s32 16, %v3620_v1  ;;  %v3633_v5 = vadd.s32 24, %v3620_v1  ;;  %v3636_v6 = vadd.s32 32, %v3620_v1 }
  0x6e   : > { %v3639_v7 = vadd.s32 40, %v3620_v1  ;;  %v3641_v8 = vld [vmem:[%s294_s6] sm:$0x1]  ;;  %v3644_v9 = vadd.s32 48, %v3620_v1  ;;  %v3647_v10 = vadd.s32 56, %v3620_v1  ;;  %v3650_v11 = vadd.s32 64, %v3620_v1 }
  0x6f   : > { %5536 = vst [vmem:[#allocation22_spill] sm:$0xff] %v3641_v8  ;;  %v3654_v12 = vadd.s32 72, %v3620_v1  ;;  %v3657_v13 = vadd.s32 80, %v3620_v1  ;;  %v3660_v14 = vadd.s32 88, %v3620_v1  ;;  %v3663_v16 = vadd.s32 96, %v3620_v1 }
  0x70   : > { %v3666_v17 = vadd.s32 104, %v3620_v1  ;;  %v3669_v18 = vadd.s32 112, %v3620_v1  ;;  %v3672_v19 = vadd.s32 120, %v3620_v1  ;;  %v3675_v20 = vadd.s32 128, %v3620_v1 }
  0x71   : > { %v3678_v21 = vadd.s32 136, %v3620_v1  ;;  %v3681_v22 = vadd.s32 144, %v3620_v1  ;;  %v3684_v24 = vadd.s32 152, %v3620_v1  ;;  %v3687_v25 = vadd.s32 160, %v3620_v1 }
  0x72   : > { %v3690_v26 = vadd.s32 168, %v3620_v1  ;;  %v3693_v27 = vadd.s32 176, %v3620_v1  ;;  %v3696_v28 = vadd.s32 184, %v3620_v1  ;;  %v3699_v29 = vadd.s32 192, %v3620_v1 }
  0x73   : > { %v3702_v30 = vadd.s32 200, %v3620_v1  ;;  %v369_v31 = vmax.f32 %v368_v23, 0.0  ;;  %v3705_v32 = vadd.s32 208, %v3620_v1  ;;  %v3708_v33 = vadd.s32 216, %v3620_v1 }
  0x74   : > { %5537 = vst [vmem:[#allocation23_spill] sm:$0xff] %v3693_v27  ;;  %5538 = vst [vmem:[#allocation24_spill] sm:$0xff] %v3696_v28  ;;  %v3711_v34 = vadd.s32 224, %v3620_v1  ;;  %v3714_v35 = vadd.s32 232, %v3620_v1  ;;  %v3717_v36 = vadd.s32 240, %v3620_v1  ;;  %v3720_v37 = vadd.s32 248, %v3620_v1 }
  0x75   : > { %5539 = vst [vmem:[#allocation25_spill] sm:$0xff] %v3699_v29  ;;  %5540 = vst [vmem:[#allocation26_spill] sm:$0xff] %v3702_v30  ;;  %v3723_v38 = vcvt.s32.f32 %v3620_v1  ;;  %v370_v39 = vmin.f32 %v369_v31, 1.0  ;;  %v3726_v40 = vcvt.s32.f32 %v3627_v2  ;;  %v3729_v41 = vcvt.s32.f32 %v3630_v4 }
  0x76   : > { %5541 = vst [vmem:[#allocation27_spill] sm:$0xff] %v3705_v32  ;;  %5542 = vst [vmem:[#allocation28_spill] sm:$0xff] %v3708_v33  ;;  %v3732_v42 = vcvt.s32.f32 %v3633_v5  ;;  %v3735_v43 = vcvt.s32.f32 %v3636_v6  ;;  %v3738_v44 = vcvt.s32.f32 %v3639_v7  ;;  %v3741_v45 = vcvt.s32.f32 %v3644_v9 }
  0x77   : > { %5543 = vst [vmem:[#allocation29_spill] sm:$0xff] %v3711_v34  ;;  %5544 = vst [vmem:[#allocation30_spill] sm:$0xff] %v3714_v35  ;;  %v3744_v46 = vcvt.s32.f32 %v3647_v10  ;;  %v371_v47 = vmul.f32 255.0, %v370_v39  ;;  %v3747_v48 = vcvt.s32.f32 %v3650_v11  ;;  %v3750_v49 = vcvt.s32.f32 %v3654_v12 }
  0x78   : > { %5545 = vst [vmem:[#allocation31_spill] sm:$0xff] %v3717_v36  ;;  %5546 = vst [vmem:[#allocation32_spill] sm:$0xff] %v3720_v37  ;;  %v3753_v50 = vcvt.s32.f32 %v3657_v13  ;;  %v3756_v51 = vcvt.s32.f32 %v3660_v14  ;;  %v3759_v52 = vcvt.s32.f32 %v3663_v16  ;;  %v3762_v53 = vcvt.s32.f32 %v3666_v17 }
  0x79   : > { %5547 = vst [vmem:[#allocation33_spill] sm:$0xff] %v3723_v38  ;;  %5548 = vst [vmem:[#allocation34_spill] sm:$0xff] %v3726_v40  ;;  %v3765_v54 = vmul.f32 %v371_v47, %v3641_v8  ;;  %v3768_v55 = vsub.s32 0, %v3620_v1  ;;  %v3771_v56 = vcvt.s32.f32 %v3669_v18  ;;  %v3774_v57 = vcvt.s32.f32 %v3672_v19 }
  0x7a   : > { %5549 = vst [vmem:[#allocation35_spill] sm:$0xff] %v3729_v41  ;;  %5550 = vst [vmem:[#allocation36_spill] sm:$0xff] %v3732_v42  ;;  %v3777_v58 = vcvt.s32.f32 %v3675_v20  ;;  %v3780_v59 = vcvt.s32.f32 %v3678_v21  ;;  %v3783_v60 = vcvt.s32.f32 %v3681_v22  ;;  %v3786_v61 = vcvt.s32.f32 %v3684_v24 }
  0x7b   : > { %5551 = vst [vmem:[#allocation37_spill] sm:$0xff] %v3735_v43  ;;  %5552 = vst [vmem:[#allocation38_spill] sm:$0xff] %v3738_v44  ;;  %v3789_v62 = vcvt.s32.f32 %v3687_v25  ;;  %v373_v63 = vfloor.f32 %v3765_v54  ;;  %v3793_v3 = vcvt.s32.f32 %v3690_v26  ;;  %v3796_v15 = vcvt.s32.f32 %v3693_v27 }
  0x7c   : > { %5553 = vst [vmem:[#allocation39_spill] sm:$0xff] %v3741_v45  ;;  %5554 = vst [vmem:[#allocation40_spill] sm:$0xff] %v3744_v46  ;;  %v3799_v23 = vcvt.s32.f32 %v3696_v28  ;;  %v3802_v31 = vcvt.s32.f32 %v3699_v29  ;;  %v3805_v39 = vcvt.s32.f32 %v3702_v30  ;;  %v3808_v47 = vcvt.s32.f32 %v3705_v32 }
  0x7d   : > { %5555 = vst [vmem:[#allocation41_spill] sm:$0xff] %v3747_v48  ;;  %5556 = vst [vmem:[#allocation42_spill] sm:$0xff] %v3750_v49  ;;  %v3811_v0 = vcvt.s32.f32 %v3708_v33  ;;  %v3817_v27 = vcvt.s32.f32 %v3711_v34  ;;  %v3820_v28 = vcvt.s32.f32 %v3714_v35  ;;  %v3823_v29 = vcvt.s32.f32 %v3717_v36 }
  0x7e   : > { %5557 = vst [vmem:[#allocation43_spill] sm:$0xff] %v3753_v50  ;;  %5558 = vst [vmem:[#allocation44_spill] sm:$0xff] %v3756_v51  ;;  %v3826_v30 = vcvt.s32.f32 %v3720_v37  ;;  %v3351_v36 = vmov (!%p3615_p13), 0.0  }
  0x7f   : > { %5559 = vst [vmem:[#allocation45_spill] sm:$0xff] %v3759_v52  ;;  %5560 = vst [vmem:[#allocation46_spill] sm:$0xff] %v3762_v53 }
  0x80   : > { %5561 = vst [vmem:[#allocation47_spill] sm:$0xff] %v3765_v54  ;;  %5562 = vst [vmem:[#allocation48_spill] sm:$0xff] %v3768_v55  ;;  %v3814_v54 = vrot.slane %v373_v63, %v3768_v55  ;;  %v5582_v63 = vlaneseq (!%p3615_p13) }
  0x81   : > { %5563 = vst [vmem:[#allocation49_spill] sm:$0xff] %v3771_v56  ;;  %5564 = vst [vmem:[#allocation50_spill] sm:$0xff] %v3774_v57 }
  0x82   : > { %5565 = vst [vmem:[#allocation51_spill] sm:$0xff] %v3777_v58  ;;  %5566 = vst [vmem:[#allocation52_spill] sm:$0xff] %v3780_v59  ;;  %vm5433_vm1 = vcmp.eq.f32.partialorder %v3723_v38, %v3814_v54  ;;  %vm5432_vm2 = vcmp.eq.f32.partialorder %v3726_v40, %v3814_v54  ;;  %vm5426_vm3 = vcmp.eq.f32.partialorder %v3729_v41, %v3814_v54  ;;  %vm500_vm5 = vcmp.lt.s32.totalorder (!%p3615_p13), %v5582_v63, 256 }
  0x83   : > { %5567 = vst [vmem:[#allocation53_spill] sm:$0xff] %v3783_v60  ;;  %5568 = vst [vmem:[#allocation54_spill] sm:$0xff] %v3786_v61  ;;  %vm5425_vm4 = vcmp.eq.f32.partialorder %v3732_v42, %v3814_v54  ;;  %vm5434_vm10 = vcmp.eq.f32.partialorder %v3777_v58, %v3814_v54  ;;  %vm5418_vm11 = vcmp.eq.f32.partialorder %v3780_v59, %v3814_v54 }
  0x84   : > { %5569 = vst [vmem:[#allocation55_spill] sm:$0xff] %v3789_v62  ;;  %5570 = vst [vmem:[#allocation56_spill] sm:$0xff] %v3793_v3  ;;  %vm5428_vm12 = vcmp.eq.f32.partialorder %v3783_v60, %v3814_v54  ;;  %vm5427_vm13 = vcmp.eq.f32.partialorder %v3786_v61, %v3814_v54  ;;  %vm5431_vm14 = vcmp.eq.f32.partialorder %v3789_v62, %v3814_v54  ;;  %497 = sbr.rel (%p3615_p13) target bundleno = 140 (0x8c), region = 48 }
  0x85   : > { %5571 = vst [vmem:[#allocation57_spill] sm:$0xff] %v3796_v15  ;;  %5572 = vst [vmem:[#allocation58_spill] sm:$0xff] %v3799_v23  ;;  %vm5515_vm0 = vcmp.eq.f32.partialorder %v3805_v39, %v3814_v54  ;;  %vm5435_vm6 = vcmp.eq.f32.partialorder %v3808_v47, %v3814_v54 }
  0x86   : > { %5573 = vst [vmem:[#allocation59_spill] sm:$0xff] %v3802_v31  ;;  %5574 = vst [vmem:[#allocation60_spill] sm:$0xff] %v3805_v39 }
  0x87   : > { %5575 = vst [vmem:[#allocation61_spill] sm:$0xff] %v3808_v47  ;;  %5576 = vst [vmem:[#allocation62_spill] sm:$0xff] %v3811_v0 }
  0x88   : > { %5577 = vst [vmem:[#allocation63_spill] sm:$0xff] %v3814_v54  ;;  %5578 = vst [vmem:[#allocation64_spill] sm:$0xff] %v3817_v27 }
  0x89   : > { %5579 = vst [vmem:[#allocation65_spill] sm:$0xff] %v3820_v28  ;;  %5580 = vst [vmem:[#allocation66_spill] sm:$0xff] %v3823_v29 }
  0x8a   : > { %5581 = vst [vmem:[#allocation67_spill] sm:$0xff] %v3826_v30  ;;  %502 = vst.msk [vmem:[#allocation2] sm:$0x3] (!%p3615_p13), %vm500_vm5, %v3351_v36 }
  0x8b   : > { %503 = vst.msk [vmem:[#allocation3] sm:$0x3] %vm500_vm5, %v3351_v36  ;;  %504 = vst [vmem:[%s3894_s9] sm:$0x1] %v3351_v36 }
  0x8c PF: > { %p2744_p0 = scmp.ne.s32.totalorder %s3327_s22, 0 }
  0x8d   : > { %vm2795_vm7 = vmpackc.low (!%p2744_p0), %vm5418_vm11, %vm5434_vm10  ;;  %v508_v37 = vld [vmem:[%s259_s29] sm:$0x1] (!%p2744_p0)  ;;  %v3352_v63 = vmov (!%p2744_p0), 1.0|1.0  }
  0x8e   : > { %507 = sbr.rel (%p2744_p0) target bundleno = 446 (0x1be), region = 52  ;;  %2947 = vmatprep.subr.msk.bf16.mxu0 (!%p2744_p0), %vm2795_vm7, %v3352_v63  ;;  %vm2779_vm5 = vmpackc.low (!%p2744_p0), %vm5432_vm2, %vm5433_vm1  ;;  %v510_v36 = vadd.f32 (!%p2744_p0), 1.0, %v508_v37  ;;  %v509_v37 = vld [vmem:[%s297_s30] sm:$0x1] (!%p2744_p0) }
  0x8f   : > { %2948 = vmatpush3.bf16.xpose.msk.msra.mxu0 (!%p2744_p0), %vm2779_vm5, %v3352_v63  ;;  %vm2797_vm11 = vmpackc.low (!%p2744_p0), %vm5427_vm13, %vm5428_vm12  ;;  %vm638_vm12 = vcmp.ne.f32.partialorder (!%p2744_p0), %v509_v37, 0.0 }
  0x90   : > { %v511_v34 = vmul.f32 (!%p2744_p0), 0.5, %v510_v36  ;;  %2949 = vmatprep.subr.msk.bf16.mxu0 (!%p2744_p0), %vm2797_vm11, %v3352_v63  ;;  %vm2781_vm7 = vmpackc.low (!%p2744_p0), %vm5425_vm4, %vm5426_vm3  ;;  %vm5583_vm11 = vcmp.eq.f32.partialorder (!%p2744_p0), %v3793_v3, %v3814_v54  ;;  %vm5584_vm4 = vcmp.eq.f32.partialorder (!%p2744_p0), %v3735_v43, %v3814_v54  ;;  %vm5585_vm3 = vcmp.eq.f32.partialorder (!%p2744_p0), %v3738_v44, %v3814_v54 }
  0x91   : > { %vm2799_vm5 = vmpackc.low (!%p2744_p0), %vm5583_vm11, %vm5431_vm14  ;;  %vm5586_vm11 = vcmp.eq.f32.partialorder (!%p2744_p0), %v3796_v15, %v3814_v54 }
  0x92   : > { %v512_v35 = vmax.f32 (!%p2744_p0), %v511_v34, 0.0  ;;  %vm2783_vm13 = vmpackc.low (!%p2744_p0), %vm5585_vm3, %vm5584_vm4 }
  0x94   : > { %v513_v32 = vmin.f32 (!%p2744_p0), %v512_v35, 1.0 }
  0x96   : > { %v514_v34 = vmul.f32 255.0, %v513_v32 }
  0x97   : > { %2950 = vmatpush3.bf16.xpose.msk.msra.mxu0 %vm2781_vm7, %v3352_v63  ;;  %vm5587_vm7 = vcmp.eq.f32.partialorder %v3799_v23, %v3814_v54 }
  0x98   : > { %v515_v35 = vmul.f32 %v514_v34, %v509_v37  ;;  %2951 = vmatprep.subr.msk.bf16.mxu0 %vm2799_vm5, %v3352_v63  ;;  %vm3958_vm14 = vmpackc.low %vm5587_vm7, %vm5586_vm11  ;;  %vm5590_vm5 = vcmp.ne.f32.partialorder %v3641_v8, 0.0 }
  0x99   : > { %vm3965_vm2 = vmpackc.low %vm5590_vm5, %vm5590_vm5 }
  0x9a   : > { %v516_v36 = vfloor.f32 %v515_v35  ;;  %2963 = vmatprep.mubr.msk.bf16.mxu0 %vm3965_vm2, %v3352_v63  ;;  %vm3980_vm7 = vmpackc.low %vm638_vm12, %vm638_vm12  ;;  %v3353_v35 = vmov 1966171168  }
  0x9b   : > { %2981 = vmatprep.mubr.msk.bf16.mxu1 %vm3980_vm7, %v3352_v63 }
  0x9c   : > { %v3950_v33 = vrot.slane %v516_v36, %v3768_v55  ;;  %v688_v36 = vunpack.c.l.s4 %v3353_v35 }
  0x9e   : > { %vm539_vm3 = vcmp.eq.f32.partialorder %v3777_v58, %v3950_v33  ;;  %vm540_vm4 = vcmp.eq.f32.partialorder %v3780_v59, %v3950_v33  ;;  %vm523_vm1 = vcmp.eq.f32.partialorder %v3723_v38, %v3950_v33  ;;  %vm524_vm11 = vcmp.eq.f32.partialorder %v3726_v40, %v3950_v33 }
  0x9f   : > { %vm2829_vm5 = vmpackc.low %vm540_vm4, %vm539_vm3  ;;  %vm541_vm10 = vcmp.eq.f32.partialorder %v3783_v60, %v3950_v33  ;;  %vm542_vm8 = vcmp.eq.f32.partialorder %v3786_v61, %v3950_v33  ;;  %2952 = vmatpush3.bf16.xpose.msk.msra.mxu0 %vm2783_vm13, %v3352_v63  ;;  %vm525_vm12 = vcmp.eq.f32.partialorder %v3729_v41, %v3950_v33  ;;  %vm526_vm3 = vcmp.eq.f32.partialorder %v3732_v42, %v3950_v33 }
  0xa0   : > { %2965 = vmatprep.subr.msk.bf16.mxu1 %vm2829_vm5, %v3352_v63  ;;  %vm2813_vm9 = vmpackc.low %vm524_vm11, %vm523_vm1  ;;  %2953 = vmatprep.subr.msk.bf16.mxu0 %vm3958_vm14, %v3352_v63  ;;  %vm543_vm1 = vcmp.eq.f32.partialorder %v3789_v62, %v3950_v33  ;;  %vm5597_vm14 = vcmp.eq.f32.partialorder %v3802_v31, %v3814_v54  ;;  %vm527_vm5 = vcmp.eq.f32.partialorder %v3735_v43, %v3950_v33  ;;  %v689_v32 = vunpack.c.0.s8 %v688_v36 }
  0xa1   : > { %2966 = vmatpush3.bf16.xpose.msk.msra.mxu1 %vm2813_vm9, %v3352_v63  ;;  %vm2831_vm15 = vmpackc.low %vm542_vm8, %vm541_vm10  ;;  %vm544_vm8 = vcmp.eq.f32.partialorder %v3793_v3, %v3950_v33  ;;  %vm5595_vm9 = vcmp.eq.f32.partialorder %v3741_v45, %v3814_v54  ;;  %vm5596_vm10 = vcmp.eq.f32.partialorder %v3744_v46, %v3814_v54 }
  0xa2   : > { %2967 = vmatprep.subr.msk.bf16.mxu1 %vm2831_vm15, %v3352_v63  ;;  %vm2785_vm13 = vmpackc.low %vm5596_vm10, %vm5595_vm9  ;;  %vm528_vm9 = vcmp.eq.f32.partialorder %v3738_v44, %v3950_v33  ;;  %vm545_vm10 = vcmp.eq.f32.partialorder %v3796_v15, %v3950_v33  ;;  %v692_v8 = vsub.s32 %v689_v32, %v3620_v1 }
  0xa3   : > { %vm2803_vm15 = vmpackc.low %vm5515_vm0, %vm5597_vm14 }
  0xa4   : > { %vm2815_vm4 = vmpackc.low %vm526_vm3, %vm525_vm12  ;;  %vm546_vm12 = vcmp.eq.f32.partialorder %v3799_v23, %v3950_v33  ;;  %vm5598_vm3 = vcmp.eq.f32.partialorder %v3747_v48, %v3814_v54  ;;  %v708_v23 = vld [vmem:[#allocation3] sm:$0x3] }
  0xa5   : > { %vm2833_vm11 = vmpackc.low %vm544_vm8, %vm543_vm1  ;;  %vm5599_vm1 = vcmp.eq.f32.partialorder %v3750_v49, %v3814_v54 }
  0xa6   : > { %vm2787_vm8 = vmpackc.low %vm5599_vm1, %vm5598_vm3  ;;  %vm530_vm3 = vcmp.eq.f32.partialorder %v3744_v46, %v3950_v33  ;;  %vm547_vm1 = vcmp.eq.f32.partialorder %v3802_v31, %v3950_v33 }
  0xa7   : > { %2954 = vmatpush3.bf16.xpose.msk.msra.mxu0 %vm2785_vm13, %v3352_v63  ;;  %vm5600_vm13 = vcmp.eq.f32.partialorder %v3811_v0, %v3814_v54 }
  0xa8   : > { %2955 = vmatprep.subr.msk.bf16.mxu0 %vm2803_vm15, %v3352_v63  ;;  %vm2805_vm14 = vmpackc.low %vm5600_vm13, %vm5435_vm6  ;;  %vm5604_vm13 = vcmp.eq.f32.partialorder %v3820_v28, %v3814_v54  ;;  %vm549_vm6 = vcmp.eq.f32.partialorder %v3808_v47, %v3950_v33  ;;  %v642_v47 = vld [vmem:[#allocation2] sm:$0x3] }
  0xa9   : > { %2968 = vmatpush3.bf16.xpose.msk.msra.mxu1 %vm2815_vm4, %v3352_v63  ;;  %vm2817_vm15 = vmpackc.low %vm528_vm9, %vm527_vm5  ;;  %vm548_vm5 = vcmp.eq.f32.partialorder %v3805_v39, %v3950_v33  ;;  %vm5601_vm9 = vcmp.eq.f32.partialorder %v3753_v50, %v3814_v54 }
  0xaa   : > { %2969 = vmatprep.subr.msk.bf16.mxu1 %vm2833_vm11, %v3352_v63  ;;  %vm2835_vm4 = vmpackc.low %vm546_vm12, %vm545_vm10  ;;  %vm529_vm11 = vcmp.eq.f32.partialorder %v3741_v45, %v3950_v33  ;;  %vm5602_vm10 = vcmp.eq.f32.partialorder %v3756_v51, %v3814_v54 }
  0xab   : > { %vm2789_vm12 = vmpackc.low %vm5602_vm10, %vm5601_vm9  ;;  %vm531_vm9 = vcmp.eq.f32.partialorder %v3747_v48, %v3950_v33  ;;  %vm532_vm10 = vcmp.eq.f32.partialorder %v3750_v49, %v3950_v33 }
  0xaf   : > { %2956 = vmatpush3.bf16.xpose.msk.msra.mxu0 %vm2787_vm8, %v3352_v63  ;;  %vm5603_vm8 = vcmp.eq.f32.partialorder %v3817_v27, %v3814_v54 }
  0xb0   : > { %2957 = vmatprep.subr.msk.bf16.mxu0 %vm2805_vm14, %v3352_v63  ;;  %vm2807_vm14 = vmpackc.low %vm5604_vm13, %vm5603_vm8  ;;  %vm5608_vm8 = vcmp.eq.f32.partialorder %v3826_v30, %v3814_v54 }
  0xb1   : > { %2970 = vmatpush3.bf16.xpose.msk.msra.mxu1 %vm2817_vm15, %v3352_v63  ;;  %vm2819_vm15 = vmpackc.low %vm530_vm3, %vm529_vm11  ;;  %vm550_vm11 = vcmp.eq.f32.partialorder %v3811_v0, %v3950_v33  ;;  %vm5605_vm3 = vcmp.eq.f32.partialorder %v3759_v52, %v3814_v54  ;;  %v5611_v0 = vlaneseq }
  0xb2   : > { %2971 = vmatprep.subr.msk.bf16.mxu1 %vm2835_vm4, %v3352_v63  ;;  %vm2837_vm4 = vmpackc.low %vm548_vm5, %vm547_vm1  ;;  %vm5606_vm1 = vcmp.eq.f32.partialorder %v3762_v53, %v3814_v54 }
  0xb3   : > { %vm2791_vm5 = vmpackc.low %vm5606_vm1, %vm5605_vm3  ;;  %vm534_vm3 = vcmp.eq.f32.partialorder %v3756_v51, %v3950_v33  ;;  %vm551_vm1 = vcmp.eq.f32.partialorder %v3817_v27, %v3950_v33 }
  0xb7   : > { %2958 = vmatpush3.bf16.xpose.msk.msra.mxu0 %vm2789_vm12, %v3352_v63  ;;  %vm5607_vm12 = vcmp.eq.f32.partialorder %v3823_v29, %v3814_v54 }
  0xb8   : > { %2959 = vmatprep.subr.msk.bf16.mxu0 %vm2807_vm14, %v3352_v63  ;;  %vm2809_vm13 = vmpackc.low %vm5608_vm8, %vm5607_vm12  ;;  %vm535_vm8 = vcmp.eq.f32.partialorder %v3759_v52, %v3950_v33 }
  0xb9   : > { %2972 = vmatpush3.bf16.xpose.msk.msra.mxu1 %vm2819_vm15, %v3352_v63  ;;  %vm2821_vm14 = vmpackc.low %vm532_vm10, %vm531_vm9  ;;  %vm5609_vm9 = vcmp.eq.f32.partialorder %v3771_v56, %v3814_v54  ;;  %vm5610_vm10 = vcmp.eq.f32.partialorder %v3774_v57, %v3814_v54 }
  0xba   : > { %2973 = vmatprep.subr.msk.bf16.mxu1 %vm2837_vm4, %v3352_v63  ;;  %vm2839_vm15 = vmpackc.low %vm550_vm11, %vm549_vm6  ;;  %vm533_vm4 = vcmp.eq.f32.partialorder %v3753_v50, %v3950_v33  ;;  %vm552_vm6 = vcmp.eq.f32.partialorder %v3820_v28, %v3950_v33 }
  0xbb   : > { %vm2793_vm11 = vmpackc.low %vm5610_vm10, %vm5609_vm9 }
  0xbc   : > { %vm2841_vm12 = vmpackc.low %vm552_vm6, %vm551_vm1  ;;  %vm537_vm1 = vcmp.eq.f32.partialorder %v3771_v56, %v3950_v33  ;;  %vm538_vm6 = vcmp.eq.f32.partialorder %v3774_v57, %v3950_v33 }
  0xbd   : > { %vm2827_vm9 = vmpackc.low %vm538_vm6, %vm537_vm1 }
  0xbf   : > { %2960 = vmatpush3.bf16.xpose.msk.msra.mxu0 %vm2791_vm5, %v3352_v63  ;;  %vm2823_vm5 = vmpackc.low %vm534_vm3, %vm533_vm4 }
  0xc0   : > { %2961 = vmatprep.subr.msk.bf16.mxu0 %vm2809_vm13, %v3352_v63  ;;  %vm536_vm13 = vcmp.eq.f32.partialorder %v3762_v53, %v3950_v33 }
  0xc1   : > { %2974 = vmatpush3.bf16.xpose.msk.msra.mxu1 %vm2821_vm14, %v3352_v63  ;;  %vm553_vm14 = vcmp.eq.f32.partialorder %v3823_v29, %v3950_v33  ;;  %vm2825_vm4 = vmpackc.low %vm536_vm13, %vm535_vm8 }
  0xc2   : > { %2975 = vmatprep.subr.msk.bf16.mxu1 %vm2839_vm15, %v3352_v63  ;;  %vm554_vm15 = vcmp.eq.f32.partialorder %v3826_v30, %v3950_v33 }
  0xc3   : > { %vm2843_vm3 = vmpackc.low %vm554_vm15, %vm553_vm14 }
  0xc7   : > { %2962 = vmatpush3.bf16.xpose.msk.msra.mxu0 %vm2793_vm11, %v3352_v63 }
  0xc9   : > { %2976 = vmatpush3.bf16.xpose.msk.msra.mxu1 %vm2823_vm5, %v3352_v63 }
  0xca   : > { %2977 = vmatprep.subr.msk.bf16.mxu1 %vm2841_vm12, %v3352_v63 }
  0xce   : > { %2964 = vmatmul.mubr.msk.bf16.vlgmr.msra.gmra.mrb[0].mxu0 %vm3965_vm2, %v3352_v63  ;;  %vm705_vm2 = vcmp.lt.s32.totalorder %v5611_v0, 256 }
  0xd1   : > { %2978 = vmatpush3.bf16.xpose.msk.msra.mxu1 %vm2825_vm4, %v3352_v63 }
  0xd2   : > { %2979 = vmatprep.subr.msk.bf16.mxu1 %vm2843_vm3, %v3352_v63 }
  0xd9   : > { %2980 = vmatpush3.bf16.xpose.msk.msra.mxu1 %vm2827_vm9, %v3352_v63 }
  0xe0   : > { %2982 = vmatmul.mubr.msk.bf16.vlgmr.msra.gmra.mrb[0].mxu1 %vm3980_vm7, %v3352_v63 }
 0x1a1   : > { %v677_v34 = vpop.f32.mrb[0].mxu0 }
 0x1a2   : > { %v679_v54 = vpop.f32.mrb[1].mxu0 }
 0x1a3   : > { %v686_v29 = vcombine.low %v677_v34, %v679_v54  ;;  %v681_v30 = vpop.f32.mrb[2].mxu0 }
 0x1a4   : > { %v682_v27 = vpop.f32.mrb[3].mxu0 }
 0x1a5   : > { %v693_v28 = vrot.slane %v686_v29, %v692_v8 }
 0x1a7   : > { %v700_v33 = vrot.slane %v693_v28, %v692_v8 }
 0x1a9   : > { %v702_v31 = vadd.f32 %v700_v33, %v642_v47 }
 0x1ab   : > { %707 = vst.msk [vmem:[#allocation2] sm:$0x3] %vm705_vm2, %v702_v31 }
 0x1b3   : > { %v743_v39 = vpop.f32.mrb[0].mxu1 }
 0x1b4   : > { %v745_v37 = vpop.f32.mrb[1].mxu1 }
 0x1b5   : > { %v752_v63 = vcombine.low %v743_v39, %v745_v37  ;;  %v747_v15 = vpop.f32.mrb[2].mxu1 }
 0x1b6   : > { %v748_v35 = vpop.f32.mrb[3].mxu1 }
 0x1b7   : > { %v759_v36 = vrot.slane %v752_v63, %v692_v8 }
 0x1b9   : > { %v766_v62 = vrot.slane %v759_v36, %v692_v8 }
 0x1bb   : > { %v768_v32 = vadd.f32 %v766_v62, %v708_v23 }
 0x1bd   : > { %769 = vst.msk [vmem:[#allocation3] sm:$0x3] %vm705_vm2, %v768_v32 }
 0x1be PF: > { %p770_p1 = scmp.eq.s32.totalorder %s3323_s21, 1 }
 0x1c0   : > { %p771_p6 = pnand %p770_p1, %p492_p4 }
 0x1c2   : > { %774 = sbr.rel (%p771_p6) target bundleno = 834 (0x342), region = 56 }
 0x1c9   : > { %v775_v0 = vld [vmem:[#allocation2] sm:$0x3]  ;;  %v776_v27 = vld [vmem:[#allocation3] sm:$0x3]  ;;  %v784_v28 = vsub.s32 1, %v3620_v1  ;;  %vm788_vm7 = vcmask 1040384   ;;  %v5612_v30 = vlaneseq }
 0x1ca   : > { %v4139_v29 = vrot.slane %v775_v0, %v3768_v55  ;;  %v4145_v8 = vrot.slane %v776_v27, %v3768_v55  ;;  %v3354_v47 = vmov 0.0   ;;  %v5613_v43 = vld [vmem:[#allocation24_spill] sm:$0xff]  ;;  %v5615_v41 = vld [vmem:[#allocation23_spill] sm:$0xff]  ;;  %v5617_v40 = vld [vmem:[#allocation26_spill] sm:$0xff]  ;;  %s3355_s29 = smov 1.0  }
 0x1cb   : > { %v4142_v54 = vand.u32 127, %v5612_v30  ;;  %v4147_v62 = vrot.slane %v775_v0, %v784_v28  ;;  %v4149_v15 = vrot.slane %v776_v27, %v784_v28 }
 0x1cc   : > { %v789_v23 = vsel %vm788_vm7, %v4139_v29, 0.0  ;;  %v813_v31 = vsel %vm788_vm7, %v4145_v8, 0.0  ;;  %v4301_v49 = vmul.f32 0.0, %v4139_v29 }
 0x1cd   : > { %vm829_vm10 = vcmp.eq.s32.totalorder %v3620_v1, %v4142_v54  ;;  %v790_v39 = vsel %vm788_vm7, %v4147_v62, 0.0  ;;  %v4160_v33 = vmul.f32 0.0, %v4147_v62  ;;  %v814_v35 = vsel %vm788_vm7, %v4149_v15, 0.0 }
 0x1ce   : > { %v4157_v34 = vsel %vm829_vm10, 1.0, %v3354_v47  ;;  %v791_v37 = vadd.f32 %v790_v39, %v789_v23  ;;  %v815_v36 = vadd.f32 %v814_v35, %v813_v31  ;;  %vm831_vm11 = vcmp.eq.s32.totalorder %v3627_v2, %v4142_v54 }
 0x1cf   : > { %v1341_v63 = vmul.f32 %v4157_v34, %v4139_v29  ;;  %vm835_vm5 = vcmp.eq.s32.totalorder %v3633_v5, %v4142_v54  ;;  %vm833_vm12 = vcmp.eq.s32.totalorder %v3630_v4, %v4142_v54  ;;  %v4173_v0 = vsel %vm831_vm11, 1.0, %v3354_v47 }
 0x1d0   : > { %792 = vadd.xlane.f32.xlu1 %v791_v37  ;;  %v4176_v27 = vsel %vm835_vm5, 1.0, %v3354_v47  ;;  %v4179_v28 = vsel %vm833_vm12, 1.0, %v3354_v47  ;;  %v1343_v23 = vmul.f32 %v4173_v0, %v4139_v29  ;;  %vm839_vm8 = vcmp.eq.s32.totalorder %v3639_v7, %v4142_v54 }
 0x1d1   : > { %v1405_v32 = vadd.f32 %v4160_v33, %v1341_v63  ;;  %v1347_v31 = vmul.f32 %v4176_v27, %v4139_v29  ;;  %v1345_v39 = vmul.f32 %v4179_v28, %v4139_v29  ;;  %v4190_v37 = vsel %vm839_vm8, 1.0, %v3354_v47 }
 0x1d2   : > { %vm837_vm13 = vcmp.eq.s32.totalorder %v3636_v6, %v4142_v54  ;;  %vm843_vm14 = vcmp.eq.s32.totalorder %v3647_v10, %v4142_v54  ;;  %v1408_v63 = vadd.f32 %v1343_v23, %v4160_v33  ;;  %vm841_vm15 = vcmp.eq.s32.totalorder %v3644_v9, %v4142_v54 }
 0x1d3   : > { %1406 = vadd.xlane.f32.xlu0 %v1405_v32  ;;  %v1414_v35 = vadd.f32 %v1347_v31, %v4160_v33  ;;  %v1351_v32 = vmul.f32 %v4190_v37, %v4139_v29  ;;  %v4201_v55 = vsel %vm837_vm13, 1.0, %v3354_v47  ;;  %v4206_v30 = vsel %vm843_vm14, 1.0, %v3354_v47 }
 0x1d4   : > { %816 = vadd.xlane.f32.xlu1 %v815_v36  ;;  %v1411_v3 = vadd.f32 %v1345_v39, %v4160_v33  ;;  %v1349_v36 = vmul.f32 %v4201_v55, %v4139_v29  ;;  %vm847_vm4 = vcmp.eq.s32.totalorder %v3654_v12, %v4142_v54  ;;  %v4214_v23 = vsel %vm841_vm15, 1.0, %v3354_v47 }
 0x1d5   : > { %v1420_v31 = vadd.f32 %v1351_v32, %v4160_v33  ;;  %v1355_v60 = vmul.f32 %v4206_v30, %v4139_v29  ;;  %vm845_vm3 = vcmp.eq.s32.totalorder %v3650_v11, %v4142_v54  ;;  %v4222_v39 = vsel %vm847_vm4, 1.0, %v3354_v47 }
 0x1d6   : > { %v1353_v61 = vmul.f32 %v4214_v23, %v4139_v29  ;;  %vm851_vm1 = vcmp.eq.s32.totalorder %v3660_v14, %v4142_v54  ;;  %v1359_v58 = vmul.f32 %v4222_v39, %v4139_v29  ;;  %vm849_vm6 = vcmp.eq.s32.totalorder %v3657_v13, %v4142_v54 }
 0x1d7   : > { %1409 = vadd.xlane.f32.xlu0 %v1408_v63  ;;  %v1417_v63 = vadd.f32 %v1349_v36, %v4160_v33  ;;  %v1426_v32 = vadd.f32 %v1355_v60, %v4160_v33  ;;  %vm855_vm9 = vcmp.eq.s32.totalorder %v3666_v17, %v4142_v54  ;;  %v4246_v60 = vsel %vm849_vm6, 1.0, %v3354_v47 }
 0x1d8   : > { %1415 = vadd.xlane.f32.xlu1 %v1414_v35  ;;  %v4230_v35 = vsel %vm845_vm3, 1.0, %v3354_v47  ;;  %v1423_v36 = vadd.f32 %v1353_v61, %v4160_v33  ;;  %vm853_vm2 = vcmp.eq.s32.totalorder %v3663_v16, %v4142_v54  ;;  %v4254_v61 = vsel %vm855_vm9, 1.0, %v3354_v47 }
 0x1d9   : > { %v1357_v59 = vmul.f32 %v4230_v35, %v4139_v29  ;;  %v1361_v57 = vmul.f32 %v4246_v60, %v4139_v29  ;;  %vm859_vm7 = vcmp.eq.s32.totalorder %v3672_v19, %v4142_v54  ;;  %vm857_vm10 = vcmp.eq.s32.totalorder %v3669_v18, %v4142_v54 }
 0x1db   : > { %1412 = vadd.xlane.f32.xlu0 %v1411_v3  ;;  %v4238_v3 = vsel %vm851_vm1, 1.0, %v3354_v47  ;;  %v1435_v53 = vadd.f32 %v1361_v57, %v4160_v33 }
 0x1dc   : > { %1421 = vadd.xlane.f32.xlu1 %v1420_v31  ;;  %v1432_v31 = vadd.f32 %v1359_v58, %v4160_v33  ;;  %v1363_v56 = vmul.f32 %v4238_v3, %v4139_v29  ;;  %v4262_v58 = vadd.s32 128, %v4142_v54 }
 0x1de   : > { %v1438_v52 = vadd.f32 %v1363_v56, %v4160_v33  ;;  %vm864_vm11 = vcmp.eq.s32.totalorder %v3678_v21, %v4262_v58  ;;  %v4281_v56 = vsel %vm857_vm10, 1.0, %v3354_v47  ;;  %vm862_vm5 = vcmp.eq.s32.totalorder %v3675_v20, %v4262_v58 }
 0x1df   : > { %1418 = vadd.xlane.f32.xlu0 %v1417_v63  ;;  %v1429_v63 = vadd.f32 %v1357_v59, %v4160_v33  ;;  %v4273_v59 = vsel %vm859_vm7, 1.0, %v3354_v47  ;;  %v4289_v57 = vsel %vm864_vm11, 1.0, %v3354_v47  ;;  %v1369_v48 = vmul.f32 %v4281_v56, %v4139_v29 }
 0x1e0   : > { %1427 = vadd.xlane.f32.xlu1 %v1426_v32  ;;  %v4265_v32 = vsel %vm853_vm2, 1.0, %v3354_v47  ;;  %v1371_v51 = vmul.f32 %v4273_v59, %v4139_v29  ;;  %vm868_vm12 = vcmp.eq.s32.totalorder %v3684_v24, %v4262_v58  ;;  %vm866_vm8 = vcmp.eq.s32.totalorder %v3681_v22, %v4262_v58 }
 0x1e1   : > { %v1365_v50 = vmul.f32 %v4265_v32, %v4139_v29  ;;  %v1447_v45 = vadd.f32 %v1369_v48, %v4160_v33  ;;  %vm872_vm13 = vcmp.eq.s32.totalorder %v3690_v26, %v4262_v58  ;;  %vm870_vm14 = vcmp.eq.s32.totalorder %v3687_v25, %v4262_v58 }
 0x1e2   : > { %v4324_v48 = vsel %vm872_vm13, 1.0, %v3354_v47  ;;  %vm876_vm15 = vcmp.eq.s32.totalorder %v5613_v43, %v4262_v58  ;;  %vm874_vm4 = vcmp.eq.s32.totalorder %v5615_v41, %v4262_v58  ;;  %vm880_vm3 = vcmp.eq.s32.totalorder %v5617_v40, %v4262_v58  ;;  %v5619_v41 = vld [vmem:[#allocation25_spill] sm:$0xff] }
 0x1e3   : > { %1424 = vadd.xlane.f32.xlu0 %v1423_v36  ;;  %v1367_v36 = vmul.f32 %v4254_v61, %v4139_v29  ;;  %v1384_v44 = vmul.f32 %v4324_v48, %v4147_v62  ;;  %vm878_vm1 = vcmp.eq.s32.totalorder %v5619_v41, %v4262_v58  ;;  %vm1021_vm11 = vcmp.gt.s32.totalorder %v3620_v1, %v4142_v54 }
 0x1e4   : > { %1433 = vadd.xlane.f32.xlu1 %v1432_v31  ;;  %vm1027_vm13 = vcmp.gt.s32.totalorder %v3633_v5, %v4142_v54 }
 0x1e5   : > { %v1444_v31 = vadd.f32 %v1367_v36, %v4160_v33  ;;  %v1450_v36 = vadd.f32 %v1371_v51, %v4160_v33  ;;  %v4316_v51 = vsel %vm866_vm8, 1.0, %v3354_v47  ;;  %vm1023_vm8 = vcmp.gt.s32.totalorder %v3627_v2, %v4142_v54 }
 0x1e7   : > { %1430 = vadd.xlane.f32.xlu0 %v1429_v63  ;;  %v1441_v63 = vadd.f32 %v1365_v50, %v4160_v33  ;;  %v4308_v50 = vsel %vm868_vm12, 1.0, %v3354_v47  ;;  %vm1025_vm12 = vcmp.gt.s32.totalorder %v3630_v4, %v4142_v54 }
 0x1e8   : > { %1439 = vadd.xlane.f32.xlu1 %v1438_v52  ;;  %v4297_v52 = vsel %vm862_vm5, 1.0, %v3354_v47  ;;  %v1380_v46 = vmul.f32 %v4308_v50, %v4147_v62 }
 0x1eb   : > { %1436 = vadd.xlane.f32.xlu0 %v1435_v53  ;;  %v1376_v53 = vmul.f32 %v4289_v57, %v4147_v62 }
 0x1ec   : > { %1445 = vadd.xlane.f32.xlu1 %v1444_v31  ;;  %v1374_v31 = vmul.f32 %v4297_v52, %v4147_v62 }
 0x1ed   : > { %v1456_v29 = vadd.f32 %v1376_v53, %v4301_v49  ;;  %v1462_v53 = vadd.f32 %v1380_v46, %v4301_v49  ;;  %v4348_v46 = vsel %vm874_vm4, 1.0, %v3354_v47  ;;  %vm1035_vm4 = vcmp.gt.s32.totalorder %v3647_v10, %v4142_v54 }
 0x1ee   : > { %v1453_v33 = vadd.f32 %v1374_v31, %v4301_v49  ;;  %5618 = vst [vmem:[#allocation70_spill] sm:$0xff] %v4348_v46  ;;  %v1386_v40 = vmul.f32 %v4348_v46, %v4147_v62  ;;  %v5624_v46 = vld [vmem:[#allocation30_spill] sm:$0xff] }
 0x1ef   : > { %1442 = vadd.xlane.f32.xlu0 %v1441_v63  ;;  %v1378_v63 = vmul.f32 %v4316_v51, %v4147_v62  ;;  %vm888_vm2 = vcmp.eq.s32.totalorder %v5624_v46, %v4262_v58 }
 0x1f0   : > { %1451 = vadd.xlane.f32.xlu1 %v1450_v36  ;;  %v4332_v36 = vsel %vm870_vm14, 1.0, %v3354_v47  ;;  %vm1031_vm14 = vcmp.gt.s32.totalorder %v3639_v7, %v4142_v54 }
 0x1f1   : > { %5614 = vst [vmem:[#allocation68_spill] sm:$0xff] %v4332_v36  ;;  %v1459_v31 = vadd.f32 %v1378_v63, %v4301_v49  ;;  %v1382_v42 = vmul.f32 %v4332_v36, %v4147_v62  ;;  %v5621_v36 = vld [vmem:[#allocation28_spill] sm:$0xff] }
 0x1f2   : > { %vm884_vm6 = vcmp.eq.s32.totalorder %v5621_v36, %v4262_v58 }
 0x1f3   : > { %1448 = vadd.xlane.f32.xlu0 %v1447_v45  ;;  %v4340_v45 = vsel %vm876_vm15, 1.0, %v3354_v47  ;;  %v1465_v63 = vadd.f32 %v1382_v42, %v4301_v49  ;;  %v4372_v42 = vsel %vm884_vm6, 1.0, %v3354_v47  ;;  %vm1029_vm15 = vcmp.gt.s32.totalorder %v3636_v6, %v4142_v54 }
 0x1f4   : > { %1457 = vadd.xlane.f32.xlu1 %v1456_v29  ;;  %5616 = vst [vmem:[#allocation69_spill] sm:$0xff] %v4340_v45  ;;  %v1468_v29 = vadd.f32 %v1384_v44, %v4301_v49  ;;  %v1388_v38 = vmul.f32 %v4340_v45, %v4147_v62  ;;  %v4364_v44 = vsel %vm878_vm1, 1.0, %v3354_v47  ;;  %v5623_v45 = vld [vmem:[#allocation27_spill] sm:$0xff]  ;;  %vm1039_vm1 = vcmp.gt.s32.totalorder %v3654_v12, %v4142_v54 }
 0x1f5   : > { %5622 = vst [vmem:[#allocation72_spill] sm:$0xff] %v4364_v44  ;;  %vm882_vm9 = vcmp.eq.s32.totalorder %v5623_v45, %v4262_v58  ;;  %v1390_v36 = vmul.f32 %v4364_v44, %v4147_v62  ;;  %v1396_v45 = vmul.f32 %v4372_v42, %v4147_v62  ;;  %v5627_v44 = vld [vmem:[#allocation32_spill] sm:$0xff]  ;;  %vm1037_vm6 = vcmp.gt.s32.totalorder %v3650_v11, %v4142_v54 }
 0x1f6   : > { %vm892_vm10 = vcmp.eq.s32.totalorder %v5627_v44, %v4262_v58 }
 0x1f7   : > { %1454 = vadd.xlane.f32.xlu0 %v1453_v33  ;;  %v4356_v33 = vsel %vm880_vm3, 1.0, %v3354_v47  ;;  %vm1033_vm3 = vcmp.gt.s32.totalorder %v3644_v9, %v4142_v54 }
 0x1f8   : > { %1463 = vadd.xlane.f32.xlu1 %v1462_v53  ;;  %5620 = vst [vmem:[#allocation71_spill] sm:$0xff] %v4356_v33  ;;  %v1474_v53 = vadd.f32 %v1388_v38, %v4301_v49  ;;  %v1392_v41 = vmul.f32 %v4356_v33, %v4147_v62  ;;  %v4380_v38 = vsel %vm882_vm9, 1.0, %v3354_v47  ;;  %v5626_v33 = vld [vmem:[#allocation29_spill] sm:$0xff]  ;;  %vm1043_vm9 = vcmp.gt.s32.totalorder %v3660_v14, %v4142_v54 }
 0x1f9   : > { %5625 = vst [vmem:[#allocation73_spill] sm:$0xff] %v4380_v38  ;;  %vm886_vm7 = vcmp.eq.s32.totalorder %v5626_v33, %v4262_v58  ;;  %v1394_v46 = vmul.f32 %v4380_v38, %v4147_v62  ;;  %v4406_v33 = vsel %vm892_vm10, 1.0, %v3354_v47  ;;  %vm1045_vm10 = vcmp.gt.s32.totalorder %v3663_v16, %v4142_v54 }
 0x1fa   : > { %5630 = vst [vmem:[#allocation75_spill] sm:$0xff] %v4406_v33 }
 0x1fb   : > { %1460 = vadd.xlane.f32.xlu0 %v1459_v31  ;;  %v1471_v31 = vadd.f32 %v1386_v40, %v4301_v49  ;;  %v4388_v40 = vsel %vm888_vm2, 1.0, %v3354_v47  ;;  %v1483_v44 = vadd.f32 %v1394_v46, %v4301_v49  ;;  %v4425_v46 = vsel %vm1025_vm12, 1.0, %v3354_v47 }
 0x1fc   : > { %1469 = vadd.xlane.f32.xlu1 %v1468_v29  ;;  %v1480_v29 = vadd.f32 %v1392_v41, %v4301_v49  ;;  %v4396_v41 = vsel %vm886_vm7, 1.0, %v3354_v47  ;;  %vm1041_vm2 = vcmp.gt.s32.totalorder %v3657_v13, %v4142_v54  ;;  %vm1047_vm7 = vcmp.gt.s32.totalorder %v3666_v17, %v4142_v54 }
 0x1fd   : > { %5628 = vst [vmem:[#allocation74_spill] sm:$0xff] %v4396_v41  ;;  %v1398_v38 = vmul.f32 %v4396_v41, %v4147_v62  ;;  %vm1056_vm12 = vcmp.gt.s32.totalorder %v3678_v21, %v4262_v58 }
 0x1ff   : > { %1466 = vadd.xlane.f32.xlu0 %v1465_v63  ;;  %v1477_v63 = vadd.f32 %v1390_v36, %v4301_v49  ;;  %v5629_v36 = vld [vmem:[#allocation31_spill] sm:$0xff] }
 0x200   : > { %1475 = vadd.xlane.f32.xlu1 %v1474_v53  ;;  %v1486_v53 = vadd.f32 %v1396_v45, %v4301_v49  ;;  %vm890_vm5 = vcmp.eq.s32.totalorder %v5629_v36, %v4262_v58  ;;  %v4414_v45 = vsel %vm1021_vm11, 1.0, %v3354_v47  ;;  %v1489_v36 = vadd.f32 %v1398_v38, %v4301_v49 }
 0x201   : > { %v1213_v4 = vadd.f32 %v4414_v45, %v4157_v34  ;;  %v1799_v41 = vmul.f32 %v4414_v45, %v4145_v8  ;;  %v1217_v34 = vadd.f32 %v4425_v46, %v4179_v28  ;;  %vm1051_vm11 = vcmp.gt.s32.totalorder %v3672_v19, %v4142_v54 }
 0x203   : > { %1472 = vadd.xlane.f32.xlu0 %v1471_v31  ;;  %v1400_v31 = vmul.f32 %v4388_v40, %v4147_v62 }
 0x204   : > { %1481 = vadd.xlane.f32.xlu1 %v1480_v29  ;;  %v4417_v29 = vsel %vm890_vm5, 1.0, %v3354_v47  ;;  %vm1049_vm5 = vcmp.gt.s32.totalorder %v3669_v18, %v4142_v54 }
 0x205   : > { %5631 = vst [vmem:[#allocation76_spill] sm:$0xff] %v4417_v29  ;;  %v1492_v1 = vadd.f32 %v1400_v31, %v4301_v49  ;;  %v4433_v31 = vmul.f32 0.0, %v4149_v15 }
 0x207   : > { %1478 = vadd.xlane.f32.xlu0 %v1477_v63  ;;  %v1404_v63 = vmul.f32 %v4406_v33, %v4147_v62  ;;  %v4436_v33 = vsel %vm1023_vm8, 1.0, %v3354_v47  ;;  %vm1054_vm8 = vcmp.gt.s32.totalorder %v3675_v20, %v4262_v58 }
 0x208   : > { %1487 = vadd.xlane.f32.xlu1 %v1486_v53  ;;  %v1402_v53 = vmul.f32 %v4417_v29, %v4147_v62  ;;  %v1215_v38 = vadd.f32 %v4436_v33, %v4173_v0  ;;  %v1643_v29 = vmul.f32 %v1217_v34, %v4145_v8  ;;  %v1803_v34 = vmul.f32 %v4425_v46, %v4145_v8 }
 0x209   : > { %v1498_v2 = vadd.f32 %v1404_v63, %v4301_v49  ;;  %v1863_v63 = vadd.f32 %v1799_v41, %v4433_v31  ;;  %v4466_v41 = vsel %vm1031_vm14, 1.0, %v3354_v47  ;;  %vm1058_vm14 = vcmp.gt.s32.totalorder %v3681_v22, %v4262_v58 }
 0x20a   : > { %v1495_v62 = vadd.f32 %v1402_v53, %v4301_v49  ;;  %v1641_v5 = vmul.f32 %v1215_v38, %v4145_v8  ;;  %v1709_v0 = vadd.f32 %v1643_v29, %v4433_v31  ;;  %v4471_v53 = vsel %vm1029_vm15, 1.0, %v3354_v47 }
 0x20b   : > { %1484 = vadd.xlane.f32.xlu0 %v1483_v44  ;;  %v1639_v44 = vmul.f32 %v1213_v4, %v4145_v8  ;;  %v1223_v6 = vadd.f32 %v4466_v41, %v4190_v37  ;;  %v4490_v37 = vsel %vm1035_vm4, 1.0, %v3354_v47  ;;  %vm1064_vm15 = vcmp.gt.s32.totalorder %v3690_v26, %v4262_v58 }
 0x20c   : > { %1493 = vadd.xlane.f32.xlu1 %v1492_v1  ;;  %v4450_v1 = vsel %vm1027_vm13, 1.0, %v3354_v47  ;;  %v1706_v4 = vadd.f32 %v1641_v5, %v4433_v31  ;;  %v1809_v5 = vmul.f32 %v4466_v41, %v4145_v8  ;;  %v1227_v9 = vadd.f32 %v4490_v37, %v4206_v30 }
 0x20d   : > { %v1703_v28 = vadd.f32 %v4433_v31, %v1639_v44  ;;  %v1219_v49 = vadd.f32 %v4450_v1, %v4176_v27  ;;  %v1805_v29 = vmul.f32 %v4450_v1, %v4145_v8  ;;  %v1649_v38 = vmul.f32 %v1223_v6, %v4145_v8 }
 0x20e   : > { %v4514_v30 = vsel %vm1039_vm1, 1.0, %v3354_v47  ;;  %v1813_v6 = vmul.f32 %v4490_v37, %v4145_v8  ;;  %vm1060_vm13 = vcmp.gt.s32.totalorder %v3684_v24, %v4262_v58  ;;  %vm1062_vm4 = vcmp.gt.s32.totalorder %v3687_v25, %v4262_v58 }
 0x20f   : > { %1490 = vadd.xlane.f32.xlu0 %v1489_v36  ;;  %v1801_v36 = vmul.f32 %v4436_v33, %v4145_v8  ;;  %v1645_v27 = vmul.f32 %v1219_v49, %v4145_v8  ;;  %v1872_v44 = vadd.f32 %v1805_v29, %v4433_v31  ;;  %v1718_v10 = vadd.f32 %v1649_v38, %v4433_v31 }
 0x210   : > { %1499 = vadd.xlane.f32.xlu1 %v1498_v2  ;;  %v1231_v11 = vadd.f32 %v4514_v30, %v4222_v39  ;;  %v4538_v39 = vsel %vm1043_vm9, 1.0, %v3354_v47 }
 0x211   : > { %v1866_v7 = vadd.f32 %v1801_v36, %v4433_v31  ;;  %v1712_v2 = vadd.f32 %v1645_v27, %v4433_v31  ;;  %v1653_v27 = vmul.f32 %v1227_v9, %v4145_v8  ;;  %v1235_v13 = vadd.f32 %v4538_v39, %v4238_v3 }
 0x212   : > { %v1657_v38 = vmul.f32 %v1231_v11, %v4145_v8  ;;  %v4562_v3 = vsel %vm1047_vm7, 1.0, %v3354_v47 }
 0x213   : > { %1496 = vadd.xlane.f32.xlu0 %v1495_v62  ;;  %v1221_v62 = vadd.f32 %v4471_v53, %v4201_v55  ;;  %v4495_v55 = vsel %vm1033_vm3, 1.0, %v3354_v47  ;;  %v1724_v12 = vadd.f32 %v1653_v27, %v4433_v31  ;;  %v1239_v16 = vadd.f32 %v4562_v3, %v4254_v61 }
 0x214   : > { %1864 = vadd.xlane.f32.xlu1 %v1863_v63  ;;  %v1869_v63 = vadd.f32 %v1803_v34, %v4433_v31  ;;  %v1225_v36 = vadd.f32 %v4495_v55, %v4214_v23  ;;  %v4519_v23 = vsel %vm1037_vm6, 1.0, %v3354_v47  ;;  %v1811_v34 = vmul.f32 %v4495_v55, %v4145_v8 }
 0x215   : > { %v1730_v14 = vadd.f32 %v1657_v38, %v4433_v31  ;;  %v1815_v9 = vmul.f32 %v4519_v23, %v4145_v8  ;;  %v4586_v61 = vsel %vm1051_vm11, 1.0, %v3354_v47  ;;  %vm1068_vm3 = vcmp.gt.s32.totalorder %v5613_v43, %v4262_v58 }
 0x216   : > { %v1651_v29 = vmul.f32 %v1225_v36, %v4145_v8  ;;  %v1661_v36 = vmul.f32 %v1235_v13, %v4145_v8  ;;  %v1243_v18 = vadd.f32 %v4586_v61, %v4273_v59  ;;  %v4610_v59 = vsel %vm1056_vm12, 1.0, %v3354_v47 }
 0x217   : > { %1704 = vadd.xlane.f32.xlu0 %v1703_v28  ;;  %v1647_v28 = vmul.f32 %v1221_v62, %v4145_v8  ;;  %v1229_v62 = vadd.f32 %v4519_v23, %v4230_v35  ;;  %v4543_v35 = vsel %vm1041_vm2, 1.0, %v3354_v47  ;;  %v1248_v20 = vadd.f32 %v4610_v59, %v4289_v57 }
 0x218   : > { %1710 = vadd.xlane.f32.xlu1 %v1709_v0  ;;  %v1807_v0 = vmul.f32 %v4471_v53, %v4145_v8  ;;  %v1736_v17 = vadd.f32 %v1661_v36, %v4433_v31  ;;  %v4634_v57 = vsel %vm1060_vm13, 1.0, %v3354_v47 }
 0x219   : > { %v1715_v49 = vadd.f32 %v1647_v28, %v4433_v31  ;;  %v1655_v28 = vmul.f32 %v1229_v62, %v4145_v8  ;;  %v1252_v22 = vadd.f32 %v4634_v57, %v4308_v50  ;;  %v4658_v50 = vsel %vm1064_vm15, 1.0, %v3354_v47 }
 0x21a   : > { %v1256_v25 = vadd.f32 %v4658_v50, %v4324_v48 }
 0x21b   : > { %1707 = vadd.xlane.f32.xlu0 %v1706_v4  ;;  %v1878_v4 = vadd.f32 %v1809_v5, %v4433_v31  ;;  %v1727_v5 = vadd.f32 %v1655_v28, %v4433_v31 }
 0x21c   : > { %1867 = vadd.xlane.f32.xlu1 %v1866_v7  ;;  %v1875_v7 = vadd.f32 %v1807_v0, %v4433_v31  ;;  %v1682_v48 = vmul.f32 %v1256_v25, %v4149_v15 }
 0x21f   : > { %1713 = vadd.xlane.f32.xlu0 %v1712_v2  ;;  %v1721_v2 = vadd.f32 %v1651_v29, %v4433_v31 }
 0x220   : > { %1873 = vadd.xlane.f32.xlu1 %v1872_v44  ;;  %v1884_v44 = vadd.f32 %v1813_v6, %v4433_v31 }
 0x223   : > { %1870 = vadd.xlane.f32.xlu0 %v1869_v63  ;;  %v1881_v63 = vadd.f32 %v1811_v34, %v4433_v31 }
 0x224   : > { %1719 = vadd.xlane.f32.xlu1 %v1718_v10  ;;  %v1817_v10 = vmul.f32 %v4514_v30, %v4145_v8 }
 0x226   : > { %v1890_v0 = vadd.f32 %v1817_v10, %v4433_v31  ;;  %v1669_v10 = vmul.f32 %v1243_v18, %v4145_v8  ;;  %v5632_v18 = vld [vmem:[#allocation68_spill] sm:$0xff] }
 0x227   : > { %1716 = vadd.xlane.f32.xlu0 %v1715_v49  ;;  %v1233_v49 = vadd.f32 %v4543_v35, %v4246_v60  ;;  %v4567_v60 = vsel %vm1045_vm10, 1.0, %v3354_v47 }
 0x228   : > { %1879 = vadd.xlane.f32.xlu1 %v1878_v4  ;;  %v1887_v4 = vadd.f32 %v1815_v9, %v4433_v31  ;;  %v1237_v6 = vadd.f32 %v4567_v60, %v4265_v32  ;;  %v4591_v32 = vsel %vm1049_vm5, 1.0, %v3354_v47  ;;  %v1748_v21 = vadd.f32 %v1669_v10, %v4433_v31 }
 0x229   : > { %v1659_v27 = vmul.f32 %v1233_v49, %v4145_v8  ;;  %v1241_v28 = vadd.f32 %v4591_v32, %v4281_v56  ;;  %v4615_v56 = vsel %vm1054_vm8, 1.0, %v3354_v47  ;;  %v1829_v9 = vmul.f32 %v4586_v61, %v4145_v8 }
 0x22a   : > { %v1663_v62 = vmul.f32 %v1237_v6, %v4145_v8  ;;  %v1246_v36 = vadd.f32 %v4615_v56, %v4297_v52  ;;  %v4639_v52 = vsel %vm1058_vm14, 1.0, %v3354_v47  ;;  %v1277_v10 = vsub.f32 1.0, %v4414_v45 }
 0x22b   : > { %1876 = vadd.xlane.f32.xlu0 %v1875_v7  ;;  %v1821_v7 = vmul.f32 %v4538_v39, %v4145_v8  ;;  %v1733_v29 = vadd.f32 %v1659_v27, %v4433_v31  ;;  %v1674_v27 = vmul.f32 %v1248_v20, %v4149_v15 }
 0x22c   : > { %1725 = vadd.xlane.f32.xlu1 %v1724_v12  ;;  %v1819_v12 = vmul.f32 %v4543_v35, %v4145_v8  ;;  %v1739_v38 = vadd.f32 %v1663_v62, %v4433_v31  ;;  %v1838_v62 = vmul.f32 %v4634_v57, %v4149_v15 }
 0x22d   : > { %v1896_v11 = vadd.f32 %v1821_v7, %v4433_v31  ;;  %v1672_v7 = vmul.f32 %v1246_v36, %v4149_v15  ;;  %v1754_v24 = vadd.f32 %v1674_v27, %v4145_v8  ;;  %v1842_v36 = vmul.f32 %v4658_v50, %v4149_v15 }
 0x22e   : > { %v1893_v34 = vadd.f32 %v1819_v12, %v4433_v31  ;;  %v1250_v12 = vadd.f32 %v4639_v52, %v4316_v51  ;;  %v4663_v51 = vsel %vm1062_vm4, 1.0, %v3354_v47 }
 0x22f   : > { %1722 = vadd.xlane.f32.xlu0 %v1721_v2  ;;  %v1665_v2 = vmul.f32 %v1239_v16, %v4145_v8  ;;  %v1834_v16 = vmul.f32 %v4610_v59, %v4149_v15 }
 0x230   : > { %1885 = vadd.xlane.f32.xlu1 %v1884_v44  ;;  %v1825_v44 = vmul.f32 %v4562_v3, %v4145_v8 }
 0x231   : > { %v1742_v19 = vadd.f32 %v1665_v2, %v4433_v31  ;;  %v1914_v6 = vadd.f32 %v1834_v16, %v4145_v8 }
 0x233   : > { %1882 = vadd.xlane.f32.xlu0 %v1881_v63  ;;  %v1823_v63 = vmul.f32 %v4567_v60, %v4145_v8 }
 0x234   : > { %1731 = vadd.xlane.f32.xlu1 %v1730_v14  ;;  %v1902_v14 = vadd.f32 %v1825_v44, %v4433_v31  ;;  %v1836_v44 = vmul.f32 %v4639_v52, %v4149_v15 }
 0x235   : > { %v1899_v13 = vadd.f32 %v1823_v63, %v4433_v31  ;;  %v5633_v63 = vld [vmem:[#allocation23_spill] sm:$0xff] }
 0x236   : > { %vm1066_vm1 = vcmp.gt.s32.totalorder %v5633_v63, %v4262_v58 }
 0x237   : > { %1728 = vadd.xlane.f32.xlu0 %v1727_v5  ;;  %v1667_v5 = vmul.f32 %v1241_v28, %v4145_v8  ;;  %v1920_v28 = vadd.f32 %v1838_v62, %v4145_v8 }
 0x238   : > { %1891 = vadd.xlane.f32.xlu1 %v1890_v0  ;;  %v1827_v0 = vmul.f32 %v4591_v32, %v4145_v8 }
 0x239   : > { %v1745_v49 = vadd.f32 %v1667_v5, %v4433_v31  ;;  %v1917_v5 = vadd.f32 %v1836_v44, %v4145_v8 }
 0x23b   : > { %1888 = vadd.xlane.f32.xlu0 %v1887_v4  ;;  %v1908_v4 = vadd.f32 %v1829_v9, %v4433_v31  ;;  %v4688_v9 = vsel %vm1066_vm1, 1.0, %v3354_v47 }
 0x23c   : > { %1737 = vadd.xlane.f32.xlu1 %v1736_v17  ;;  %v1905_v17 = vadd.f32 %v1827_v0, %v4433_v31  ;;  %v1832_v31 = vmul.f32 %v4615_v56, %v4149_v15  ;;  %v1283_v0 = vsub.f32 1.0, %v4450_v1  ;;  %v1287_v1 = vsub.f32 1.0, %v4466_v41 }
 0x23e   : > { %v1911_v2 = vadd.f32 %v1832_v31, %v4145_v8 }
 0x23f   : > { %1734 = vadd.xlane.f32.xlu0 %v1733_v29  ;;  %v1751_v29 = vadd.f32 %v1672_v7, %v4145_v8  ;;  %v1281_v7 = vsub.f32 1.0, %v4425_v46  ;;  %v5637_v46 = vld [vmem:[#allocation25_spill] sm:$0xff] }
 0x240   : > { %1897 = vadd.xlane.f32.xlu1 %v1896_v11  ;;  %v1678_v11 = vmul.f32 %v1252_v22, %v4149_v15  ;;  %v1285_v22 = vsub.f32 1.0, %v4471_v53  ;;  %vm1070_vm9 = vcmp.gt.s32.totalorder %v5637_v46, %v4262_v58 }
 0x242   : > { %v1760_v26 = vadd.f32 %v1678_v11, %v4145_v8 }
 0x243   : > { %1894 = vadd.xlane.f32.xlu0 %v1893_v34  ;;  %v1676_v34 = vmul.f32 %v1250_v12, %v4149_v15 }
 0x244   : > { %1743 = vadd.xlane.f32.xlu1 %v1742_v19 }
 0x245   : > { %v1757_v19 = vadd.f32 %v1676_v34, %v4145_v8 }
 0x247   : > { %1740 = vadd.xlane.f32.xlu0 %v1739_v38  ;;  %v1254_v38 = vadd.f32 %v4663_v51, %v5632_v18 }
 0x248   : > { %1903 = vadd.xlane.f32.xlu1 %v1902_v14  ;;  %v4682_v14 = vsel %vm1068_vm3, 1.0, %v3354_v47 }
 0x24b   : > { %1900 = vadd.xlane.f32.xlu0 %v1899_v13 }
 0x24c   : > { %1749 = vadd.xlane.f32.xlu1 %v1748_v21  ;;  %v1680_v21 = vmul.f32 %v1254_v38, %v4149_v15 }
 0x24e   : > { %v1763_v11 = vadd.f32 %v1680_v21, %v4145_v8 }
 0x24f   : > { %1746 = vadd.xlane.f32.xlu0 %v1745_v49  ;;  %v1279_v49 = vsub.f32 1.0, %v4436_v33  ;;  %v1840_v33 = vmul.f32 %v4663_v51, %v4149_v15 }
 0x250   : > { %1909 = vadd.xlane.f32.xlu1 %v1908_v4  ;;  %v5634_v4 = vld [vmem:[#allocation69_spill] sm:$0xff] }
 0x251   : > { %v1260_v45 = vadd.f32 %v4682_v14, %v5634_v4  ;;  %v1923_v38 = vadd.f32 %v1840_v33, %v4145_v8  ;;  %v1289_v33 = vsub.f32 1.0, %v4495_v55 }
 0x253   : > { %1906 = vadd.xlane.f32.xlu0 %v1905_v17  ;;  %v1766_v17 = vadd.f32 %v1682_v48, %v4145_v8  ;;  %v1686_v62 = vmul.f32 %v1260_v45, %v4149_v15  ;;  %v4718_v48 = vsel %vm1070_vm9, 1.0, %v3354_v47  ;;  %v5639_v45 = vld [vmem:[#allocation28_spill] sm:$0xff] }
 0x254   : > { %1755 = vadd.xlane.f32.xlu1 %v1754_v24  ;;  %v5635_v24 = vld [vmem:[#allocation26_spill] sm:$0xff]  ;;  %vm1076_vm2 = vcmp.gt.s32.totalorder %v5639_v45, %v4262_v58 }
 0x255   : > { %vm1072_vm6 = vcmp.gt.s32.totalorder %v5635_v24, %v4262_v58  ;;  %v4739_v55 = vsel %vm1076_vm2, 1.0, %v3354_v47 }
 0x256   : > { %v4712_v41 = vsel %vm1072_vm6, 1.0, %v3354_v47 }
 0x257   : > { %1752 = vadd.xlane.f32.xlu0 %v1751_v29  ;;  %v5636_v29 = vld [vmem:[#allocation70_spill] sm:$0xff] }
 0x258   : > { %1915 = vadd.xlane.f32.xlu1 %v1914_v6  ;;  %v1258_v31 = vadd.f32 %v4688_v9, %v5636_v29  ;;  %v1844_v29 = vmul.f32 %v4688_v9, %v4149_v15 }
 0x25a   : > { %v1684_v63 = vmul.f32 %v1258_v31, %v4149_v15  ;;  %v5640_v31 = vld [vmem:[#allocation72_spill] sm:$0xff] }
 0x25b   : > { %1912 = vadd.xlane.f32.xlu0 %v1911_v2 }
 0x25c   : > { %1761 = vadd.xlane.f32.xlu1 %v1760_v26  ;;  %v1926_v26 = vadd.f32 %v1842_v36, %v4145_v8  ;;  %v5638_v36 = vld [vmem:[#allocation71_spill] sm:$0xff] }
 0x25d   : > { %v793_v43 = vpop.xlane.xlu1 %792  ;;  %v1264_v4 = vadd.f32 %v4712_v41, %v5638_v36 }
 0x25e   : > { %v794_v13 = vrot.slane %v793_v43, 4 }
 0x25f   : > { %1758 = vadd.xlane.f32.xlu0 %v1757_v19 }
 0x260   : > { %v1407_v20 = vpop.xlane.xlu0 %1406  ;;  %v795_v27 = vadd.f32 %v794_v13, %v793_v43  ;;  %1921 = vadd.xlane.f32.xlu1 %v1920_v28  ;;  %v1291_v28 = vsub.f32 1.0, %v4490_v37 }
 0x261   : > { %v817_v16 = vpop.xlane.xlu1 %816  ;;  %v1501_v2 = vmul.f32 %v1407_v20, %v1277_v10 }
 0x262   : > { %v796_v12 = vrot.slane %v795_v27, 2  ;;  %v818_v6 = vrot.slane %v817_v16, 4 }
 0x263   : > { %1918 = vadd.xlane.f32.xlu0 %v1917_v5 }
 0x264   : > { %v1410_v34 = vpop.xlane.xlu0 %1409  ;;  %v819_v53 = vadd.f32 %v818_v6, %v817_v16  ;;  %1767 = vadd.xlane.f32.xlu1 %v1766_v17  ;;  %v797_v44 = vadd.f32 %v796_v12, %v795_v27  ;;  %v1262_v12 = vadd.f32 %v4718_v48, %v5640_v31  ;;  %v1297_v31 = vsub.f32 1.0, %v4543_v35 }
 0x265   : > { %v1503_v25 = vmul.f32 %v1410_v34, %v1279_v49  ;;  %v1602_v19 = vadd.f32 %v1410_v34, %v1407_v20  ;;  %v1416_v18 = vpop.xlane.xlu1 %1415  ;;  %v1772_v20 = vadd.f32 %v1686_v62, %v4145_v8  ;;  %v1846_v49 = vmul.f32 %v4682_v14, %v4149_v15  ;;  %v5641_v62 = vld [vmem:[#allocation27_spill] sm:$0xff] }
 0x266   : > { %v820_v43 = vrot.slane %v819_v53, 2  ;;  %v1507_v13 = vmul.f32 %v1416_v18, %v1283_v0  ;;  %v798_v5 = vrot.slane %v797_v44, 1  ;;  %v1769_v0 = vadd.f32 %v1684_v63, %v4145_v8 }
 0x267   : > { %v1565_v10 = vadd.f32 %v1503_v25, %v1501_v2  ;;  %1764 = vadd.xlane.f32.xlu0 %v1763_v11  ;;  %v1932_v34 = vadd.f32 %v1846_v49, %v4145_v8  ;;  %vm1074_vm7 = vcmp.gt.s32.totalorder %v5641_v62, %v4262_v58  ;;  %v1688_v63 = vmul.f32 %v1262_v12, %v4149_v15 }
 0x268   : > { %v1413_v21 = vpop.xlane.xlu0 %1412  ;;  %1927 = vadd.xlane.f32.xlu1 %v1926_v26  ;;  %v799_v17 = vadd.f32 %v798_v5, %v797_v44  ;;  %v821_v24 = vadd.f32 %v820_v43, %v819_v53  ;;  %v1690_v26 = vmul.f32 %v1264_v4, %v4149_v15  ;;  %v1268_v49 = vadd.f32 %v4739_v55, %v4372_v42 }
 0x269   : > { %v1505_v37 = vmul.f32 %v1413_v21, %v1281_v7  ;;  %v1603_v27 = vadd.f32 %v1602_v19, %v1413_v21  ;;  %v1422_v16 = vpop.xlane.xlu1 %1421  ;;  %v4747_v21 = vsel %vm1074_vm7, 1.0, %v3354_v47  ;;  %v1303_v62 = vsub.f32 1.0, %v4562_v3 }
 0x26a   : > { %v1511_v11 = vmul.f32 %v1422_v16, %v1287_v1  ;;  %3005 = vpush %v799_v17  ;;  %v822_v7 = vrot.slane %v821_v24, 1  ;;  %v5642_v17 = vld [vmem:[#allocation73_spill] sm:$0xff]  ;;  %v1694_v12 = vmul.f32 %v1268_v49, %v4149_v15  ;;  %v5645_v49 = vld [vmem:[#allocation74_spill] sm:$0xff] }
 0x26b   : > { %v1566_v6 = vadd.f32 %v1565_v10, %v1505_v37  ;;  %1924 = vadd.xlane.f32.xlu0 %v1923_v38  ;;  %v1604_v46 = vadd.f32 %v1603_v27, %v1416_v18  ;;  %v1929_v18 = vadd.f32 %v1844_v29, %v4145_v8  ;;  %v1295_v38 = vsub.f32 1.0, %v4514_v30 }
 0x26c   : > { %v1419_v2 = vpop.xlane.xlu0 %1418  ;;  %1773 = vadd.xlane.f32.xlu1 %v1772_v20  ;;  %v823_v19 = vadd.f32 %v822_v7, %v821_v24  ;;  %v1850_v20 = vmul.f32 %v4712_v41, %v4149_v15  ;;  %v1299_v37 = vsub.f32 1.0, %v4538_v39  ;;  %v1848_v27 = vmul.f32 %v4718_v48, %v4149_v15  ;;  %v5643_v24 = vld [vmem:[#allocation30_spill] sm:$0xff] }
 0x26d   : > { %v1509_v53 = vmul.f32 %v1419_v2, %v1285_v22  ;;  %v1567_v25 = vadd.f32 %v1566_v6, %v1507_v13  ;;  %v1605_v1 = vadd.f32 %v1604_v46, %v1419_v2  ;;  %v1428_v44 = vpop.xlane.xlu1 %1427  ;;  %v1293_v13 = vsub.f32 1.0, %v4519_v23  ;;  %v5644_v6 = vld [vmem:[#allocation29_spill] sm:$0xff] }
 0x26e   : > { %v1515_v10 = vmul.f32 %v1428_v44, %v1291_v28  ;;  %3007 = vpush %v823_v19  ;;  %v1778_v28 = vadd.f32 %v1690_v26, %v4145_v8  ;;  %v1266_v23 = vadd.f32 %v4747_v21, %v5642_v17  ;;  %vm1080_vm10 = vcmp.gt.s32.totalorder %v5643_v24, %v4262_v58  ;;  %v5647_v17 = vld [vmem:[#allocation31_spill] sm:$0xff] }
 0x26f   : > { %v1568_v43 = vadd.f32 %v1567_v25, %v1509_v53  ;;  %1770 = vadd.xlane.f32.xlu0 %v1769_v0  ;;  %v1606_v5 = vadd.f32 %v1605_v1, %v1422_v16  ;;  %v1938_v39 = vadd.f32 %v1850_v20, %v4145_v8  ;;  %vm1078_vm11 = vcmp.gt.s32.totalorder %v5644_v6, %v4262_v58 }
 0x270   : > { %v1425_v22 = vpop.xlane.xlu0 %1424  ;;  %1933 = vadd.xlane.f32.xlu1 %v1932_v34  ;;  %v4769_v2 = vsel %vm1080_vm10, 1.0, %v3354_v47  ;;  %v1935_v26 = vadd.f32 %v1848_v27, %v4145_v8  ;;  %v1692_v35 = vmul.f32 %v1266_v23, %v4149_v15  ;;  %v4775_v19 = vsel %vm1078_vm11, 1.0, %v3354_v47 }
 0x271   : > { %v1513_v30 = vmul.f32 %v1425_v22, %v1289_v33  ;;  %v1569_v36 = vadd.f32 %v1568_v43, %v1511_v11  ;;  %v1607_v4 = vadd.f32 %v1606_v5, %v1425_v22  ;;  %v1434_v45 = vpop.xlane.xlu1 %1433  ;;  %v1775_v33 = vadd.f32 %v1688_v63, %v4145_v8 }
 0x272   : > { %v1519_v42 = vmul.f32 %v1434_v45, %v1295_v38  ;;  %v1854_v38 = vmul.f32 %v4739_v55, %v4149_v15  ;;  %v1272_v63 = vadd.f32 %v4769_v2, %v4388_v40  ;;  %v1784_v5 = vadd.f32 %v1694_v12, %v4145_v8 }
 0x273   : > { %v1570_v16 = vadd.f32 %v1569_v36, %v1513_v30  ;;  %1930 = vadd.xlane.f32.xlu0 %v1929_v18  ;;  %v1608_v0 = vadd.f32 %v1607_v4, %v1428_v44  ;;  %v1301_v18 = vsub.f32 1.0, %v4567_v60  ;;  %v1852_v20 = vmul.f32 %v4747_v21, %v4149_v15  ;;  %v5646_v30 = vld [vmem:[#allocation32_spill] sm:$0xff] }
 0x274   : > { %v1431_v29 = vpop.xlane.xlu0 %1430  ;;  %1779 = vadd.xlane.f32.xlu1 %v1778_v28  ;;  %v1270_v60 = vadd.f32 %v4775_v19, %v5645_v49  ;;  %vm1084_vm5 = vcmp.gt.s32.totalorder %v5646_v30, %v4262_v58  ;;  %v1781_v28 = vadd.f32 %v1692_v35, %v4145_v8  ;;  %v1698_v27 = vmul.f32 %v1272_v63, %v4149_v15 }
 0x275   : > { %v1517_v11 = vmul.f32 %v1431_v29, %v1293_v13  ;;  %v1571_v46 = vadd.f32 %v1570_v16, %v1515_v10  ;;  %v1609_v7 = vadd.f32 %v1608_v0, %v1431_v29  ;;  %v1440_v34 = vpop.xlane.xlu1 %1439  ;;  %v1307_v13 = vsub.f32 1.0, %v4586_v61 }
 0x276   : > { %v1523_v25 = vmul.f32 %v1440_v34, %v1299_v37  ;;  %v1305_v37 = vsub.f32 1.0, %v4591_v32  ;;  %v1944_v61 = vadd.f32 %v1854_v38, %v4145_v8  ;;  %vm1082_vm12 = vcmp.gt.s32.totalorder %v5647_v17, %v4262_v58 }
 0x277   : > { %v1572_v53 = vadd.f32 %v1571_v46, %v1517_v11  ;;  %1776 = vadd.xlane.f32.xlu0 %v1775_v33  ;;  %v1610_v1 = vadd.f32 %v1609_v7, %v1434_v45  ;;  %v1941_v33 = vadd.f32 %v1852_v20, %v4145_v8  ;;  %v1312_v29 = vsub.f32 1.0, %v4610_v59 }
 0x278   : > { %v1437_v44 = vpop.xlane.xlu0 %1436  ;;  %1939 = vadd.xlane.f32.xlu1 %v1938_v39  ;;  %v1696_v32 = vmul.f32 %v1270_v60, %v4149_v15  ;;  %v4803_v6 = vsel %vm1082_vm12, 1.0, %v3354_v47  ;;  %v1310_v46 = vsub.f32 1.0, %v4615_v56  ;;  %v1858_v7 = vmul.f32 %v4769_v2, %v4149_v15 }
 0x279   : > { %v1521_v43 = vmul.f32 %v1437_v44, %v1297_v31  ;;  %v1573_v3 = vadd.f32 %v1572_v53, %v1519_v42  ;;  %v1611_v10 = vadd.f32 %v1610_v1, %v1437_v44  ;;  %v1446_v22 = vpop.xlane.xlu1 %1445  ;;  %v4797_v42 = vsel %vm1084_vm5, 1.0, %v3354_v47  ;;  %v5649_v44 = vld [vmem:[#allocation76_spill] sm:$0xff] }
 0x27a   : > { %v1527_v40 = vmul.f32 %v1446_v22, %v1303_v62  ;;  %v1790_v53 = vadd.f32 %v1698_v27, %v4145_v8  ;;  %v1316_v1 = vsub.f32 1.0, %v4634_v57  ;;  %v1856_v47 = vmul.f32 %v4775_v19, %v4149_v15 }
 0x27b   : > { %v1574_v36 = vadd.f32 %v1573_v3, %v1521_v43  ;;  %1936 = vadd.xlane.f32.xlu0 %v1935_v26  ;;  %v1612_v4 = vadd.f32 %v1611_v10, %v1440_v34  ;;  %v5648_v34 = vld [vmem:[#allocation75_spill] sm:$0xff]  ;;  %v1274_v56 = vadd.f32 %v4803_v6, %v5649_v44  ;;  %v1787_v43 = vadd.f32 %v1696_v32, %v4145_v8 }
 0x27c   : > { %v1443_v45 = vpop.xlane.xlu0 %1442  ;;  %1785 = vadd.xlane.f32.xlu1 %v1784_v5  ;;  %v1276_v26 = vadd.f32 %v4797_v42, %v5648_v34  ;;  %v1314_v10 = vsub.f32 1.0, %v4639_v52  ;;  %v1950_v20 = vadd.f32 %v1858_v7, %v4145_v8  ;;  %v1947_v60 = vadd.f32 %v1856_v47, %v4145_v8 }
 0x27d   : > { %v1525_v23 = vmul.f32 %v1443_v45, %v1301_v18  ;;  %v1575_v24 = vadd.f32 %v1574_v36, %v1523_v25  ;;  %v1613_v16 = vadd.f32 %v1612_v4, %v1443_v45  ;;  %v1452_v0 = vpop.xlane.xlu1 %1451  ;;  %v1320_v30 = vsub.f32 1.0, %v4658_v50 }
 0x27e   : > { %v1531_v39 = vmul.f32 %v1452_v0, %v1307_v13  ;;  %v1702_v5 = vmul.f32 %v1276_v26, %v4149_v15  ;;  %v1700_v36 = vmul.f32 %v1274_v56, %v4149_v15  ;;  %v1862_v27 = vmul.f32 %v4797_v42, %v4149_v15 }
 0x27f   : > { %v1576_v31 = vadd.f32 %v1575_v24, %v1525_v23  ;;  %1782 = vadd.xlane.f32.xlu0 %v1781_v28  ;;  %v1614_v12 = vadd.f32 %v1613_v16, %v1446_v22 }
 0x280   : > { %v1449_v11 = vpop.xlane.xlu0 %1448  ;;  %1945 = vadd.xlane.f32.xlu1 %v1944_v61  ;;  %v1796_v61 = vadd.f32 %v1702_v5, %v4145_v8 }
 0x281   : > { %v1529_v62 = vmul.f32 %v1449_v11, %v1305_v37  ;;  %v1577_v59 = vadd.f32 %v1576_v31, %v1527_v40  ;;  %v1615_v35 = vadd.f32 %v1614_v12, %v1449_v11  ;;  %v1458_v25 = vpop.xlane.xlu1 %1457  ;;  %v1318_v37 = vsub.f32 1.0, %v4663_v51 }
 0x282   : > { %v1536_v63 = vmul.f32 %v1458_v25, %v1312_v29  ;;  %v1535_v40 = vmul.f32 0.0, %v1458_v25  ;;  %v1860_v29 = vmul.f32 %v4803_v6, %v4149_v15  ;;  %v1322_v11 = vsub.f32 1.0, %v4688_v9 }
 0x283   : > { %v1578_v18 = vadd.f32 %v1577_v59, %v1529_v62  ;;  %v1616_v38 = vadd.f32 %v1615_v35, %v1452_v0  ;;  %1942 = vadd.xlane.f32.xlu0 %v1941_v33  ;;  %v1793_v0 = vadd.f32 %v1700_v36, %v4145_v8  ;;  %v1324_v33 = vsub.f32 1.0, %v4682_v14 }
 0x284   : > { %v1455_v3 = vpop.xlane.xlu0 %1454  ;;  %1791 = vadd.xlane.f32.xlu1 %v1790_v53  ;;  %v1953_v14 = vadd.f32 %v1860_v29, %v4145_v8  ;;  %v1328_v15 = vsub.f32 1.0, %v4712_v41  ;;  %v1326_v9 = vsub.f32 1.0, %v4718_v48 }
 0x285   : > { %v1533_v22 = vmul.f32 0.0, %v1455_v3  ;;  %v1534_v13 = vmul.f32 %v1455_v3, %v1310_v46  ;;  %v1579_v57 = vadd.f32 %v1578_v18, %v1531_v39  ;;  %v1464_v49 = vpop.xlane.xlu1 %1463  ;;  %v1956_v46 = vadd.f32 %v1862_v27, %v4145_v8 }
 0x286   : > { %v1540_v52 = vmul.f32 %v1464_v49, %v1316_v1  ;;  %v1539_v32 = vmul.f32 0.0, %v1464_v49 }
 0x287   : > { %v1580_v4 = vadd.f32 %v1579_v57, %v1533_v22  ;;  %v1617_v28 = vadd.f32 %v1616_v38, %v1534_v13  ;;  %1788 = vadd.xlane.f32.xlu0 %v1787_v43  ;;  %v1332_v43 = vsub.f32 1.0, %v4739_v55  ;;  %v1330_v22 = vsub.f32 1.0, %v4747_v21 }
 0x288   : > { %v1461_v45 = vpop.xlane.xlu0 %1460  ;;  %1951 = vadd.xlane.f32.xlu1 %v1950_v20 }
 0x289   : > { %v1537_v17 = vmul.f32 0.0, %v1461_v45  ;;  %v1538_v23 = vmul.f32 %v1461_v45, %v1314_v10  ;;  %v1581_v24 = vadd.f32 %v1580_v4, %v1535_v40  ;;  %v1618_v16 = vadd.f32 %v1617_v28, %v1536_v63  ;;  %v1470_v50 = vpop.xlane.xlu1 %1469 }
 0x28a   : > { %v1544_v39 = vmul.f32 %v1470_v50, %v1320_v30  ;;  %v1543_v35 = vmul.f32 0.0, %v1470_v50  ;;  %v1334_v28 = vsub.f32 1.0, %v4775_v19  ;;  %v1340_v50 = vsub.f32 1.0, %v4797_v42 }
 0x28b   : > { %v1582_v51 = vadd.f32 %v1581_v24, %v1537_v17  ;;  %v1619_v31 = vadd.f32 %v1618_v16, %v1538_v23  ;;  %1948 = vadd.xlane.f32.xlu0 %v1947_v60  ;;  %v1336_v60 = vsub.f32 1.0, %v4769_v2  ;;  %v1338_v2 = vsub.f32 1.0, %v4803_v6 }
 0x28c   : > { %v1467_v12 = vpop.xlane.xlu0 %1466  ;;  %1797 = vadd.xlane.f32.xlu1 %v1796_v61 }
 0x28d   : > { %v1541_v7 = vmul.f32 0.0, %v1467_v12  ;;  %v1542_v34 = vmul.f32 %v1467_v12, %v1318_v37  ;;  %v1583_v26 = vadd.f32 %v1582_v51, %v1539_v32  ;;  %v1620_v62 = vadd.f32 %v1619_v31, %v1540_v52  ;;  %v1476_v59 = vpop.xlane.xlu1 %1475 }
 0x28e   : > { %v1548_v1 = vmul.f32 %v1476_v59, %v1324_v33  ;;  %v1547_v3 = vmul.f32 0.0, %v1476_v59 }
 0x28f   : > { %v1584_v53 = vadd.f32 %v1583_v26, %v1541_v7  ;;  %v1621_v25 = vadd.f32 %v1620_v62, %v1542_v34  ;;  %1794 = vadd.xlane.f32.xlu0 %v1793_v0 }
 0x290   : > { %v1473_v47 = vpop.xlane.xlu0 %1472  ;;  %1957 = vadd.xlane.f32.xlu1 %v1956_v46 }
 0x291   : > { %v1545_v44 = vmul.f32 0.0, %v1473_v47  ;;  %v1546_v56 = vmul.f32 %v1473_v47, %v1322_v11  ;;  %v1585_v18 = vadd.f32 %v1584_v53, %v1543_v35  ;;  %v1622_v38 = vadd.f32 %v1621_v25, %v1544_v39  ;;  %v1482_v63 = vpop.xlane.xlu1 %1481 }
 0x292   : > { %v1552_v41 = vmul.f32 %v1482_v63, %v1328_v15  ;;  %v1551_v30 = vmul.f32 0.0, %v1482_v63 }
 0x293   : > { %v1586_v8 = vadd.f32 %v1585_v18, %v1545_v44  ;;  %v1623_v10 = vadd.f32 %v1622_v38, %v1546_v56  ;;  %1954 = vadd.xlane.f32.xlu0 %v1953_v14 }
 0x294   : > { %v1479_v5 = vpop.xlane.xlu0 %1478 }
 0x295   : > { %v1549_v13 = vmul.f32 0.0, %v1479_v5  ;;  %v1550_v57 = vmul.f32 %v1479_v5, %v1326_v9  ;;  %v1587_v20 = vadd.f32 %v1586_v8, %v1547_v3  ;;  %v1624_v48 = vadd.f32 %v1623_v10, %v1548_v1  ;;  %v1488_v49 = vpop.xlane.xlu1 %1487 }
 0x296   : > { %v1556_v4 = vmul.f32 %v1488_v49, %v1332_v43  ;;  %v1555_v21 = vmul.f32 0.0, %v1488_v49 }
 0x297   : > { %v1588_v36 = vadd.f32 %v1587_v20, %v1549_v13  ;;  %v1625_v40 = vadd.f32 %v1624_v48, %v1550_v57 }
 0x298   : > { %v1485_v55 = vpop.xlane.xlu0 %1484 }
 0x299   : > { %v1553_v52 = vmul.f32 0.0, %v1485_v55  ;;  %v1554_v45 = vmul.f32 %v1485_v55, %v1330_v22  ;;  %v1589_v37 = vadd.f32 %v1588_v36, %v1551_v30  ;;  %v1626_v61 = vadd.f32 %v1625_v40, %v1552_v41  ;;  %v1494_v27 = vpop.xlane.xlu1 %1493  ;;  %v5650_v30 = vld [vmem:[#allocation21_spill] sm:$0xff] }
 0x29a   : > { %v1560_v24 = vmul.f32 %v1494_v27, %v1336_v60  ;;  %v1559_v19 = vmul.f32 0.0, %v1494_v27  ;;  %vm2221_vm8 = vcmp.ge.s32.totalorder %v5650_v30, 1 }
 0x29b   : > { %v1590_v17 = vadd.f32 %v1589_v37, %v1553_v52  ;;  %v1627_v23 = vadd.f32 %v1626_v61, %v1554_v45  ;;  %s3006_s21 = spop %3005 }
 0x29c   : > { %v1491_v16 = vpop.xlane.xlu0 %1490  ;;  %s801_s26 = smax.f32 %s3355_s29, %s3006_s21 }
 0x29d   : > { %v1557_v0 = vmul.f32 0.0, %v1491_v16  ;;  %v1558_v33 = vmul.f32 %v1491_v16, %v1334_v28  ;;  %v1591_v29 = vadd.f32 %v1590_v17, %v1555_v21  ;;  %v1628_v32 = vadd.f32 %v1627_v23, %v1556_v4  ;;  %v1500_v51 = vpop.xlane.xlu1 %1499 }
 0x29e   : > { %v1564_v12 = vmul.f32 %v1500_v51, %v1340_v50  ;;  %v1563_v62 = vmul.f32 0.0, %v1500_v51  ;;  %v1959_v35 = vstv %s801_s26 }
 0x29f   : > { %v1592_v31 = vadd.f32 %v1591_v29, %v1557_v0  ;;  %v1629_v39 = vadd.f32 %v1628_v32, %v1558_v33  ;;  %s3008_s11 = spop %3007  ;;  %v5655_v0 = vld [vmem:[#allocation33_spill] sm:$0xff] }
 0x2a0   : > { %v1497_v11 = vpop.xlane.xlu0 %1496  ;;  %s825_s24 = smax.f32 %s3355_s29, %s3008_s11 }
 0x2a1   : > { %v1561_v46 = vmul.f32 0.0, %v1497_v11  ;;  %v1562_v7 = vmul.f32 %v1497_v11, %v1338_v2  ;;  %v1593_v34 = vadd.f32 %v1592_v31, %v1559_v19  ;;  %v1630_v26 = vadd.f32 %v1629_v39, %v1560_v24  ;;  %v1865_v6 = vpop.xlane.xlu1 %1864  ;;  %v5660_v39 = vld [vmem:[#allocation34_spill] sm:$0xff]  ;;  %v5672_v31 = vld [vmem:[#allocation41_spill] sm:$0xff] }
 0x2a2   : > { %v1963_v42 = vstv %s825_s24 }
 0x2a3   : > { %v1594_v59 = vadd.f32 %v1593_v34, %v1561_v46  ;;  %v1631_v14 = vadd.f32 %v1630_v26, %v1562_v7  ;;  %3141 = vrcp.f32 %v1963_v42  ;;  %v5661_v34 = vld [vmem:[#allocation36_spill] sm:$0xff] }
 0x2a4   : > { %v1705_v15 = vpop.xlane.xlu0 %1704  ;;  %3143 = vrcp.f32 %v1959_v35  ;;  %v5664_v35 = vld [vmem:[#allocation35_spill] sm:$0xff] }
 0x2a5   : > { %v1595_v53 = vadd.f32 %v1594_v59, %v1563_v62  ;;  %v1632_v25 = vadd.f32 %v1631_v14, %v1564_v12  ;;  %v1711_v1 = vpop.xlane.xlu1 %1710 }
 0x2a7   : > { %v1596_v47 = vrot.slane %v1595_v53, 4  ;;  %v1633_v9 = vrot.slane %v1632_v25, 4 }
 0x2a8   : > { %v1708_v44 = vpop.xlane.xlu0 %1707 }
 0x2a9   : > { %v1597_v56 = vadd.f32 %v1596_v47, %v1595_v53  ;;  %v1634_v18 = vadd.f32 %v1633_v9, %v1632_v25  ;;  %v1868_v38 = vpop.xlane.xlu1 %1867 }
 0x2ab   : > { %v1598_v63 = vrot.slane %v1597_v56, 2  ;;  %v1635_v43 = vrot.slane %v1634_v18, 2 }
 0x2ac   : > { %v1714_v3 = vpop.xlane.xlu0 %1713 }
 0x2ad   : > { %v1599_v8 = vadd.f32 %v1598_v63, %v1597_v56  ;;  %v1636_v10 = vadd.f32 %v1635_v43, %v1634_v18  ;;  %v1874_v41 = vpop.xlane.xlu1 %1873  ;;  %v4842_v5 = vpop.eup %3141  ;;  %v5665_v56 = vld [vmem:[#allocation38_spill] sm:$0xff] }
 0x2ae   : > { %v3144_v49 = vpop.eup %3143  ;;  %v1997_v60 = vmul.f32 %v4842_v5, %v1865_v6  ;;  %v1965_v36 = vmul.f32 %v4842_v5, %v1705_v15  ;;  %v4848_v40 = vmul.f32 %v4842_v5, %v1711_v1  ;;  %v1966_v52 = vmul.f32 %v4842_v5, %v1708_v44 }
 0x2af   : > { %v1600_v22 = vrot.slane %v1599_v8, 1  ;;  %v1637_v13 = vrot.slane %v1636_v10, 1  ;;  %v1998_v45 = vmul.f32 %v4842_v5, %v1868_v38  ;;  %v1968_v37 = vmul.f32 %v4842_v5, %v1714_v3 }
 0x2b0   : > { %v1871_v57 = vpop.xlane.xlu0 %1870  ;;  %v2000_v61 = vmul.f32 %v4842_v5, %v1874_v41 }
 0x2b1   : > { %v1601_v20 = vadd.f32 %v1600_v22, %v1599_v8  ;;  %v1638_v48 = vadd.f32 %v1637_v13, %v1636_v10  ;;  %v1720_v4 = vpop.xlane.xlu1 %1719  ;;  %v1999_v27 = vmul.f32 %v4842_v5, %v1871_v57  ;;  %v5668_v10 = vld [vmem:[#allocation37_spill] sm:$0xff] }
 0x2b2   : > { %v4860_v21 = vmul.f32 %v4842_v5, %v1720_v4 }
 0x2b3   : > { %v4850_v55 = vmul.f32 %v3144_v49, %v1601_v20  ;;  %v4852_v28 = vmul.f32 %v3144_v49, %v1638_v48  ;;  %v5669_v49 = vld [vmem:[#allocation40_spill] sm:$0xff] }
 0x2b4   : > { %v1717_v17 = vpop.xlane.xlu0 %1716 }
 0x2b5   : > { %vm2029_vm13 = vcmp.ge.f32.partialorder %v4850_v55, %v1997_v60  ;;  %vm2030_vm14 = vcmp.ge.f32.partialorder %v4852_v28, %v1997_v60  ;;  %vm2093_vm15 = vcmp.le.f32.partialorder %v4850_v55, %v1965_v36  ;;  %vm2094_vm4 = vcmp.le.f32.partialorder %v4852_v28, %v1965_v36  ;;  %v1880_v23 = vpop.xlane.xlu1 %1879 }
 0x2b6   : > { %vm2157_vm3 = vmand %vm2029_vm13, %vm2093_vm15  ;;  %vm2095_vm9 = vcmp.le.f32.partialorder %v4850_v55, %v1966_v52  ;;  %vm2096_vm2 = vcmp.le.f32.partialorder %v4852_v28, %v1966_v52  ;;  %vm2031_vm10 = vcmp.ge.f32.partialorder %v4850_v55, %v1998_v45  ;;  %vm2032_vm11 = vcmp.ge.f32.partialorder %v4852_v28, %v1998_v45 }
 0x2b7   : > { %vm2158_vm7 = vmand %vm2030_vm14, %vm2094_vm4  ;;  %vm2099_vm5 = vcmp.le.f32.partialorder %v4850_v55, %v1968_v37  ;;  %vm2100_vm12 = vcmp.le.f32.partialorder %v4852_v28, %v1968_v37  ;;  %vm2035_vm15 = vcmp.ge.f32.partialorder %v4850_v55, %v2000_v61  ;;  %vm2036_vm0 = vcmp.ge.f32.partialorder %v4852_v28, %v2000_v61  ;;  %v5670_v37 = vld [vmem:[#allocation39_spill] sm:$0xff] }
 0x2b8   : > { %vm4878_vm13 = vmand %vm2157_vm3, %vm2221_vm8  ;;  %vm2033_vm14 = vcmp.ge.f32.partialorder %v4850_v55, %v1999_v27  ;;  %vm2034_vm4 = vcmp.ge.f32.partialorder %v4852_v28, %v1999_v27  ;;  %v1877_v16 = vpop.xlane.xlu0 %1876  ;;  %vm2103_vm3 = vcmp.le.f32.partialorder %v4850_v55, %v4860_v21  ;;  %vm2104_vm1 = vcmp.le.f32.partialorder %v4852_v28, %v4860_v21 }
 0x2b9   : > { %vm4888_vm6 = vmand %vm2158_vm7, %vm2221_vm8  ;;  %v1969_v2 = vmul.f32 %v4842_v5, %v1717_v17  ;;  %v2317_v33 = vsel %vm4878_vm13, %v5655_v0, 256.0  ;;  %v2002_v32 = vmul.f32 %v4842_v5, %v1880_v23  ;;  %v2001_v51 = vmul.f32 %v4842_v5, %v1877_v16  ;;  %v1726_v19 = vpop.xlane.xlu1 %1725 }
 0x2ba   : > { %vm4904_vm8 = vmand %vm2031_vm10, %vm2095_vm9  ;;  %v1972_v11 = vmul.f32 %v4842_v5, %v1726_v19  ;;  %v2318_v42 = vsel %vm4888_vm6, %v5655_v0, 256.0 }
 0x2bb   : > { %vm4914_vm7 = vmand %vm2032_vm11, %vm2096_vm2  ;;  %v2319_v12 = vsel %vm4904_vm8, %v5660_v39, 256.0  ;;  %vm2039_vm11 = vcmp.ge.f32.partialorder %v4850_v55, %v2002_v32  ;;  %vm2040_vm13 = vcmp.ge.f32.partialorder %v4852_v28, %v2002_v32  ;;  %vm2037_vm8 = vcmp.ge.f32.partialorder %v4850_v55, %v2001_v51 }
 0x2bc   : > { %v2320_v46 = vsel %vm4914_vm7, %v5660_v39, 256.0  ;;  %vm2163_vm2 = vmand %vm2035_vm15, %vm2099_vm5  ;;  %v1723_v7 = vpop.xlane.xlu0 %1722  ;;  %vm2038_vm7 = vcmp.ge.f32.partialorder %v4852_v28, %v2001_v51  ;;  %vm2107_vm9 = vcmp.le.f32.partialorder %v4850_v55, %v1972_v11  ;;  %vm2108_vm5 = vcmp.le.f32.partialorder %v4852_v28, %v1972_v11 }
 0x2bd   : > { %vm2164_vm10 = vmand %vm2036_vm0, %vm2100_vm12  ;;  %v2323_v26 = vsel %vm2163_vm2, %v5661_v34, 256.0  ;;  %vm5662_vm15 = vcmp.le.f32.partialorder %v4850_v55, %v4848_v40  ;;  %v1971_v59 = vmul.f32 %v4842_v5, %v1723_v7  ;;  %v1886_v14 = vpop.xlane.xlu1 %1885  ;;  %vm5663_vm12 = vcmp.le.f32.partialorder %v4852_v28, %v4848_v40 }
 0x2be   : > { %v2324_v6 = vsel %vm2164_vm10, %v5661_v34, 256.0  ;;  %v2382_v62 = vmin.f32 %v2319_v12, %v2323_v26  ;;  %vm2161_vm0 = vmand %vm2033_vm14, %vm5662_vm15  ;;  %v2004_v25 = vmul.f32 %v4842_v5, %v1886_v14 }
 0x2bf   : > { %v2419_v15 = vmin.f32 %v2320_v46, %v2324_v6  ;;  %vm2162_vm2 = vmand %vm2034_vm4, %vm5663_vm12  ;;  %v2321_v53 = vsel %vm2161_vm0, %v5664_v35, 256.0  ;;  %vm2105_vm14 = vcmp.le.f32.partialorder %v4850_v55, %v1971_v59  ;;  %vm2106_vm10 = vcmp.le.f32.partialorder %v4852_v28, %v1971_v59  ;;  %v5673_v59 = vld [vmem:[#allocation44_spill] sm:$0xff] }
 0x2c0   : > { %v2322_v1 = vsel %vm2162_vm2, %v5664_v35, 256.0  ;;  %v2381_v47 = vmin.f32 %v2317_v33, %v2321_v53  ;;  %vm2167_vm6 = vmand %vm2039_vm11, %vm2103_vm3  ;;  %v1883_v9 = vpop.xlane.xlu0 %1882  ;;  %vm2043_vm15 = vcmp.ge.f32.partialorder %v4850_v55, %v2004_v25  ;;  %vm2044_vm0 = vcmp.ge.f32.partialorder %v4852_v28, %v2004_v25 }
 0x2c1   : > { %v2418_v44 = vmin.f32 %v2318_v42, %v2322_v1  ;;  %vm2168_vm4 = vmand %vm2040_vm13, %vm2104_vm1  ;;  %v2327_v18 = vsel %vm2167_vm6, %v5665_v56, 256.0  ;;  %vm5666_vm3 = vcmp.le.f32.partialorder %v4850_v55, %v1969_v2  ;;  %v2003_v43 = vmul.f32 %v4842_v5, %v1883_v9  ;;  %v1732_v3 = vpop.xlane.xlu1 %1731  ;;  %v5674_v1 = vld [vmem:[#allocation43_spill] sm:$0xff] }
 0x2c2   : > { %v2328_v38 = vsel %vm2168_vm4, %v5665_v56, 256.0  ;;  %v2384_v63 = vmin.f32 %v2382_v62, %v2327_v18  ;;  %vm2165_vm11 = vmand %vm2037_vm8, %vm5666_vm3  ;;  %vm5667_vm1 = vcmp.le.f32.partialorder %v4852_v28, %v1969_v2  ;;  %v1974_v22 = vmul.f32 %v4842_v5, %v1732_v3  ;;  %v5671_v2 = vld [vmem:[#allocation42_spill] sm:$0xff] }
 0x2c3   : > { %v2421_v8 = vmin.f32 %v2419_v15, %v2328_v38  ;;  %vm2166_vm13 = vmand %vm2038_vm7, %vm5667_vm1  ;;  %v2325_v41 = vsel %vm2165_vm11, %v5668_v10, 256.0  ;;  %vm2041_vm8 = vcmp.ge.f32.partialorder %v4850_v55, %v2003_v43  ;;  %vm2042_vm2 = vcmp.ge.f32.partialorder %v4852_v28, %v2003_v43 }
 0x2c4   : > { %v2326_v13 = vsel %vm2166_vm13, %v5668_v10, 256.0  ;;  %v2383_v57 = vmin.f32 %v2381_v47, %v2325_v41  ;;  %vm2171_vm12 = vmand %vm2043_vm15, %vm2107_vm9  ;;  %v1729_v20 = vpop.xlane.xlu0 %1728  ;;  %vm2111_vm6 = vcmp.le.f32.partialorder %v4850_v55, %v1974_v22  ;;  %vm2112_vm4 = vcmp.le.f32.partialorder %v4852_v28, %v1974_v22  ;;  %v5675_v41 = vld [vmem:[#allocation46_spill] sm:$0xff] }
 0x2c5   : > { %v2420_v48 = vmin.f32 %v2418_v44, %v2326_v13  ;;  %vm2172_vm7 = vmand %vm2044_vm0, %vm2108_vm5  ;;  %v2331_v60 = vsel %vm2171_vm12, %v5669_v49, 256.0  ;;  %v1973_v4 = vmul.f32 %v4842_v5, %v1729_v20  ;;  %v1892_v52 = vpop.xlane.xlu1 %1891 }
 0x2c6   : > { %v2332_v36 = vsel %vm2172_vm7, %v5669_v49, 256.0  ;;  %v2386_v40 = vmin.f32 %v2384_v63, %v2331_v60  ;;  %vm2169_vm9 = vmand %vm2041_vm8, %vm2105_vm14  ;;  %v2006_v27 = vmul.f32 %v4842_v5, %v1892_v52  ;;  %v5676_v49 = vld [vmem:[#allocation45_spill] sm:$0xff] }
 0x2c7   : > { %v2423_v45 = vmin.f32 %v2421_v8, %v2332_v36  ;;  %vm2170_vm15 = vmand %vm2042_vm2, %vm2106_vm10  ;;  %v2329_v61 = vsel %vm2169_vm9, %v5670_v37, 256.0  ;;  %vm2109_vm5 = vcmp.le.f32.partialorder %v4850_v55, %v1973_v4  ;;  %vm2110_vm0 = vcmp.le.f32.partialorder %v4852_v28, %v1973_v4 }
 0x2c8   : > { %v2330_v21 = vsel %vm2170_vm15, %v5670_v37, 256.0  ;;  %v2385_v17 = vmin.f32 %v2383_v57, %v2329_v61  ;;  %v1889_v23 = vpop.xlane.xlu0 %1888  ;;  %vm2047_vm14 = vcmp.ge.f32.partialorder %v4850_v55, %v2006_v27  ;;  %vm2048_vm3 = vcmp.ge.f32.partialorder %v4852_v28, %v2006_v27 }
 0x2c9   : > { %v2422_v24 = vmin.f32 %v2420_v48, %v2330_v21  ;;  %v2005_v16 = vmul.f32 %v4842_v5, %v1889_v23  ;;  %vm2175_vm10 = vmand %vm2047_vm14, %vm2111_vm6  ;;  %v1738_v50 = vpop.xlane.xlu1 %1737  ;;  %v5677_v23 = vld [vmem:[#allocation50_spill] sm:$0xff] }
 0x2ca   : > { %vm2176_vm11 = vmand %vm2048_vm3, %vm2112_vm4  ;;  %v2335_v0 = vsel %vm2175_vm10, %v5671_v2, 256.0  ;;  %v1976_v33 = vmul.f32 %v4842_v5, %v1738_v50 }
 0x2cb   : > { %vm2045_vm1 = vcmp.ge.f32.partialorder %v4850_v55, %v2005_v16  ;;  %vm2046_vm13 = vcmp.ge.f32.partialorder %v4852_v28, %v2005_v16  ;;  %v2336_v29 = vsel %vm2176_vm11, %v5671_v2, 256.0  ;;  %v2388_v32 = vmin.f32 %v2386_v40, %v2335_v0 }
 0x2cc   : > { %vm2173_vm12 = vmand %vm2045_vm1, %vm2109_vm5  ;;  %v1735_v51 = vpop.xlane.xlu0 %1734  ;;  %v2425_v19 = vmin.f32 %v2423_v45, %v2336_v29  ;;  %vm2115_vm2 = vcmp.le.f32.partialorder %v4850_v55, %v1976_v33  ;;  %vm2116_vm7 = vcmp.le.f32.partialorder %v4852_v28, %v1976_v33  ;;  %v5678_v33 = vld [vmem:[#allocation49_spill] sm:$0xff] }
 0x2cd   : > { %vm2174_vm8 = vmand %vm2046_vm13, %vm2110_vm0  ;;  %v2333_v39 = vsel %vm2173_vm12, %v5672_v31, 256.0  ;;  %v1975_v46 = vmul.f32 %v4842_v5, %v1735_v51  ;;  %v1898_v7 = vpop.xlane.xlu1 %1897 }
 0x2ce   : > { %v2334_v12 = vsel %vm2174_vm8, %v5672_v31, 256.0  ;;  %v2387_v11 = vmin.f32 %v2385_v17, %v2333_v39  ;;  %v2008_v26 = vmul.f32 %v4842_v5, %v1898_v7 }
 0x2cf   : > { %v2424_v34 = vmin.f32 %v2422_v24, %v2334_v12  ;;  %vm2113_vm6 = vcmp.le.f32.partialorder %v4850_v55, %v1975_v46  ;;  %vm2114_vm4 = vcmp.le.f32.partialorder %v4852_v28, %v1975_v46 }
 0x2d0   : > { %v1895_v42 = vpop.xlane.xlu0 %1894  ;;  %vm2051_vm9 = vcmp.ge.f32.partialorder %v4850_v55, %v2008_v26  ;;  %vm2052_vm15 = vcmp.ge.f32.partialorder %v4852_v28, %v2008_v26  ;;  %v5679_v26 = vld [vmem:[#allocation52_spill] sm:$0xff] }
 0x2d1   : > { %v2007_v6 = vmul.f32 %v4842_v5, %v1895_v42  ;;  %vm2179_vm5 = vmand %vm2051_vm9, %vm2115_vm2  ;;  %v1744_v62 = vpop.xlane.xlu1 %1743 }
 0x2d2   : > { %vm2180_vm0 = vmand %vm2052_vm15, %vm2116_vm7  ;;  %v2339_v14 = vsel %vm2179_vm5, %v5673_v59, 256.0  ;;  %v1978_v9 = vmul.f32 %v4842_v5, %v1744_v62 }
 0x2d3   : > { %vm2049_vm14 = vcmp.ge.f32.partialorder %v4850_v55, %v2007_v6  ;;  %vm2050_vm3 = vcmp.ge.f32.partialorder %v4852_v28, %v2007_v6  ;;  %v2340_v15 = vsel %vm2180_vm0, %v5673_v59, 256.0  ;;  %v2390_v35 = vmin.f32 %v2388_v32, %v2339_v14 }
 0x2d4   : > { %vm2177_vm10 = vmand %vm2049_vm14, %vm2113_vm6  ;;  %v1741_v53 = vpop.xlane.xlu0 %1740  ;;  %v2427_v25 = vmin.f32 %v2425_v19, %v2340_v15  ;;  %vm2119_vm1 = vcmp.le.f32.partialorder %v4850_v55, %v1978_v9  ;;  %vm2120_vm8 = vcmp.le.f32.partialorder %v4852_v28, %v1978_v9  ;;  %v5680_v15 = vld [vmem:[#allocation51_spill] sm:$0xff] }
 0x2d5   : > { %vm2178_vm11 = vmand %vm2050_vm3, %vm2114_vm4  ;;  %v2337_v47 = vsel %vm2177_vm10, %v5674_v1, 256.0  ;;  %v1904_v18 = vpop.xlane.xlu1 %1903  ;;  %v1977_v63 = vmul.f32 %v4842_v5, %v1741_v53 }
 0x2d6   : > { %v2338_v44 = vsel %vm2178_vm11, %v5674_v1, 256.0  ;;  %v2389_v56 = vmin.f32 %v2387_v11, %v2337_v47  ;;  %v2010_v43 = vmul.f32 %v4842_v5, %v1904_v18 }
 0x2d7   : > { %v2426_v38 = vmin.f32 %v2424_v34, %v2338_v44  ;;  %vm2117_vm7 = vcmp.le.f32.partialorder %v4850_v55, %v1977_v63  ;;  %vm2118_vm15 = vcmp.le.f32.partialorder %v4852_v28, %v1977_v63 }
 0x2d8   : > { %v1901_v3 = vpop.xlane.xlu0 %1900  ;;  %vm2055_vm13 = vcmp.ge.f32.partialorder %v4850_v55, %v2010_v43  ;;  %vm2056_vm12 = vcmp.ge.f32.partialorder %v4852_v28, %v2010_v43  ;;  %v5681_v43 = vld [vmem:[#allocation54_spill] sm:$0xff] }
 0x2d9   : > { %v2009_v8 = vmul.f32 %v4842_v5, %v1901_v3  ;;  %vm2183_vm2 = vmand %vm2055_vm13, %vm2119_vm1  ;;  %v1750_v10 = vpop.xlane.xlu1 %1749 }
 0x2da   : > { %vm2184_vm6 = vmand %vm2056_vm12, %vm2120_vm8  ;;  %v2343_v22 = vsel %vm2183_vm2, %v5675_v41, 256.0  ;;  %v1980_v36 = vmul.f32 %v4842_v5, %v1750_v10 }
 0x2db   : > { %vm2053_vm4 = vcmp.ge.f32.partialorder %v4850_v55, %v2009_v8  ;;  %vm2054_vm9 = vcmp.ge.f32.partialorder %v4852_v28, %v2009_v8  ;;  %v2344_v13 = vsel %vm2184_vm6, %v5675_v41, 256.0  ;;  %v2392_v57 = vmin.f32 %v2390_v35, %v2343_v22 }
 0x2dc   : > { %vm2181_vm5 = vmand %vm2053_vm4, %vm2117_vm7  ;;  %v1747_v20 = vpop.xlane.xlu0 %1746  ;;  %v2429_v48 = vmin.f32 %v2427_v25, %v2344_v13  ;;  %vm2123_vm14 = vcmp.le.f32.partialorder %v4850_v55, %v1980_v36  ;;  %vm2124_vm11 = vcmp.le.f32.partialorder %v4852_v28, %v1980_v36  ;;  %v5682_v13 = vld [vmem:[#allocation53_spill] sm:$0xff] }
 0x2dd   : > { %vm2182_vm0 = vmand %vm2054_vm9, %vm2118_vm15  ;;  %v2341_v60 = vsel %vm2181_vm5, %v5676_v49, 256.0  ;;  %v1910_v52 = vpop.xlane.xlu1 %1909  ;;  %v1979_v37 = vmul.f32 %v4842_v5, %v1747_v20 }
 0x2de   : > { %v2342_v40 = vsel %vm2182_vm0, %v5676_v49, 256.0  ;;  %v2391_v4 = vmin.f32 %v2389_v56, %v2341_v60  ;;  %v2012_v61 = vmul.f32 %v4842_v5, %v1910_v52 }
 0x2df   : > { %v2428_v45 = vmin.f32 %v2426_v38, %v2342_v40  ;;  %vm2121_vm13 = vcmp.le.f32.partialorder %v4850_v55, %v1979_v37  ;;  %vm2122_vm7 = vcmp.le.f32.partialorder %v4852_v28, %v1979_v37 }
 0x2e0   : > { %v1907_v27 = vpop.xlane.xlu0 %1906  ;;  %vm2059_vm3 = vcmp.ge.f32.partialorder %v4850_v55, %v2012_v61  ;;  %vm2060_vm10 = vcmp.ge.f32.partialorder %v4852_v28, %v2012_v61  ;;  %v5683_v61 = vld [vmem:[#allocation56_spill] sm:$0xff] }
 0x2e1   : > { %v2011_v21 = vmul.f32 %v4842_v5, %v1907_v27  ;;  %vm2187_vm1 = vmand %vm2059_vm3, %vm2123_vm14  ;;  %v1756_v17 = vpop.xlane.xlu1 %1755 }
 0x2e2   : > { %vm2188_vm12 = vmand %vm2060_vm10, %vm2124_vm11  ;;  %v2347_v24 = vsel %vm2187_vm1, %v5677_v23, 256.0  ;;  %v1982_v32 = vmul.f32 %v4842_v5, %v1756_v17 }
 0x2e3   : > { %vm2057_vm8 = vcmp.ge.f32.partialorder %v4850_v55, %v2011_v21  ;;  %vm2058_vm2 = vcmp.ge.f32.partialorder %v4852_v28, %v2011_v21  ;;  %v2348_v16 = vsel %vm2188_vm12, %v5677_v23, 256.0  ;;  %v2394_v50 = vmin.f32 %v2392_v57, %v2347_v24 }
 0x2e4   : > { %vm2185_vm6 = vmand %vm2057_vm8, %vm2121_vm13  ;;  %v1753_v2 = vpop.xlane.xlu0 %1752  ;;  %v2431_v0 = vmin.f32 %v2429_v48, %v2348_v16  ;;  %vm2127_vm9 = vcmp.le.f32.partialorder %v4850_v55, %v1982_v32  ;;  %vm2128_vm0 = vcmp.le.f32.partialorder %v4852_v28, %v1982_v32  ;;  %v5684_v16 = vld [vmem:[#allocation55_spill] sm:$0xff] }
 0x2e5   : > { %vm2186_vm4 = vmand %vm2058_vm2, %vm2122_vm7  ;;  %v2345_v29 = vsel %vm2185_vm6, %v5678_v33, 256.0  ;;  %v1916_v31 = vpop.xlane.xlu1 %1915  ;;  %v1981_v12 = vmul.f32 %v4842_v5, %v1753_v2 }
 0x2e6   : > { %v2346_v51 = vsel %vm2186_vm4, %v5678_v33, 256.0  ;;  %v2393_v19 = vmin.f32 %v2391_v4, %v2345_v29  ;;  %v2014_v11 = vmul.f32 %v4842_v5, %v1916_v31 }
 0x2e7   : > { %v2430_v39 = vmin.f32 %v2428_v45, %v2346_v51  ;;  %vm2125_vm3 = vcmp.le.f32.partialorder %v4850_v55, %v1981_v12  ;;  %vm2126_vm13 = vcmp.le.f32.partialorder %v4852_v28, %v1981_v12 }
 0x2e8   : > { %v1913_v46 = vpop.xlane.xlu0 %1912  ;;  %vm2063_vm15 = vcmp.ge.f32.partialorder %v4850_v55, %v2014_v11  ;;  %vm2064_vm5 = vcmp.ge.f32.partialorder %v4852_v28, %v2014_v11  ;;  %v5685_v11 = vld [vmem:[#allocation58_spill] sm:$0xff] }
 0x2e9   : > { %v2013_v7 = vmul.f32 %v4842_v5, %v1913_v46  ;;  %vm2191_vm14 = vmand %vm2063_vm15, %vm2127_vm9  ;;  %v1762_v34 = vpop.xlane.xlu1 %1761 }
 0x2ea   : > { %vm2192_vm10 = vmand %vm2064_vm5, %vm2128_vm0  ;;  %v2351_v42 = vsel %vm2191_vm14, %v5679_v26, 256.0  ;;  %v1984_v53 = vmul.f32 %v4842_v5, %v1762_v34 }
 0x2eb   : > { %vm2061_vm11 = vcmp.ge.f32.partialorder %v4850_v55, %v2013_v7  ;;  %vm2062_vm1 = vcmp.ge.f32.partialorder %v4852_v28, %v2013_v7  ;;  %v2352_v6 = vsel %vm2192_vm10, %v5679_v26, 256.0  ;;  %v2396_v62 = vmin.f32 %v2394_v50, %v2351_v42 }
 0x2ec   : > { %vm2189_vm12 = vmand %vm2061_vm11, %vm2125_vm3  ;;  %v1759_v59 = vpop.xlane.xlu0 %1758  ;;  %v2433_v14 = vmin.f32 %v2431_v0, %v2352_v6  ;;  %vm2131_vm2 = vcmp.le.f32.partialorder %v4850_v55, %v1984_v53  ;;  %vm2132_vm4 = vcmp.le.f32.partialorder %v4852_v28, %v1984_v53  ;;  %v5686_v6 = vld [vmem:[#allocation57_spill] sm:$0xff] }
 0x2ed   : > { %vm2190_vm8 = vmand %vm2062_vm1, %vm2126_vm13  ;;  %v2349_v35 = vsel %vm2189_vm12, %v5680_v15, 256.0  ;;  %v1922_v47 = vpop.xlane.xlu1 %1921  ;;  %v1983_v44 = vmul.f32 %v4842_v5, %v1759_v59 }
 0x2ee   : > { %v2350_v25 = vsel %vm2190_vm8, %v5680_v15, 256.0  ;;  %v2395_v1 = vmin.f32 %v2393_v19, %v2349_v35  ;;  %v2016_v56 = vmul.f32 %v4842_v5, %v1922_v47 }
 0x2ef   : > { %v2432_v9 = vmin.f32 %v2430_v39, %v2350_v25  ;;  %vm2129_vm15 = vcmp.le.f32.partialorder %v4850_v55, %v1983_v44  ;;  %vm2130_vm3 = vcmp.le.f32.partialorder %v4852_v28, %v1983_v44 }
 0x2f0   : > { %v1919_v18 = vpop.xlane.xlu0 %1918  ;;  %vm2067_vm7 = vcmp.ge.f32.partialorder %v4850_v55, %v2016_v56  ;;  %vm2068_vm6 = vcmp.ge.f32.partialorder %v4852_v28, %v2016_v56  ;;  %v5687_v56 = vld [vmem:[#allocation60_spill] sm:$0xff] }
 0x2f1   : > { %v2015_v38 = vmul.f32 %v4842_v5, %v1919_v18  ;;  %vm2195_vm9 = vmand %vm2067_vm7, %vm2131_vm2  ;;  %v1768_v63 = vpop.xlane.xlu1 %1767 }
 0x2f2   : > { %vm2196_vm5 = vmand %vm2068_vm6, %vm2132_vm4  ;;  %v2355_v3 = vsel %vm2195_vm9, %v5681_v43, 256.0  ;;  %v1986_v20 = vmul.f32 %v4842_v5, %v1768_v63 }
 0x2f3   : > { %vm2065_vm0 = vcmp.ge.f32.partialorder %v4850_v55, %v2015_v38  ;;  %vm2066_vm14 = vcmp.ge.f32.partialorder %v4852_v28, %v2015_v38  ;;  %v2356_v8 = vsel %vm2196_vm5, %v5681_v43, 256.0  ;;  %v2398_v10 = vmin.f32 %v2396_v62, %v2355_v3 }
 0x2f4   : > { %vm2193_vm10 = vmand %vm2065_vm0, %vm2129_vm15  ;;  %v1765_v41 = vpop.xlane.xlu0 %1764  ;;  %v2435_v22 = vmin.f32 %v2433_v14, %v2356_v8  ;;  %vm2135_vm1 = vcmp.le.f32.partialorder %v4850_v55, %v1986_v20  ;;  %vm2136_vm8 = vcmp.le.f32.partialorder %v4852_v28, %v1986_v20  ;;  %v5688_v8 = vld [vmem:[#allocation59_spill] sm:$0xff] }
 0x2f5   : > { %vm2194_vm11 = vmand %vm2066_vm14, %vm2130_vm3  ;;  %v2353_v57 = vsel %vm2193_vm10, %v5682_v13, 256.0  ;;  %v1928_v60 = vpop.xlane.xlu1 %1927  ;;  %v1985_v40 = vmul.f32 %v4842_v5, %v1765_v41 }
 0x2f6   : > { %v2354_v48 = vsel %vm2194_vm11, %v5682_v13, 256.0  ;;  %v2397_v49 = vmin.f32 %v2395_v1, %v2353_v57  ;;  %v2018_v4 = vmul.f32 %v4842_v5, %v1928_v60 }
 0x2f7   : > { %v2434_v36 = vmin.f32 %v2432_v9, %v2354_v48  ;;  %vm2133_vm7 = vcmp.le.f32.partialorder %v4850_v55, %v1985_v40  ;;  %vm2134_vm15 = vcmp.le.f32.partialorder %v4852_v28, %v1985_v40 }
 0x2f8   : > { %v1925_v52 = vpop.xlane.xlu0 %1924  ;;  %vm2071_vm13 = vcmp.ge.f32.partialorder %v4850_v55, %v2018_v4  ;;  %vm2072_vm12 = vcmp.ge.f32.partialorder %v4852_v28, %v2018_v4  ;;  %v5689_v4 = vld [vmem:[#allocation62_spill] sm:$0xff] }
 0x2f9   : > { %v2017_v45 = vmul.f32 %v4842_v5, %v1925_v52  ;;  %vm2199_vm2 = vmand %vm2071_vm13, %vm2135_vm1  ;;  %v1774_v37 = vpop.xlane.xlu1 %1773 }
 0x2fa   : > { %vm2200_vm6 = vmand %vm2072_vm12, %vm2136_vm8  ;;  %v2359_v27 = vsel %vm2199_vm2, %v5683_v61, 256.0  ;;  %v1988_v2 = vmul.f32 %v4842_v5, %v1774_v37 }
 0x2fb   : > { %vm2069_vm4 = vcmp.ge.f32.partialorder %v4850_v55, %v2017_v45  ;;  %vm2070_vm9 = vcmp.ge.f32.partialorder %v4852_v28, %v2017_v45  ;;  %v2360_v21 = vsel %vm2200_vm6, %v5683_v61, 256.0  ;;  %v2400_v17 = vmin.f32 %v2398_v10, %v2359_v27 }
 0x2fc   : > { %vm2197_vm5 = vmand %vm2069_vm4, %vm2133_vm7  ;;  %v1771_v23 = vpop.xlane.xlu0 %1770  ;;  %v2437_v24 = vmin.f32 %v2435_v22, %v2360_v21  ;;  %vm2139_vm14 = vcmp.le.f32.partialorder %v4850_v55, %v1988_v2  ;;  %vm2140_vm11 = vcmp.le.f32.partialorder %v4852_v28, %v1988_v2  ;;  %v5690_v21 = vld [vmem:[#allocation61_spill] sm:$0xff] }
 0x2fd   : > { %vm2198_vm0 = vmand %vm2070_vm9, %vm2134_vm15  ;;  %v2357_v50 = vsel %vm2197_vm5, %v5684_v16, 256.0  ;;  %v1934_v29 = vpop.xlane.xlu1 %1933  ;;  %v1987_v51 = vmul.f32 %v4842_v5, %v1771_v23 }
 0x2fe   : > { %v2358_v0 = vsel %vm2198_vm0, %v5684_v16, 256.0  ;;  %v2399_v33 = vmin.f32 %v2397_v49, %v2357_v50  ;;  %v2020_v19 = vmul.f32 %v4842_v5, %v1934_v29 }
 0x2ff   : > { %v2436_v32 = vmin.f32 %v2434_v36, %v2358_v0  ;;  %vm2137_vm13 = vcmp.le.f32.partialorder %v4850_v55, %v1987_v51  ;;  %vm2138_vm7 = vcmp.le.f32.partialorder %v4852_v28, %v1987_v51 }
 0x300   : > { %v1931_v31 = vpop.xlane.xlu0 %1930  ;;  %vm2075_vm3 = vcmp.ge.f32.partialorder %v4850_v55, %v2020_v19  ;;  %vm2076_vm10 = vcmp.ge.f32.partialorder %v4852_v28, %v2020_v19  ;;  %v5691_v19 = vld [vmem:[#allocation65_spill] sm:$0xff] }
 0x301   : > { %v2019_v39 = vmul.f32 %v4842_v5, %v1931_v31  ;;  %vm2203_vm1 = vmand %vm2075_vm3, %vm2139_vm14  ;;  %v1780_v12 = vpop.xlane.xlu1 %1779 }
 0x302   : > { %vm2204_vm12 = vmand %vm2076_vm10, %vm2140_vm11  ;;  %v2363_v46 = vsel %vm2203_vm1, %v5685_v11, 256.0  ;;  %v1990_v59 = vmul.f32 %v4842_v5, %v1780_v12 }
 0x303   : > { %vm2073_vm8 = vcmp.ge.f32.partialorder %v4850_v55, %v2019_v39  ;;  %vm2074_vm2 = vcmp.ge.f32.partialorder %v4852_v28, %v2019_v39  ;;  %v2364_v7 = vsel %vm2204_vm12, %v5685_v11, 256.0  ;;  %v2402_v34 = vmin.f32 %v2400_v17, %v2363_v46 }
 0x304   : > { %vm2201_vm6 = vmand %vm2073_vm8, %vm2137_vm13  ;;  %v1777_v26 = vpop.xlane.xlu0 %1776  ;;  %v2439_v42 = vmin.f32 %v2437_v24, %v2364_v7  ;;  %vm2143_vm9 = vcmp.le.f32.partialorder %v4850_v55, %v1990_v59  ;;  %vm2144_vm0 = vcmp.le.f32.partialorder %v4852_v28, %v1990_v59  ;;  %v5692_v7 = vld [vmem:[#allocation64_spill] sm:$0xff] }
 0x305   : > { %vm2202_vm4 = vmand %vm2074_vm2, %vm2138_vm7  ;;  %v2361_v62 = vsel %vm2201_vm6, %v5686_v6, 256.0  ;;  %v1940_v35 = vpop.xlane.xlu1 %1939  ;;  %v1989_v25 = vmul.f32 %v4842_v5, %v1777_v26 }
 0x306   : > { %v2362_v14 = vsel %vm2202_vm4, %v5686_v6, 256.0  ;;  %v2401_v15 = vmin.f32 %v2399_v33, %v2361_v62  ;;  %v2022_v1 = vmul.f32 %v4842_v5, %v1940_v35 }
 0x307   : > { %v2438_v53 = vmin.f32 %v2436_v32, %v2362_v14  ;;  %vm2141_vm3 = vcmp.le.f32.partialorder %v4850_v55, %v1989_v25  ;;  %vm2142_vm13 = vcmp.le.f32.partialorder %v4852_v28, %v1989_v25  ;;  %v5693_v25 = vld [vmem:[#allocation67_spill] sm:$0xff] }
 0x308   : > { %v1937_v47 = vpop.xlane.xlu0 %1936  ;;  %vm2079_vm15 = vcmp.ge.f32.partialorder %v4850_v55, %v2022_v1  ;;  %vm2080_vm5 = vcmp.ge.f32.partialorder %v4852_v28, %v2022_v1 }
 0x309   : > { %v2021_v9 = vmul.f32 %v4842_v5, %v1937_v47  ;;  %vm2207_vm14 = vmand %vm2079_vm15, %vm2143_vm9  ;;  %v1786_v44 = vpop.xlane.xlu1 %1785 }
 0x30a   : > { %vm2208_vm10 = vmand %vm2080_vm5, %vm2144_vm0  ;;  %v2367_v18 = vsel %vm2207_vm14, %v5687_v56, 256.0  ;;  %v1992_v41 = vmul.f32 %v4842_v5, %v1786_v44 }
 0x30b   : > { %vm2077_vm11 = vcmp.ge.f32.partialorder %v4850_v55, %v2021_v9  ;;  %vm2078_vm1 = vcmp.ge.f32.partialorder %v4852_v28, %v2021_v9  ;;  %v2368_v38 = vsel %vm2208_vm10, %v5687_v56, 256.0  ;;  %v2404_v63 = vmin.f32 %v2402_v34, %v2367_v18 }
 0x30c   : > { %vm2205_vm12 = vmand %vm2077_vm11, %vm2141_vm3  ;;  %v1783_v43 = vpop.xlane.xlu0 %1782  ;;  %v2441_v3 = vmin.f32 %v2439_v42, %v2368_v38  ;;  %vm2147_vm2 = vcmp.le.f32.partialorder %v4850_v55, %v1992_v41  ;;  %vm2148_vm4 = vcmp.le.f32.partialorder %v4852_v28, %v1992_v41 }
 0x30d   : > { %vm2206_vm8 = vmand %vm2078_vm1, %vm2142_vm13  ;;  %v2365_v10 = vsel %vm2205_vm12, %v5688_v8, 256.0  ;;  %v1946_v57 = vpop.xlane.xlu1 %1945  ;;  %v1991_v48 = vmul.f32 %v4842_v5, %v1783_v43 }
 0x30e   : > { %v2366_v22 = vsel %vm2206_vm8, %v5688_v8, 256.0  ;;  %v2403_v13 = vmin.f32 %v2401_v15, %v2365_v10  ;;  %v2024_v49 = vmul.f32 %v4842_v5, %v1946_v57  ;;  %v2455_v57 = vcvt.s32.f32 %v4142_v54 }
 0x30f   : > { %v2440_v20 = vmin.f32 %v2438_v53, %v2366_v22  ;;  %vm2145_vm15 = vcmp.le.f32.partialorder %v4850_v55, %v1991_v48  ;;  %vm2146_vm3 = vcmp.le.f32.partialorder %v4852_v28, %v1991_v48 }
 0x310   : > { %v1943_v60 = vpop.xlane.xlu0 %1942  ;;  %vm2083_vm7 = vcmp.ge.f32.partialorder %v4850_v55, %v2024_v49  ;;  %vm2084_vm6 = vcmp.ge.f32.partialorder %v4852_v28, %v2024_v49 }
 0x311   : > { %v2023_v36 = vmul.f32 %v4842_v5, %v1943_v60  ;;  %vm2211_vm9 = vmand %vm2083_vm7, %vm2147_vm2  ;;  %v1792_v40 = vpop.xlane.xlu1 %1791  ;;  %v2456_v60 = vcvt.s32.f32 %v4262_v58 }
 0x312   : > { %vm2212_vm5 = vmand %vm2084_vm6, %vm2148_vm4  ;;  %v2371_v52 = vsel %vm2211_vm9, %v5689_v4, 256.0  ;;  %v1994_v23 = vmul.f32 %v4842_v5, %v1792_v40 }
 0x313   : > { %vm2081_vm0 = vcmp.ge.f32.partialorder %v4850_v55, %v2023_v36  ;;  %vm2082_vm14 = vcmp.ge.f32.partialorder %v4852_v28, %v2023_v36  ;;  %v2372_v45 = vsel %vm2212_vm5, %v5689_v4, 256.0  ;;  %v2406_v37 = vmin.f32 %v2404_v63, %v2371_v52 }
 0x314   : > { %vm2209_vm10 = vmand %vm2081_vm0, %vm2145_vm15  ;;  %v1789_v61 = vpop.xlane.xlu0 %1788  ;;  %v2443_v27 = vmin.f32 %v2441_v3, %v2372_v45  ;;  %vm2151_vm1 = vcmp.le.f32.partialorder %v4850_v55, %v1994_v23  ;;  %vm2152_vm8 = vcmp.le.f32.partialorder %v4852_v28, %v1994_v23 }
 0x315   : > { %vm2210_vm11 = vmand %vm2082_vm14, %vm2146_vm3  ;;  %v2369_v17 = vsel %vm2209_vm10, %v5690_v21, 256.0  ;;  %v1952_v50 = vpop.xlane.xlu1 %1951  ;;  %v1993_v0 = vmul.f32 %v4842_v5, %v1789_v61 }
 0x316   : > { %v2370_v24 = vsel %vm2210_vm11, %v5690_v21, 256.0  ;;  %v2405_v16 = vmin.f32 %v2403_v13, %v2369_v17  ;;  %v2026_v33 = vmul.f32 %v4842_v5, %v1952_v50 }
 0x317   : > { %v2442_v2 = vmin.f32 %v2440_v20, %v2370_v24  ;;  %vm2149_vm7 = vcmp.le.f32.partialorder %v4850_v55, %v1993_v0  ;;  %vm2150_vm15 = vcmp.le.f32.partialorder %v4852_v28, %v1993_v0  ;;  %v3356_v20 = vmov 1966171168  }
 0x318   : > { %v1949_v29 = vpop.xlane.xlu0 %1948  ;;  %vm2087_vm13 = vcmp.ge.f32.partialorder %v4850_v55, %v2026_v33  ;;  %vm2088_vm12 = vcmp.ge.f32.partialorder %v4852_v28, %v2026_v33  ;;  %v2473_v48 = vunpack.c.l.s4 %v3356_v20 }
 0x319   : > { %v2025_v32 = vmul.f32 %v4842_v5, %v1949_v29  ;;  %vm2215_vm2 = vmand %vm2087_vm13, %vm2151_vm1  ;;  %v1798_v51 = vpop.xlane.xlu1 %1797 }
 0x31a   : > { %vm2216_vm6 = vmand %vm2088_vm12, %vm2152_vm8  ;;  %v2375_v31 = vsel %vm2215_vm2, %v5691_v19, 256.0  ;;  %v1996_v26 = vmul.f32 %v4842_v5, %v1798_v51  ;;  %v2474_v52 = vunpack.c.0.s8 %v2473_v48 }
 0x31b   : > { %vm2085_vm4 = vcmp.ge.f32.partialorder %v4850_v55, %v2025_v32  ;;  %vm2086_vm9 = vcmp.ge.f32.partialorder %v4852_v28, %v2025_v32  ;;  %v2376_v39 = vsel %vm2216_vm6, %v5691_v19, 256.0  ;;  %v2408_v12 = vmin.f32 %v2406_v37, %v2375_v31 }
 0x31c   : > { %vm2213_vm5 = vmand %vm2085_vm4, %vm2149_vm7  ;;  %v1795_v11 = vpop.xlane.xlu0 %1794  ;;  %v2445_v46 = vmin.f32 %v2443_v27, %v2376_v39  ;;  %vm2155_vm14 = vcmp.le.f32.partialorder %v4850_v55, %v1996_v26  ;;  %vm2156_vm11 = vcmp.le.f32.partialorder %v4852_v28, %v1996_v26  ;;  %v2477_v54 = vsub.s32 %v2474_v52, %v5650_v30 }
 0x31d   : > { %vm2214_vm0 = vmand %vm2086_vm9, %vm2150_vm15  ;;  %v2373_v34 = vsel %vm2213_vm5, %v5692_v7, 256.0  ;;  %v1958_v62 = vpop.xlane.xlu1 %1957  ;;  %v1995_v14 = vmul.f32 %v4842_v5, %v1795_v11  ;;  %vm2461_vm9 = vcmp.eq.f32.partialorder %v2455_v57, 0.0  ;;  %vm2462_vm15 = vcmp.eq.f32.partialorder %v2456_v60, 0.0 }
 0x31e   : > { %v2374_v42 = vsel %vm2214_vm0, %v5692_v7, 256.0  ;;  %v2407_v6 = vmin.f32 %v2405_v16, %v2373_v34  ;;  %v2028_v15 = vmul.f32 %v4842_v5, %v1958_v62  ;;  %vm2465_vm5 = vcmp.eq.f32.partialorder %v2455_v57, 255.0 }
 0x31f   : > { %v2444_v59 = vmin.f32 %v2442_v2, %v2374_v42  ;;  %vm2153_vm13 = vcmp.le.f32.partialorder %v4850_v55, %v1995_v14  ;;  %vm2154_vm7 = vcmp.le.f32.partialorder %v4852_v28, %v1995_v14  ;;  %v5695_v16 = vlaneseq }
 0x320   : > { %v1955_v35 = vpop.xlane.xlu0 %1954  ;;  %vm2091_vm3 = vcmp.ge.f32.partialorder %v4850_v55, %v2028_v15  ;;  %vm2092_vm10 = vcmp.ge.f32.partialorder %v4852_v28, %v2028_v15 }
 0x321   : > { %v2027_v53 = vmul.f32 %v4842_v5, %v1955_v35  ;;  %vm2219_vm1 = vmand %vm2091_vm3, %vm2155_vm14  ;;  %v5694_v5 = vld [vmem:[#allocation66_spill] sm:$0xff]  ;;  %vm2466_vm14 = vcmp.eq.f32.partialorder %v2456_v60, 255.0 }
 0x322   : > { %vm2220_vm12 = vmand %vm2092_vm10, %vm2156_vm11  ;;  %v2379_v1 = vsel %vm2219_vm1, %v5693_v25, 256.0  ;;  %vm2489_vm10 = vcmp.lt.s32.totalorder %v5695_v16, 256 }
 0x323   : > { %vm2089_vm8 = vcmp.ge.f32.partialorder %v4850_v55, %v2027_v53  ;;  %vm2090_vm2 = vcmp.ge.f32.partialorder %v4852_v28, %v2027_v53  ;;  %v2380_v47 = vsel %vm2220_vm12, %v5693_v25, 256.0  ;;  %v2410_v9 = vmin.f32 %v2408_v12, %v2379_v1 }
 0x324   : > { %vm2217_vm6 = vmand %vm2089_vm8, %vm2153_vm13  ;;  %v2447_v44 = vmin.f32 %v2445_v46, %v2380_v47 }
 0x325   : > { %vm2218_vm4 = vmand %vm2090_vm2, %vm2154_vm7  ;;  %v2377_v56 = vsel %vm2217_vm6, %v5694_v5, 256.0 }
 0x326   : > { %v2378_v18 = vsel %vm2218_vm4, %v5694_v5, 256.0  ;;  %v2409_v38 = vmin.f32 %v2407_v6, %v2377_v56 }
 0x327   : > { %v2446_v63 = vmin.f32 %v2444_v59, %v2378_v18 }
 0x328   : > { %v2411_v43 = vmin.f32 %v2409_v38, %v2410_v9 }
 0x329   : > { %v2448_v3 = vmin.f32 %v2446_v63, %v2447_v44 }
 0x32a   : > { %v2412_v8 = vrot.slane %v2411_v43, 4 }
 0x32b   : > { %v2449_v55 = vrot.slane %v2448_v3, 4 }
 0x32c   : > { %v2413_v10 = vmin.f32 %v2411_v43, %v2412_v8 }
 0x32d   : > { %v2450_v41 = vmin.f32 %v2448_v3, %v2449_v55 }
 0x32e   : > { %v2414_v22 = vrot.slane %v2413_v10, 2 }
 0x32f   : > { %v2451_v28 = vrot.slane %v2450_v41, 2 }
 0x330   : > { %v2415_v13 = vmin.f32 %v2413_v10, %v2414_v22 }
 0x331   : > { %v2452_v49 = vmin.f32 %v2450_v41, %v2451_v28 }
 0x332   : > { %v2416_v36 = vrot.slane %v2415_v13, 1 }
 0x333   : > { %v2453_v40 = vrot.slane %v2452_v49, 1 }
 0x334   : > { %v2417_v4 = vmin.f32 %v2415_v13, %v2416_v36 }
 0x335   : > { %v2454_v45 = vmin.f32 %v2452_v49, %v2453_v40 }
 0x336   : > { %vm2457_vm0 = vcmp.lt.f32.partialorder %v2417_v4, 256.0 }
 0x337   : > { %vm2458_vm3 = vcmp.lt.f32.partialorder %v2454_v45, 256.0  ;;  %v2459_v37 = vsel %vm2457_vm0, %v2417_v4, %v2455_v57 }
 0x338   : > { %v2460_v61 = vsel %vm2458_vm3, %v2454_v45, %v2456_v60  ;;  %v2463_v27 = vsel %vm2461_vm9, 0.0, %v2459_v37 }
 0x339   : > { %v2464_v21 = vsel %vm2462_vm15, 0.0, %v2460_v61  ;;  %v2467_v17 = vsel %vm2465_vm5, 255.0, %v2463_v27 }
 0x33a   : > { %v2468_v23 = vsel %vm2466_vm14, 255.0, %v2464_v21 }
 0x33b   : > { %v2471_v58 = vcombine.low %v2467_v17, %v2468_v23 }
 0x33d   : > { %v2478_v24 = vrot.slane %v2471_v58, %v2477_v54 }
 0x33f   : > { %v2485_v50 = vrot.slane %v2478_v24, %v2477_v54 }
 0x341   : > { %2491 = vst.msk [vmem:[#allocation4] sm:$0x3] %vm2489_vm10, %v2485_v50 }
 0x342 PF: > { %p2911_p8 = scmp.ne.s32.totalorder %s3327_s22, 1 }
 0x343   : > { %v5696_v2 = vld [vmem:[#allocation51_spill] sm:$0xff] (!%p2911_p8)  ;;  %v5699_v33 = vld [vmem:[#allocation52_spill] sm:$0xff] (!%p2911_p8)  ;;  %v5701_v29 = vld [vmem:[#allocation21_spill] sm:$0xff] (!%p2911_p8)  ;;  %v3357_v51 = vmov (!%p2911_p8), 1.0|1.0  }
 0x344   : > { %2495 = sbr.rel (%p2911_p8) target bundleno = 1300 (0x514), region = 60  ;;  %v5697_v0 = vld [vmem:[#allocation63_spill] sm:$0xff] (!%p2911_p8)  ;;  %v2504_v32 = vsub.s32 (!%p2911_p8), 1, %v5701_v29  ;;  %v5702_v19 = vld [vmem:[#allocation33_spill] sm:$0xff] (!%p2911_p8)  ;;  %v5704_v31 = vld [vmem:[#allocation34_spill] sm:$0xff] (!%p2911_p8) }
 0x345   : > { %vm5698_vm11 = vcmp.eq.f32.partialorder (!%p2911_p8), %v5696_v2, %v5697_v0  ;;  %vm5700_vm1 = vcmp.eq.f32.partialorder (!%p2911_p8), %v5699_v33, %v5697_v0  ;;  %vm5703_vm12 = vcmp.eq.f32.partialorder (!%p2911_p8), %v5702_v19, %v5697_v0  ;;  %vm5705_vm8 = vcmp.eq.f32.partialorder (!%p2911_p8), %v5704_v31, %v5697_v0  ;;  %v5706_v39 = vld [vmem:[#allocation53_spill] sm:$0xff] (!%p2911_p8)  ;;  %v5708_v12 = vld [vmem:[#allocation54_spill] sm:$0xff] (!%p2911_p8)  ;;  %v5710_v46 = vld [vmem:[#allocation35_spill] sm:$0xff] (!%p2911_p8) }
 0x346   : > { %vm2928_vm13 = vmpackc.low (!%p2911_p8), %vm5700_vm1, %vm5698_vm11  ;;  %vm5707_vm7 = vcmp.eq.f32.partialorder (!%p2911_p8), %v5706_v39, %v5697_v0  ;;  %vm5709_vm6 = vcmp.eq.f32.partialorder (!%p2911_p8), %v5708_v12, %v5697_v0  ;;  %vm5711_vm9 = vcmp.eq.f32.partialorder (!%p2911_p8), %v5710_v46, %v5697_v0  ;;  %v5712_v7 = vld [vmem:[#allocation36_spill] sm:$0xff] (!%p2911_p8)  ;;  %v5714_v34 = vld [vmem:[#allocation55_spill] sm:$0xff] (!%p2911_p8) }
 0x347   : > { %2983 = vmatprep.subr.msk.bf16.mxu0 (!%p2911_p8), %vm2928_vm13, %v3357_v51  ;;  %vm2912_vm2 = vmpackc.low (!%p2911_p8), %vm5705_vm8, %vm5703_vm12  ;;  %vm5713_vm15 = vcmp.eq.f32.partialorder (!%p2911_p8), %v5712_v7, %v5697_v0  ;;  %vm5715_vm0 = vcmp.eq.f32.partialorder (!%p2911_p8), %v5714_v34, %v5697_v0  ;;  %v5716_v26 = vld [vmem:[#allocation56_spill] sm:$0xff] (!%p2911_p8)  ;;  %v5718_v6 = vld [vmem:[#allocation37_spill] sm:$0xff] (!%p2911_p8) }
 0x348   : > { %v2496_v30 = vld [vmem:[#allocation4] sm:$0x3] (!%p2911_p8)  ;;  %2984 = vmatpush3.bf16.msk.msra.mxu0 (!%p2911_p8), %vm2912_vm2, %v3357_v51  ;;  %vm2930_vm4 = vmpackc.low (!%p2911_p8), %vm5709_vm6, %vm5707_vm7  ;;  %vm5717_vm14 = vcmp.eq.f32.partialorder (!%p2911_p8), %v5716_v26, %v5697_v0  ;;  %vm5719_vm10 = vcmp.eq.f32.partialorder (!%p2911_p8), %v5718_v6, %v5697_v0  ;;  %v5720_v62 = vld [vmem:[#allocation38_spill] sm:$0xff] (!%p2911_p8) }
 0x349   : > { %v2505_v11 = vrot.slane (!%p2911_p8), %v2496_v30, %v2504_v32  ;;  %2985 = vmatprep.subr.msk.bf16.mxu0 (!%p2911_p8), %vm2930_vm4, %v3357_v51  ;;  %vm2914_vm5 = vmpackc.low (!%p2911_p8), %vm5713_vm15, %vm5711_vm9  ;;  %vm5721_vm11 = vcmp.eq.f32.partialorder (!%p2911_p8), %v5720_v62, %v5697_v0  ;;  %v5722_v59 = vld [vmem:[#allocation57_spill] sm:$0xff] (!%p2911_p8)  ;;  %v5724_v14 = vld [vmem:[#allocation58_spill] sm:$0xff] (!%p2911_p8) }
 0x34a   : > { %vm2932_vm3 = vmpackc.low (!%p2911_p8), %vm5717_vm14, %vm5715_vm0  ;;  %vm5723_vm13 = vcmp.eq.f32.partialorder (!%p2911_p8), %v5722_v59, %v5697_v0  ;;  %vm5725_vm12 = vcmp.eq.f32.partialorder (!%p2911_p8), %v5724_v14, %v5697_v0  ;;  %v5726_v15 = vld [vmem:[#allocation39_spill] sm:$0xff] (!%p2911_p8)  ;;  %v5728_v35 = vld [vmem:[#allocation40_spill] sm:$0xff] (!%p2911_p8) }
 0x34b   : > { %v2509_v42 = vpack.c.bf16 %v2505_v11, %v2505_v11  ;;  %vm2916_vm1 = vmpackc.low %vm5721_vm11, %vm5719_vm10  ;;  %vm5727_vm2 = vcmp.eq.f32.partialorder %v5726_v15, %v5697_v0  ;;  %vm5729_vm7 = vcmp.eq.f32.partialorder %v5728_v35, %v5697_v0  ;;  %v5730_v53 = vld [vmem:[#allocation59_spill] sm:$0xff]  ;;  %v5732_v25 = vld [vmem:[#allocation60_spill] sm:$0xff] }
 0x34c   : > { %2986 = vmatpush3.bf16.msk.msra.mxu0 %vm2914_vm5, %v3357_v51  ;;  %vm2934_vm8 = vmpackc.low %vm5725_vm12, %vm5723_vm13  ;;  %vm5731_vm4 = vcmp.eq.f32.partialorder %v5730_v53, %v5697_v0  ;;  %vm5733_vm9 = vcmp.eq.f32.partialorder %v5732_v25, %v5697_v0  ;;  %v5734_v1 = vld [vmem:[#allocation41_spill] sm:$0xff]  ;;  %v5736_v47 = vld [vmem:[#allocation42_spill] sm:$0xff] }
 0x34d   : > { %2542 = vmatprep.mubr.bf16.mxu0 %v2509_v42  ;;  %2987 = vmatprep.subr.msk.bf16.mxu0 %vm2932_vm3, %v3357_v51  ;;  %vm2918_vm6 = vmpackc.low %vm5729_vm7, %vm5727_vm2  ;;  %vm5735_vm5 = vcmp.eq.f32.partialorder %v5734_v1, %v5697_v0  ;;  %vm5737_vm0 = vcmp.eq.f32.partialorder %v5736_v47, %v5697_v0  ;;  %v5738_v9 = vld [vmem:[#allocation61_spill] sm:$0xff]  ;;  %v5740_v44 = vld [vmem:[#allocation62_spill] sm:$0xff] }
 0x34e   : > { %vm2936_vm15 = vmpackc.low %vm5733_vm9, %vm5731_vm4  ;;  %vm5739_vm3 = vcmp.eq.f32.partialorder %v5738_v9, %v5697_v0  ;;  %vm5741_vm10 = vcmp.eq.f32.partialorder %v5740_v44, %v5697_v0  ;;  %v5742_v5 = vld [vmem:[#allocation43_spill] sm:$0xff]  ;;  %v5744_v56 = vld [vmem:[#allocation44_spill] sm:$0xff] }
 0x34f   : > { %vm2920_vm14 = vmpackc.low %vm5737_vm0, %vm5735_vm5  ;;  %vm5745_vm13 = vcmp.eq.f32.partialorder %v5744_v56, %v5697_v0  ;;  %v5746_v18 = vld [vmem:[#allocation64_spill] sm:$0xff]  ;;  %v5748_v38 = vld [vmem:[#allocation65_spill] sm:$0xff] }
 0x350   : > { %2988 = vmatpush3.bf16.msk.msra.mxu0 %vm2916_vm1, %v3357_v51  ;;  %vm2938_vm11 = vmpackc.low %vm5741_vm10, %vm5739_vm3  ;;  %vm5743_vm1 = vcmp.eq.f32.partialorder %v5742_v5, %v5697_v0  ;;  %vm5749_vm2 = vcmp.eq.f32.partialorder %v5748_v38, %v5697_v0  ;;  %v5750_v63 = vld [vmem:[#allocation45_spill] sm:$0xff]  ;;  %v5752_v43 = vld [vmem:[#allocation46_spill] sm:$0xff] }
 0x351   : > { %2989 = vmatprep.subr.msk.bf16.mxu0 %vm2934_vm8, %v3357_v51  ;;  %vm2922_vm12 = vmpackc.low %vm5745_vm13, %vm5743_vm1  ;;  %vm5747_vm8 = vcmp.eq.f32.partialorder %v5746_v18, %v5697_v0  ;;  %vm5753_vm4 = vcmp.eq.f32.partialorder %v5752_v43, %v5697_v0  ;;  %v5754_v3 = vld [vmem:[#allocation66_spill] sm:$0xff]  ;;  %v5756_v8 = vld [vmem:[#allocation67_spill] sm:$0xff] }
 0x352   : > { %vm2940_vm7 = vmpackc.low %vm5749_vm2, %vm5747_vm8  ;;  %vm5757_vm5 = vcmp.eq.f32.partialorder %v5756_v8, %v5697_v0  ;;  %v5758_v55 = vld [vmem:[#allocation48_spill] sm:$0xff]  ;;  %v5759_v41 = vld [vmem:[#allocation49_spill] sm:$0xff] }
 0x353   : > { %v2501_v10 = vrot.slane %v2496_v30, %v5758_v55  ;;  %v5761_v22 = vld [vmem:[#allocation50_spill] sm:$0xff]  ;;  %v5763_v60 = vld [vmem:[#allocation47_spill] sm:$0xff] }
 0x354   : > { %2990 = vmatpush3.bf16.msk.msra.mxu0 %vm2918_vm6, %v3357_v51  ;;  %vm5751_vm6 = vcmp.eq.f32.partialorder %v5750_v63, %v5697_v0  ;;  %vm5762_vm3 = vcmp.eq.f32.partialorder %v5761_v22, %v5697_v0  ;;  %v5764_v4 = vld [vmem:[#allocation22_spill] sm:$0xff]  ;;  %v2553_v58 = vld [vmem:[%s3894_s9] sm:$0x1] }
 0x355   : > { %2991 = vmatprep.subr.msk.bf16.mxu0 %vm2936_vm15, %v3357_v51  ;;  %vm2924_vm9 = vmpackc.low %vm5753_vm4, %vm5751_vm6  ;;  %vm5755_vm15 = vcmp.eq.f32.partialorder %v5754_v3, %v5697_v0  ;;  %v2508_v28 = vpack.c.bf16 %v2501_v10, %v2501_v10  ;;  %vm5765_vm1 = vcmp.ne.f32.partialorder %v5764_v4, 0.0 }
 0x356   : > { %vm2942_vm0 = vmpackc.low %vm5757_vm5, %vm5755_vm15 }
 0x358   : > { %2992 = vmatpush3.bf16.msk.msra.mxu0 %vm2920_vm14, %v3357_v51  ;;  %vm5760_vm14 = vcmp.eq.f32.partialorder %v5759_v41, %v5697_v0 }
 0x359   : > { %2993 = vmatprep.subr.msk.bf16.mxu0 %vm2938_vm11, %v3357_v51  ;;  %vm2926_vm10 = vmpackc.low %vm5762_vm3, %vm5760_vm14  ;;  %vm2554_vm11 = vcmask 1040384  }
 0x35c   : > { %2994 = vmatpush3.bf16.msk.msra.mxu0 %vm2922_vm12, %v3357_v51 }
 0x35d   : > { %2995 = vmatprep.subr.msk.bf16.mxu0 %vm2940_vm7, %v3357_v51 }
 0x360   : > { %2996 = vmatpush3.bf16.msk.msra.mxu0 %vm2924_vm9, %v3357_v51 }
 0x361   : > { %2997 = vmatprep.subr.msk.bf16.mxu0 %vm2942_vm0, %v3357_v51 }
 0x364   : > { %2998 = vmatpush3.bf16.msk.msra.mxu0 %vm2926_vm10, %v3357_v51 }
 0x367   : > { %2543 = vmatmul.mubr.bf16.vlgmr.msra.gmra.mrb[0].mxu0 %v2508_v28 }
 0x43a   : > { %v2999_v13 = vpop.f32.mrb[0].mxu0 }
 0x43b   : > { %v3000_v57 = vpop.f32.mrb[1].mxu0 }
 0x43c   : > { %v3001_v20 = vadd.f32 %v3000_v57, %v2999_v13  ;;  %v3002_v48 = vpop.f32.mrb[2].mxu0 }
 0x43d   : > { %v3003_v49 = vpop.f32.mrb[3].mxu0 }
 0x43e   : > { %v2550_v36 = vsub.f32 %v5763_v60, %v3001_v20 }
 0x440   : > { %v2551_v40 = vand.u32 2147483647, %v2550_v36 }
 0x442   : > { %v2552_v52 = vsel %vm5765_vm1, %v2551_v40, 0.0 }
 0x443   : > { %v2555_v45 = vsel %vm2554_vm11, %v2552_v52, 0.0 }
 0x444   : > { %2556 = vadd.xlane.f32.xlu0 %v2555_v45 }
 0x4d1   : > { %v2557_v37 = vpop.xlane.xlu0 %2556 }
 0x4d2   : > { %v2558_v61 = vrot.slane %v2557_v37, 4 }
 0x4d4   : > { %v2559_v27 = vadd.f32 %v2558_v61, %v2557_v37 }
 0x4d6   : > { %v2560_v54 = vrot.slane %v2559_v27, 2 }
 0x4d8   : > { %v2561_v21 = vadd.f32 %v2560_v54, %v2559_v27 }
 0x4da   : > { %v2562_v17 = vrot.slane %v2561_v21, 1 }
 0x4dc   : > { %v2563_v23 = vadd.f32 %v2562_v17, %v2561_v21 }
 0x4de   : > { %3009 = vpush %v2563_v23 }
 0x50f   : > { %s3010_s22 = spop %3009 }
 0x510   : > { %v2565_v24 = vstv %s3010_s22 }
 0x511   : > { %v2566_v16 = vadd.f32 %v2565_v24, %v2553_v58 }
 0x513   : > { %2567 = vst [vmem:[%s3894_s9] sm:$0x1] %v2566_v16 }
 0x514 PF: > { %s2944_s14 = sshll.u32 %s3331_s23, 4  ;;  %s2581_s25 = sshll.u32 %s3894_s9, 4  ;;  %s2582_s25 = int_to_ptr.vmem [resolvable:$true] %s2581_s25 }
 0x515   : > { %s5319_s7 = scalar_lea.hbm %s5394_s4, %s2944_s14  ;;  %s2569_s6 = scalar_lea.sflag [#allocation7], %s290_s13 }
 0x516   : > { %s3205_s8 = scalar_lea.vmem %s2582_s25, 16  ;;  %p5766_p2 = scmp.ne.s32.totalorder %s5524_s12, 0 }
 0x517   : > { %p3206_p12 = scmp.ne.s32.totalorder %s2582_s25, %s3205_s8  ;;  %s3358_s5 = smov [#allocation10]  }
 0x518   : > { %s3209_s21 = sshll.u32 %s3358_s5, 4  ;;  %s3210_s21 = int_to_ptr.vmem [resolvable:$false] %s3209_s21 }
 0x519   : > { %p3207_p5 = pnand %p3206_p12, %p5766_p2  ;;  %s3211_s11 = scalar_lea.vmem %s3210_s21, 32 }
 0x51a   : > { %p3212_p3 = scmp.lt.s32.totalorder %s2582_s25, %s3210_s21  ;;  %p3213_p9 = scmp.lt.s32.totalorder %s3211_s11, %s3205_s8 }
 0x51b   : > { %p3208_p10 = pneg %p3207_p5 }
 0x51c   : > { %p3214_p7 = por %p3213_p9, %p3212_p3 }
 0x51e   : > { %p3215_p4 = pnand %p3214_p7, %p3208_p10 }
 0x520   : > { %3218 = shalt.err (!%p3215_p4)
}
 0x521   : > { %s3219_s23 = scalar_lea.hbm %s5319_s7, 16  ;;  %s3223_s29 = scalar_lea.hbm %s5394_s4, 48 }
 0x522   : > { %p3220_p11 = scmp.ne.s32.totalorder %s5319_s7, %s3219_s23  ;;  %p3224_p1 = scmp.lt.u32.totalorder %s5319_s7, %s5394_s4 }
 0x523   : > { %p3225_p6 = scmp.lt.u32.totalorder %s3223_s29, %s3219_s23  ;;  %p3227_p12 = scmp.lt.u32.totalorder %s3219_s23, %s5319_s7 }
 0x524   : > { %p3221_p13 = pnand %p3220_p11, %p5766_p2 }
 0x525   : > { %p3226_p8 = por %p3225_p6, %p3224_p1 }
 0x526   : > { %p3222_p0 = pneg %p3221_p13 }
 0x527   : > { %p3228_p5 = por %p3227_p12, %p3226_p8 }
 0x529   : > { %p3229_p10 = pnand %p3228_p5, %p3222_p0 }
 0x52b   : > { %3232 = shalt.err (!%p3229_p10)
}
 0x52c   : > { %3015 = dma.vmem_to_hbm [thread:$0]  (%p5766_p2), %s2582_s25, 16, %s5319_s7, %s2569_s6  }
 0x52d PF: > { %p3029_p3 = scmp.ge.s32.totalorder %s3347_s27, 2  ;;  %s2593_s22 = sand.u32 1, %s3299_s15  }
 0x52e   : > { %p5767_p9 = scmp.ne.s32.totalorder %s5525_s18, 0  ;;  %s2594_s14 = scalar_lea.sflag [#allocation7], %s2593_s22 }
 0x530   : > { %p3025_p7 = pnand %p3029_p3, %p5767_p9 }
 0x532   : > { %3294 = dma.done.wait (!%p3025_p7), %s2594_s14, 16  }
 0x533   : > { %3296 = vsyncadd (!%p3025_p7), %s2594_s14, 4294967280  ;;  %s23_s27 = sadd.s32 1, %s3347_s27   ;;  %s5769_s12 = sld [smem:[#allocation20_spill]] }
 0x534   : > { %p5346_p4 = scmp.ge.s32.totalorder %s23_s27, 14   ;;  %s5770_s21 = sld [smem:[#allocation14_spill]] }
 0x535   : > { %s5771_s22 = sld [smem:[#allocation15_spill]]  ;;  %s5772_s23 = sld [smem:[#allocation16_spill]] }
 0x536   : > { %s5773_s24 = sld [smem:[#allocation17_spill]]  ;;  %s5774_s25 = sld [smem:[#allocation18_spill]] }
 0x537   : > { %s5775_s26 = sld [smem:[#allocation19_spill]]  ;;  %s5776_s15 = smov %s3303_s16 }
 0x538   : > { %s5777_s16 = smov %s3307_s17  ;;  %s5778_s17 = smov %s3491_s28 }
 0x539   : > { %s5779_s18 = smov %s3315_s19  ;;  %s5780_s19 = smov %s3319_s20 }
 0x53a   : > { %s5781_s20 = smov %s5769_s12  ;;  %22 = sbr.rel (!%p5346_p4) target bundleno = 12 (0xc), region = 116 }
 0x541   :  { %2598 = vsyncpa [#allocation6], 1 }
 0x542   :  { %2600 = vsyncpa [#allocation6 + $0x1], 1 }
 0x543   :  { %2601 = vsyncpa [#allocation9], 1 }
 0x544   :  { %2603 = vsyncpa [#allocation9 + $0x1], 1 }
 0x545   :  { %2604 = vsyncpa [#allocation7], 1 }
 0x546   :  { %2606 = vsyncpa [#allocation7 + $0x1], 1 }

</bundles_post_ra>
